<compile_context>
chip_gen: v7x
topology: tpu7x:2x2x1
jax: 0.10.0
libtpu: 0.0.40
codegen_flags: <defaults>
</compile_context>

<pallas_src>
import functools

import jax
import jax.numpy as jnp
from jax.experimental import pallas as pl
from jax.experimental.pallas import tpu as pltpu


MATMUL_DTYPE = jnp.bfloat16        # MXU operand / activation dtype (accumulation f32)


# ------------------------------- helpers ------------------------------------

def _round_up(x, m):
    return (x + m - 1) // m * m


def _pad_to(a, shape):
    return jnp.pad(a, [(0, s - d) for d, s in zip(a.shape, shape)])


def _pad_gate_cols(w, h, hp):
    """Pad last dim (= 4*h, PyTorch gate order [i, f, g, o]) per gate block to 4*hp."""
    if hp == h:
        return w
    parts = jnp.split(w, 4, axis=-1)
    pad = [(0, 0)] * (w.ndim - 1) + [(0, hp - h)]
    return jnp.concatenate([jnp.pad(p, pad) for p in parts], axis=-1)


def _pick_tile(dim, candidates):
    for c in candidates:
        if dim >= c and dim % c == 0:
            return c
    return dim


def _sigmoid(x):
    # tanh form: fewer EUP ops than exp+divide on the serial recurrence chain.
    return 0.5 * jnp.tanh(0.5 * x) + 0.5


def _vmem_limit_bytes():
    """Per-core VMEM limit with headroom, derived from the actual chip (v5e/v6e: 128 MiB,
    v7x: 64 MiB).  Conservative fallback if the query is unavailable."""
    cap = 64 * 1024 * 1024
    try:
        val = getattr(pltpu.get_tpu_info(), "vmem_capacity_bytes", None)
        if val:
            cap = int(val)
    except Exception:
        pass
    return min(int(cap * 7 // 8), 112 * 1024 * 1024)


def _num_tensorcores():
    """Best-effort TensorCores-per-chip query (v7x: 2).  Falls back to 1 (no batch split)."""
    try:
        info = pltpu.get_tpu_info()
        for name in ("num_cores", "core_count", "num_tensorcores", "tensorcores_per_chip"):
            val = getattr(info, name, None)
            if isinstance(val, int) and val >= 1:
                return val
    except Exception:
        pass
    try:
        val = getattr(jax.devices()[0], "num_cores", None)
        if isinstance(val, int) and val >= 1:
            return val
    except Exception:
        pass
    return 1


def _pick_t_chunk(t, bpc, e_max, hp, vmem_limit):
    """Largest power-of-two time chunk whose working set fits the VMEM budget:
    2x dbl-buffered bf16 x blocks + 2x dbl-buffered bf16 out blocks + f32 gate scratch
    (+ matmul-temp headroom) + resident bf16 W_ih/W_hh + f32 h/c/bias scratch."""
    budget = int(vmem_limit * 0.8)
    fixed = 2 * 4 * hp * (e_max + hp) + 2 * bpc * hp * 4 + 4 * hp * 4
    per_t = bpc * (4 * e_max + 4 * hp + 32 * hp)
    tc = max(1, (budget - fixed) // per_t) if budget > fixed else 1
    tc = int(max(1, min(tc, 128, t)))
    return 1 << (tc.bit_length() - 1)          # round down to a power of two


# ----------------------------- Pallas kernels --------------------------------

def matmul_bias_kernel(x_ref, w_ref, b_ref, o_ref, acc_ref):
    """Tiled (TN, TK) @ (TK, TM) + bias with f32 VMEM accumulator over the K grid axis."""
    @pl.when(pl.program_id(2) == 0)
    def _():
        acc_ref[...] = jnp.zeros_like(acc_ref)

    acc_ref[...] += jnp.dot(x_ref[...], w_ref[...],
                            preferred_element_type=jnp.float32)

    @pl.when(pl.program_id(2) == pl.num_programs(2) - 1)
    def _():
        o_ref[...] = (acc_ref[...] + b_ref[...]).astype(o_ref.dtype)


def lstm_layer_kernel(x_ref, wih_ref, b_ref, whh_ref, o_ref, g_scr, h_scr, c_scr,
                      *, unroll):
    """One fused LSTM-layer chunk:
      1) chunk-level input projection (MXU): g = x @ W_ih + (b_ih + b_hh)  -> VMEM scratch
      2) T_CHUNK serial steps: gates = g[t] + h @ W_hh^T, elementwise cell update (f32).
    h/c state persists in VMEM scratch across time chunks; carried in vregs within a chunk.
    """
    @pl.when(pl.program_id(1) == 0)
    def _():
        h_scr[...] = jnp.zeros_like(h_scr)
        c_scr[...] = jnp.zeros_like(c_scr)

    t_chunk, bpc, hp = o_ref.shape

    # Hoisted (per-chunk) input projection: full-utilization MXU matmul, f32 accumulation.
    g_scr[...] = jnp.dot(x_ref[...], wih_ref[...],
                         preferred_element_type=jnp.float32) + b_ref[...]

    def step(t, carry):
        h, c = carry                                           # f32 (Bpc, Hp) in vregs
        r0 = pl.multiple_of(t * bpc, bpc)
        gates = g_scr[pl.ds(r0, bpc), :] + jnp.dot(
            h.astype(whh_ref.dtype), whh_ref[...],
            preferred_element_type=jnp.float32)
        i = _sigmoid(gates[:, 0 * hp:1 * hp])
        f = _sigmoid(gates[:, 1 * hp:2 * hp])
        g = jnp.tanh(gates[:, 2 * hp:3 * hp])
        o = _sigmoid(gates[:, 3 * hp:4 * hp])
        c = f * c + i * g
        h = o * jnp.tanh(c)
        o_ref[t] = h.astype(o_ref.dtype)
        return (h, c)

    h_fin, c_fin = jax.lax.fori_loop(0, t_chunk, step,
                                     (h_scr[...], c_scr[...]), unroll=unroll)
    h_scr[...] = h_fin
    c_scr[...] = c_fin


# ------------------------------ wrappers --------------------------------------

def matmul_bias(x, w, b, *, vmem_limit, out_dtype=jnp.float32):
    """(N, K) @ (K, M) + b -> (N, M).  K and M must be multiples of 128; x/w pre-cast."""
    n, k = x.shape
    m = w.shape[1]
    tk = _pick_tile(k, (512, 256, 128))
    tm = _pick_tile(m, (1024, 512, 256, 128))
    if n >= 1024:
        tn = 1024
    elif n >= 512:
        tn = 512
    elif n >= 256:
        tn = 256
    else:
        tn = _round_up(n, 8)
    np_ = _round_up(n, tn)
    if np_ != n:
        x = jnp.pad(x, ((0, np_ - n), (0, 0)))

    out = pl.pallas_call(
        matmul_bias_kernel,
        out_shape=jax.ShapeDtypeStruct((np_, m), out_dtype),
        grid_spec=pltpu.PrefetchScalarGridSpec(
            num_scalar_prefetch=0,
            grid=(np_ // tn, m // tm, k // tk),
            in_specs=[
                pl.BlockSpec((tn, tk), lambda i, j, kk: (i, kk)),
                pl.BlockSpec((tk, tm), lambda i, j, kk: (kk, j)),
                pl.BlockSpec((1, tm), lambda i, j, kk: (0, j)),
            ],
            out_specs=pl.BlockSpec((tn, tm), lambda i, j, kk: (i, j)),
            scratch_shapes=[pltpu.VMEM((tn, tm), jnp.float32)],
        ),
        compiler_params=pltpu.CompilerParams(
            dimension_semantics=("parallel", "parallel", "arbitrary"),
            vmem_limit_bytes=vmem_limit),
    )(x, w, b)
    return out[:n]


def lstm_layer(x, wih, bias, whh, *, bpc, t_chunk, vmem_limit):
    """x: (NB, Tp*Bpc, E) bf16.  Returns (NB, Tp, Bpc, Hp) bf16 hidden states."""
    nb, rows, e_p = x.shape
    hp = whh.shape[0]
    g4 = 4 * hp
    tp = rows // bpc
    n_tc = tp // t_chunk

    # adaptive unroll of the serial time loop: full only for small per-step gate state
    step_bytes = bpc * g4 * 4
    unroll = min(t_chunk, 16) if step_bytes <= 16 * 4096 else min(t_chunk, 4)

    kernel = functools.partial(lstm_layer_kernel, unroll=unroll)

    return pl.pallas_call(
        kernel,
        out_shape=jax.ShapeDtypeStruct((nb, tp, bpc, hp), x.dtype),
        grid_spec=pltpu.PrefetchScalarGridSpec(
            num_scalar_prefetch=0,
            grid=(nb, n_tc),
            in_specs=[
                pl.BlockSpec((None, t_chunk * bpc, e_p), lambda bi, ti: (bi, ti, 0)),
                # constant index maps -> weights stay VMEM-resident, single-buffered
                pl.BlockSpec((e_p, g4), lambda bi, ti: (0, 0),
                             pipeline_mode=pl.Buffered(1)),
                pl.BlockSpec((1, g4), lambda bi, ti: (0, 0),
                             pipeline_mode=pl.Buffered(1)),
                pl.BlockSpec((hp, g4), lambda bi, ti: (0, 0),
                             pipeline_mode=pl.Buffered(1)),
            ],
            out_specs=pl.BlockSpec((None, t_chunk, bpc, hp),
                                   lambda bi, ti: (bi, ti, 0, 0)),
            scratch_shapes=[
                pltpu.VMEM((t_chunk * bpc, g4), jnp.float32),   # chunk gate pre-acts
                pltpu.VMEM((bpc, hp), jnp.float32),             # h state
                pltpu.VMEM((bpc, hp), jnp.float32),             # c state
            ],
        ),
        compiler_params=pltpu.CompilerParams(
            dimension_semantics=("parallel", "arbitrary"),
            vmem_limit_bytes=vmem_limit),
    )(x, wih, bias, whh)


def prepare_params(params, matmul_dtype=MATMUL_DTYPE):
    """Pad to lane/sublane-friendly shapes and pre-cast matmul operands to bf16 ONCE."""
    v, e = params["embedding"].shape
    h = params["lstm"][0][1].shape[0]
    e_p, hp, vp = _round_up(e, 128), _round_up(h, 128), _round_up(v, 128)

    emb_p = _pad_to(params["embedding"], (v, e_p)).astype(matmul_dtype)
    layers = []
    for wih_t, whh_t, bias in params["lstm"]:
        e_in = wih_t.shape[0]
        wih_p = _pad_to(_pad_gate_cols(wih_t, h, hp),
                        (_round_up(e_in, 128), 4 * hp)).astype(matmul_dtype)
        whh_p = _pad_to(_pad_gate_cols(whh_t, h, hp), (hp, 4 * hp)).astype(matmul_dtype)
        bias_p = _pad_gate_cols(bias, h, hp).astype(jnp.float32)   # (1, 4*Hp)
        layers.append((wih_p, bias_p, whh_p))
    fc_w_p = _pad_to(params["fc_w"], (hp, vp)).astype(matmul_dtype)
    fc_b_p = _pad_to(params["fc_b"], (1, vp)).astype(jnp.float32)
    return {"embedding": emb_p, "lstm": layers, "fc_w": fc_w_p, "fc_b": fc_b_p}


def lstm_language_model_forward(x_ids, p, *, vocab_size):
    """Embedding -> n_layers fused LSTM -> Linear.  Returns (B, T, V) f32 logits."""
    b, t = x_ids.shape
    emb = p["embedding"]
    e_p = emb.shape[1]
    hp = p["lstm"][0][2].shape[0]
    vp = p["fc_w"].shape[1]

    vmem_limit = _vmem_limit_bytes()
    cores = _num_tensorcores()

    bp = _round_up(b, 8)
    nb = 1
    for cand in (4, 2):                       # batch-split only on multi-TC chips (v7x)
        if cores >= cand and bp % (8 * cand) == 0:
            nb = cand
            break
    bpc = bp // nb

    t_chunk = _pick_t_chunk(t, bpc, max(e_p, hp), hp, vmem_limit)
    tp = _round_up(t, t_chunk)

    # ---- embedding gather, directly into the (NB, T, Bpc, Ep) blocked time-major layout
    # TODO(synk): fuse this gather into the first layer kernel (scalar-prefetch ids +
    # manual DMA row gather) to avoid materializing the (T*Bp, Ep) activation in HBM.
    ids = jnp.pad(x_ids, ((0, bp - b), (0, 0)))                  # (Bp, T)
    ids = ids.T.reshape(t, nb, bpc).transpose(1, 0, 2)           # (NB, T, Bpc)
    x = jnp.take(emb, ids, axis=0)                               # (NB, T, Bpc, Ep) bf16
    if tp != t:
        x = jnp.pad(x, ((0, 0), (0, tp - t), (0, 0), (0, 0)))
    x = x.reshape(nb, tp * bpc, e_p)
    # dropout on the embedding: identity (inference semantics)

    out4 = None
    for wih_p, bias_p, whh_p in p["lstm"]:
        out4 = lstm_layer(x, wih_p, bias_p, whh_p, bpc=bpc, t_chunk=t_chunk,
                          vmem_limit=vmem_limit)                 # (NB, Tp, Bpc, Hp) bf16
        x = out4.reshape(nb, tp * bpc, hp)
        # inter-layer / output dropout: identity (inference semantics)

    # transpose the (small) hidden tensor to batch-major before the FC, not the logits
    hid = out4[:, :t].transpose(0, 2, 1, 3).reshape(bp * t, hp)  # (Bp*T, Hp) bf16
    logits = matmul_bias(hid, p["fc_w"], p["fc_b"], vmem_limit=vmem_limit)
    logits = logits.reshape(bp, t, vp)
    return logits[:b, :, :vocab_size]


# --------------------------- pure-JAX reference -------------------------------

def reference_forward(x_ids, params, matmul_dtype=jnp.float32):
    """lax.scan reference; matmul_dtype emulates the kernel's MXU operand cast."""
    def mm(a, w):
        return jnp.dot(a.astype(matmul_dtype), w.astype(matmul_dtype),
                       preferred_element_type=jnp.float32)

    emb = jnp.take(params["embedding"], x_ids, axis=0)           # (B, T, E)
    h_seq = jnp.transpose(emb, (1, 0, 2))                        # (T, B, E)
    for wih_t, whh_t, bias in params["lstm"]:
        hdim = whh_t.shape[0]
        bdim = h_seq.shape[1]
        gates_in = (mm(h_seq.reshape(-1, h_seq.shape[-1]), wih_t) + bias[0]
                    ).reshape(h_seq.shape[0], bdim, 4 * hdim)

        def step(carry, g_in):
            hh, cc = carry
            gates = g_in + mm(hh, whh_t)
            i = jax.nn.sigmoid(gates[:, 0:hdim])
            f = jax.nn.sigmoid(gates[:, hdim:2 * hdim])
            g = jnp.tanh(gates[:, 2 * hdim:3 * hdim])
            o = jax.nn.sigmoid(gates[:, 3 * hdim:4 * hdim])
            cc = f * cc + i * g
            hh = o * jnp.tanh(cc)
            return (hh, cc), hh

        init = (jnp.zeros((bdim, hdim), jnp.float32),
                jnp.zeros((bdim, hdim), jnp.float32))
        _, h_seq = jax.lax.scan(step, init, gates_in)
    out = jnp.transpose(h_seq, (1, 0, 2))                        # (B, T, H)
    logits = mm(out.reshape(-1, out.shape[-1]), params["fc_w"]) + params["fc_b"][0]
    return logits.reshape(out.shape[0], out.shape[1], -1)


# --------------------------------- init ---------------------------------------

def init_params(key, vocab_size, embedding_dim, hidden_dim, n_layers, pad_idx):
    keys = jax.random.split(key, 2 + 4 * n_layers + 2)
    ki = iter(keys)

    emb = jax.random.normal(next(ki), (vocab_size, embedding_dim), jnp.float32)
    emb = emb.at[pad_idx].set(0.0)                               # padding_idx row = 0

    bound = 1.0 / float(jnp.sqrt(hidden_dim))
    lstm_params = []
    for layer in range(n_layers):
        in_dim = embedding_dim if layer == 0 else hidden_dim
        w_ih = jax.random.uniform(next(ki), (4 * hidden_dim, in_dim),
                                  jnp.float32, -bound, bound)
        w_hh = jax.random.uniform(next(ki), (4 * hidden_dim, hidden_dim),
                                  jnp.float32, -bound, bound)
        b_ih = jax.random.uniform(next(ki), (4 * hidden_dim,),
                                  jnp.float32, -bound, bound)
        b_hh = jax.random.uniform(next(ki), (4 * hidden_dim,),
                                  jnp.float32, -bound, bound)
        lstm_params.append((w_ih.T, w_hh.T, (b_ih + b_hh)[None, :]))

    fc_w = jax.random.uniform(next(ki), (vocab_size, hidden_dim),
                              jnp.float32, -bound, bound)
    fc_b = jax.random.uniform(next(ki), (vocab_size,),
                              jnp.float32, -bound, bound)

    return {"embedding": emb, "lstm": lstm_params,
            "fc_w": fc_w.T, "fc_b": fc_b[None, :]}


# --------------------------------- main ----------------------------------------

if __name__ == "__main__":
    VOCAB, EMB, HID, LAYERS, PAD = 64, 32, 32, 2, 0
    B, T = 2, 8

    key = jax.random.PRNGKey(0)
    k_param, k_x = jax.random.split(key)
    params = init_params(k_param, VOCAB, EMB, HID, LAYERS, PAD)
    prepped = prepare_params(params)
    x_ids = jax.random.randint(k_x, (B, T), 0, VOCAB, dtype=jnp.int32)

    fwd = jax.jit(functools.partial(lstm_language_model_forward, vocab_size=VOCAB))
    logits = jax.block_until_ready(fwd(x_ids, prepped))
    assert logits.shape == (B, T, VOCAB)

    # precision-matched reference (same bf16 MXU operand casts, f32 accumulation)
    ref_matched = jax.block_until_ready(
        reference_forward(x_ids, params, matmul_dtype=MATMUL_DTYPE))
    assert jnp.allclose(logits, ref_matched, atol=3e-3, rtol=3e-3), \
        "mismatch vs precision-matched reference"

    # full-f32 reference (PyTorch semantics); looser tolerance only from bf16 operands
    ref_f32 = jax.block_until_ready(
        reference_forward(x_ids, params, matmul_dtype=jnp.float32))
    assert jnp.allclose(logits, ref_f32, atol=5e-2, rtol=5e-2), \
        "mismatch vs f32 reference"

    print("KERNEL_OK")
</pallas_src>

<mosaic_0001>
module attributes {stable_mosaic.version = 11 : i64} {
  func.func @lstm_layer_kernel(%arg0: i32, %arg1: i32, %arg2: memref<1x64x128xbf16, #tpu.memory_space<vmem>>, %arg3: memref<128x512xbf16, #tpu.memory_space<vmem>>, %arg4: memref<1x512xf32, #tpu.memory_space<vmem>>, %arg5: memref<128x512xbf16, #tpu.memory_space<vmem>>, %arg6: memref<1x8x8x128xbf16, #tpu.memory_space<vmem>>, %arg7: memref<64x512xf32, #tpu.memory_space<vmem>>, %arg8: memref<8x128xf32, #tpu.memory_space<vmem>>, %arg9: memref<8x128xf32, #tpu.memory_space<vmem>>) attributes {dimension_semantics = [#tpu.dimension_semantics<parallel>, #tpu.dimension_semantics<arbitrary>], iteration_bounds = array<i64: 1, 1>, scalar_prefetch = 0 : i64, scratch_operands = 3 : i64, tpu.core_type = #tpu.core_type<tc>, window_params = [{transform_indices = @transform_0, window_bounds = array<i64: 1, 64, 128>}, {pipeline_mode = #tpu.pipeline_mode<synchronous>, transform_indices = @transform_1, window_bounds = array<i64: 128, 512>}, {pipeline_mode = #tpu.pipeline_mode<synchronous>, transform_indices = @transform_2, window_bounds = array<i64: 1, 512>}, {pipeline_mode = #tpu.pipeline_mode<synchronous>, transform_indices = @transform_3, window_bounds = array<i64: 128, 512>}, {transform_indices = @transform_4, window_bounds = array<i64: 1, 8, 8, 128>}]} {
    %c0_i32 = arith.constant 0 : i32
    %0 = arith.cmpi eq, %arg1, %c0_i32 : i32
    %1 = arith.extui %0 : i1 to i32
    %c0_i32_0 = arith.constant 0 : i32
    %2 = arith.cmpi ne, %1, %c0_i32_0 : i32
    scf.if %2 {
      %cst_154 = arith.constant 0.000000e+00 : f32
      %367 = vector.broadcast %cst_154 : f32 to vector<8x128xf32>
      %c0_155 = arith.constant 0 : index
      %c0_156 = arith.constant 0 : index
      %368 = vector.load %arg8[%c0_155, %c0_156] : memref<8x128xf32, #tpu.memory_space<vmem>>, vector<8x128xf32>
      tpu.vector_store %arg8[%c0_155, %c0_156], %367 {strides = array<i32>} : memref<8x128xf32, #tpu.memory_space<vmem>>, vector<8x128xf32>,
      %cst_157 = arith.constant 0.000000e+00 : f32
      %369 = vector.broadcast %cst_157 : f32 to vector<8x128xf32>
      %c0_158 = arith.constant 0 : index
      %c0_159 = arith.constant 0 : index
      %370 = vector.load %arg9[%c0_158, %c0_159] : memref<8x128xf32, #tpu.memory_space<vmem>>, vector<8x128xf32>
      tpu.vector_store %arg9[%c0_158, %c0_159], %369 {strides = array<i32>} : memref<8x128xf32, #tpu.memory_space<vmem>>, vector<8x128xf32>,
    } else {
    }
    %c0 = arith.constant 0 : index
    %c0_1 = arith.constant 0 : index
    %c0_2 = arith.constant 0 : index
    %3 = vector.load %arg2[%c0, %c0_1, %c0_2] : memref<1x64x128xbf16, #tpu.memory_space<vmem>>, vector<1x64x128xbf16>
    %4 = vector.shape_cast %3 : vector<1x64x128xbf16> to vector<64x128xbf16>
    %c0_3 = arith.constant 0 : index
    %c0_4 = arith.constant 0 : index
    %5 = vector.load %arg3[%c0_3, %c0_4] : memref<128x512xbf16, #tpu.memory_space<vmem>>, vector<128x512xbf16>
    %cst = arith.constant dense<0.000000e+00> : vector<64x512xf32>
    %6 = tpu.matmul %4, %5, %cst {dimension_numbers = #tpu.dot_dimension_numbers<[1], [0], [0], [1], [0, 0, 1, 1], [], []>} : vector<64x128xbf16>, vector<128x512xbf16>, vector<64x512xf32> -> vector<64x512xf32>
    %c0_5 = arith.constant 0 : index
    %c0_6 = arith.constant 0 : index
    %7 = vector.load %arg4[%c0_5, %c0_6] : memref<1x512xf32, #tpu.memory_space<vmem>>, vector<1x512xf32>
    %8 = vector.broadcast %7 : vector<1x512xf32> to vector<64x512xf32>
    %9 = arith.addf %6, %8 : vector<64x512xf32>
    %c0_7 = arith.constant 0 : index
    %c0_8 = arith.constant 0 : index
    %10 = vector.load %arg7[%c0_7, %c0_8] : memref<64x512xf32, #tpu.memory_space<vmem>>, vector<64x512xf32>
    tpu.vector_store %arg7[%c0_7, %c0_8], %9 {strides = array<i32>} : memref<64x512xf32, #tpu.memory_space<vmem>>, vector<64x512xf32>,
    %c0_9 = arith.constant 0 : index
    %c0_10 = arith.constant 0 : index
    %11 = vector.load %arg8[%c0_9, %c0_10] : memref<8x128xf32, #tpu.memory_space<vmem>>, vector<8x128xf32>
    %c0_11 = arith.constant 0 : index
    %c0_12 = arith.constant 0 : index
    %12 = vector.load %arg9[%c0_11, %c0_12] : memref<8x128xf32, #tpu.memory_space<vmem>>, vector<8x128xf32>
    %c0_i32_13 = arith.constant 0 : i32
    %c8_i32 = arith.constant 8 : i32
    %13 = arith.muli %c0_i32_13, %c8_i32 : i32
    %14 = tpu.assume_multiple %13, 8 : i32
    %15 = arith.index_cast %14 : i32 to index
    %c0_14 = arith.constant 0 : index
    %16 = vector.load %arg7[%15, %c0_14] : memref<64x512xf32, #tpu.memory_space<vmem>>, vector<8x512xf32>
    %17 = arith.truncf %11 : vector<8x128xf32> to vector<8x128xbf16>
    %c0_15 = arith.constant 0 : index
    %c0_16 = arith.constant 0 : index
    %18 = vector.load %arg5[%c0_15, %c0_16] : memref<128x512xbf16, #tpu.memory_space<vmem>>, vector<128x512xbf16>
    %cst_17 = arith.constant dense<0.000000e+00> : vector<8x512xf32>
    %19 = tpu.matmul %17, %18, %cst_17 {dimension_numbers = #tpu.dot_dimension_numbers<[1], [0], [0], [1], [0, 0, 1, 1], [], []>} : vector<8x128xbf16>, vector<128x512xbf16>, vector<8x512xf32> -> vector<8x512xf32>
    %20 = arith.addf %16, %19 : vector<8x512xf32>
    %21 = vector.extract_strided_slice %20 {offsets = [0, 0], sizes = [8, 128], strides = [1, 1]} : vector<8x512xf32> to vector<8x128xf32>
    %cst_18 = arith.constant 5.000000e-01 : f32
    %22 = vector.broadcast %cst_18 : f32 to vector<8x128xf32>
    %23 = arith.mulf %22, %21 : vector<8x128xf32>
    %24 = math.tanh %23 : vector<8x128xf32>
    %cst_19 = arith.constant 5.000000e-01 : f32
    %25 = vector.broadcast %cst_19 : f32 to vector<8x128xf32>
    %26 = arith.mulf %25, %24 : vector<8x128xf32>
    %cst_20 = arith.constant 5.000000e-01 : f32
    %27 = vector.broadcast %cst_20 : f32 to vector<8x128xf32>
    %28 = arith.addf %26, %27 : vector<8x128xf32>
    %29 = vector.extract_strided_slice %20 {offsets = [0, 128], sizes = [8, 128], strides = [1, 1]} : vector<8x512xf32> to vector<8x128xf32>
    %cst_21 = arith.constant 5.000000e-01 : f32
    %30 = vector.broadcast %cst_21 : f32 to vector<8x128xf32>
    %31 = arith.mulf %30, %29 : vector<8x128xf32>
    %32 = math.tanh %31 : vector<8x128xf32>
    %cst_22 = arith.constant 5.000000e-01 : f32
    %33 = vector.broadcast %cst_22 : f32 to vector<8x128xf32>
    %34 = arith.mulf %33, %32 : vector<8x128xf32>
    %cst_23 = arith.constant 5.000000e-01 : f32
    %35 = vector.broadcast %cst_23 : f32 to vector<8x128xf32>
    %36 = arith.addf %34, %35 : vector<8x128xf32>
    %37 = vector.extract_strided_slice %20 {offsets = [0, 256], sizes = [8, 128], strides = [1, 1]} : vector<8x512xf32> to vector<8x128xf32>
    %38 = math.tanh %37 : vector<8x128xf32>
    %39 = vector.extract_strided_slice %20 {offsets = [0, 384], sizes = [8, 128], strides = [1, 1]} : vector<8x512xf32> to vector<8x128xf32>
    %cst_24 = arith.constant 5.000000e-01 : f32
    %40 = vector.broadcast %cst_24 : f32 to vector<8x128xf32>
    %41 = arith.mulf %40, %39 : vector<8x128xf32>
    %42 = math.tanh %41 : vector<8x128xf32>
    %cst_25 = arith.constant 5.000000e-01 : f32
    %43 = vector.broadcast %cst_25 : f32 to vector<8x128xf32>
    %44 = arith.mulf %43, %42 : vector<8x128xf32>
    %cst_26 = arith.constant 5.000000e-01 : f32
    %45 = vector.broadcast %cst_26 : f32 to vector<8x128xf32>
    %46 = arith.addf %44, %45 : vector<8x128xf32>
    %47 = arith.mulf %36, %12 : vector<8x128xf32>
    %48 = arith.mulf %28, %38 : vector<8x128xf32>
    %49 = arith.addf %47, %48 : vector<8x128xf32>
    %50 = math.tanh %49 : vector<8x128xf32>
    %51 = arith.mulf %46, %50 : vector<8x128xf32>
    %52 = arith.truncf %51 : vector<8x128xf32> to vector<8x128xbf16>
    %c0_27 = arith.constant 0 : index
    %53 = arith.index_cast %c0_i32_13 : i32 to index
    %c0_28 = arith.constant 0 : index
    %c0_29 = arith.constant 0 : index
    %54 = vector.load %arg6[%c0_27, %53, %c0_28, %c0_29] : memref<1x8x8x128xbf16, #tpu.memory_space<vmem>>, vector<1x1x8x128xbf16>
    %55 = vector.shape_cast %54 : vector<1x1x8x128xbf16> to vector<8x128xbf16>
    %56 = vector.shape_cast %52 : vector<8x128xbf16> to vector<1x1x8x128xbf16>
    tpu.vector_store %arg6[%c0_27, %53, %c0_28, %c0_29], %56 {strides = array<i32>} : memref<1x8x8x128xbf16, #tpu.memory_space<vmem>>, vector<1x1x8x128xbf16>,
    %c1_i32 = arith.constant 1 : i32
    %c8_i32_30 = arith.constant 8 : i32
    %57 = arith.muli %c1_i32, %c8_i32_30 : i32
    %58 = tpu.assume_multiple %57, 8 : i32
    %59 = arith.index_cast %58 : i32 to index
    %c0_31 = arith.constant 0 : index
    %60 = vector.load %arg7[%59, %c0_31] : memref<64x512xf32, #tpu.memory_space<vmem>>, vector<8x512xf32>
    %61 = arith.truncf %51 : vector<8x128xf32> to vector<8x128xbf16>
    %c0_32 = arith.constant 0 : index
    %c0_33 = arith.constant 0 : index
    %62 = vector.load %arg5[%c0_32, %c0_33] : memref<128x512xbf16, #tpu.memory_space<vmem>>, vector<128x512xbf16>
    %cst_34 = arith.constant dense<0.000000e+00> : vector<8x512xf32>
    %63 = tpu.matmul %61, %62, %cst_34 {dimension_numbers = #tpu.dot_dimension_numbers<[1], [0], [0], [1], [0, 0, 1, 1], [], []>} : vector<8x128xbf16>, vector<128x512xbf16>, vector<8x512xf32> -> vector<8x512xf32>
    %64 = arith.addf %60, %63 : vector<8x512xf32>
    %65 = vector.extract_strided_slice %64 {offsets = [0, 0], sizes = [8, 128], strides = [1, 1]} : vector<8x512xf32> to vector<8x128xf32>
    %cst_35 = arith.constant 5.000000e-01 : f32
    %66 = vector.broadcast %cst_35 : f32 to vector<8x128xf32>
    %67 = arith.mulf %66, %65 : vector<8x128xf32>
    %68 = math.tanh %67 : vector<8x128xf32>
    %cst_36 = arith.constant 5.000000e-01 : f32
    %69 = vector.broadcast %cst_36 : f32 to vector<8x128xf32>
    %70 = arith.mulf %69, %68 : vector<8x128xf32>
    %cst_37 = arith.constant 5.000000e-01 : f32
    %71 = vector.broadcast %cst_37 : f32 to vector<8x128xf32>
    %72 = arith.addf %70, %71 : vector<8x128xf32>
    %73 = vector.extract_strided_slice %64 {offsets = [0, 128], sizes = [8, 128], strides = [1, 1]} : vector<8x512xf32> to vector<8x128xf32>
    %cst_38 = arith.constant 5.000000e-01 : f32
    %74 = vector.broadcast %cst_38 : f32 to vector<8x128xf32>
    %75 = arith.mulf %74, %73 : vector<8x128xf32>
    %76 = math.tanh %75 : vector<8x128xf32>
    %cst_39 = arith.constant 5.000000e-01 : f32
    %77 = vector.broadcast %cst_39 : f32 to vector<8x128xf32>
    %78 = arith.mulf %77, %76 : vector<8x128xf32>
    %cst_40 = arith.constant 5.000000e-01 : f32
    %79 = vector.broadcast %cst_40 : f32 to vector<8x128xf32>
    %80 = arith.addf %78, %79 : vector<8x128xf32>
    %81 = vector.extract_strided_slice %64 {offsets = [0, 256], sizes = [8, 128], strides = [1, 1]} : vector<8x512xf32> to vector<8x128xf32>
    %82 = math.tanh %81 : vector<8x128xf32>
    %83 = vector.extract_strided_slice %64 {offsets = [0, 384], sizes = [8, 128], strides = [1, 1]} : vector<8x512xf32> to vector<8x128xf32>
    %cst_41 = arith.constant 5.000000e-01 : f32
    %84 = vector.broadcast %cst_41 : f32 to vector<8x128xf32>
    %85 = arith.mulf %84, %83 : vector<8x128xf32>
    %86 = math.tanh %85 : vector<8x128xf32>
    %cst_42 = arith.constant 5.000000e-01 : f32
    %87 = vector.broadcast %cst_42 : f32 to vector<8x128xf32>
    %88 = arith.mulf %87, %86 : vector<8x128xf32>
    %cst_43 = arith.constant 5.000000e-01 : f32
    %89 = vector.broadcast %cst_43 : f32 to vector<8x128xf32>
    %90 = arith.addf %88, %89 : vector<8x128xf32>
    %91 = arith.mulf %80, %49 : vector<8x128xf32>
    %92 = arith.mulf %72, %82 : vector<8x128xf32>
    %93 = arith.addf %91, %92 : vector<8x128xf32>
    %94 = math.tanh %93 : vector<8x128xf32>
    %95 = arith.mulf %90, %94 : vector<8x128xf32>
    %96 = arith.truncf %95 : vector<8x128xf32> to vector<8x128xbf16>
    %c0_44 = arith.constant 0 : index
    %97 = arith.index_cast %c1_i32 : i32 to index
    %c0_45 = arith.constant 0 : index
    %c0_46 = arith.constant 0 : index
    %98 = vector.load %arg6[%c0_44, %97, %c0_45, %c0_46] : memref<1x8x8x128xbf16, #tpu.memory_space<vmem>>, vector<1x1x8x128xbf16>
    %99 = vector.shape_cast %98 : vector<1x1x8x128xbf16> to vector<8x128xbf16>
    %100 = vector.shape_cast %96 : vector<8x128xbf16> to vector<1x1x8x128xbf16>
    tpu.vector_store %arg6[%c0_44, %97, %c0_45, %c0_46], %100 {strides = array<i32>} : memref<1x8x8x128xbf16, #tpu.memory_space<vmem>>, vector<1x1x8x128xbf16>,
    %c2_i32 = arith.constant 2 : i32
    %c8_i32_47 = arith.constant 8 : i32
    %101 = arith.muli %c2_i32, %c8_i32_47 : i32
    %102 = tpu.assume_multiple %101, 8 : i32
    %103 = arith.index_cast %102 : i32 to index
    %c0_48 = arith.constant 0 : index
    %104 = vector.load %arg7[%103, %c0_48] : memref<64x512xf32, #tpu.memory_space<vmem>>, vector<8x512xf32>
    %105 = arith.truncf %95 : vector<8x128xf32> to vector<8x128xbf16>
    %c0_49 = arith.constant 0 : index
    %c0_50 = arith.constant 0 : index
    %106 = vector.load %arg5[%c0_49, %c0_50] : memref<128x512xbf16, #tpu.memory_space<vmem>>, vector<128x512xbf16>
    %cst_51 = arith.constant dense<0.000000e+00> : vector<8x512xf32>
    %107 = tpu.matmul %105, %106, %cst_51 {dimension_numbers = #tpu.dot_dimension_numbers<[1], [0], [0], [1], [0, 0, 1, 1], [], []>} : vector<8x128xbf16>, vector<128x512xbf16>, vector<8x512xf32> -> vector<8x512xf32>
    %108 = arith.addf %104, %107 : vector<8x512xf32>
    %109 = vector.extract_strided_slice %108 {offsets = [0, 0], sizes = [8, 128], strides = [1, 1]} : vector<8x512xf32> to vector<8x128xf32>
    %cst_52 = arith.constant 5.000000e-01 : f32
    %110 = vector.broadcast %cst_52 : f32 to vector<8x128xf32>
    %111 = arith.mulf %110, %109 : vector<8x128xf32>
    %112 = math.tanh %111 : vector<8x128xf32>
    %cst_53 = arith.constant 5.000000e-01 : f32
    %113 = vector.broadcast %cst_53 : f32 to vector<8x128xf32>
    %114 = arith.mulf %113, %112 : vector<8x128xf32>
    %cst_54 = arith.constant 5.000000e-01 : f32
    %115 = vector.broadcast %cst_54 : f32 to vector<8x128xf32>
    %116 = arith.addf %114, %115 : vector<8x128xf32>
    %117 = vector.extract_strided_slice %108 {offsets = [0, 128], sizes = [8, 128], strides = [1, 1]} : vector<8x512xf32> to vector<8x128xf32>
    %cst_55 = arith.constant 5.000000e-01 : f32
    %118 = vector.broadcast %cst_55 : f32 to vector<8x128xf32>
    %119 = arith.mulf %118, %117 : vector<8x128xf32>
    %120 = math.tanh %119 : vector<8x128xf32>
    %cst_56 = arith.constant 5.000000e-01 : f32
    %121 = vector.broadcast %cst_56 : f32 to vector<8x128xf32>
    %122 = arith.mulf %121, %120 : vector<8x128xf32>
    %cst_57 = arith.constant 5.000000e-01 : f32
    %123 = vector.broadcast %cst_57 : f32 to vector<8x128xf32>
    %124 = arith.addf %122, %123 : vector<8x128xf32>
    %125 = vector.extract_strided_slice %108 {offsets = [0, 256], sizes = [8, 128], strides = [1, 1]} : vector<8x512xf32> to vector<8x128xf32>
    %126 = math.tanh %125 : vector<8x128xf32>
    %127 = vector.extract_strided_slice %108 {offsets = [0, 384], sizes = [8, 128], strides = [1, 1]} : vector<8x512xf32> to vector<8x128xf32>
    %cst_58 = arith.constant 5.000000e-01 : f32
    %128 = vector.broadcast %cst_58 : f32 to vector<8x128xf32>
    %129 = arith.mulf %128, %127 : vector<8x128xf32>
    %130 = math.tanh %129 : vector<8x128xf32>
    %cst_59 = arith.constant 5.000000e-01 : f32
    %131 = vector.broadcast %cst_59 : f32 to vector<8x128xf32>
    %132 = arith.mulf %131, %130 : vector<8x128xf32>
    %cst_60 = arith.constant 5.000000e-01 : f32
    %133 = vector.broadcast %cst_60 : f32 to vector<8x128xf32>
    %134 = arith.addf %132, %133 : vector<8x128xf32>
    %135 = arith.mulf %124, %93 : vector<8x128xf32>
    %136 = arith.mulf %116, %126 : vector<8x128xf32>
    %137 = arith.addf %135, %136 : vector<8x128xf32>
    %138 = math.tanh %137 : vector<8x128xf32>
    %139 = arith.mulf %134, %138 : vector<8x128xf32>
    %140 = arith.truncf %139 : vector<8x128xf32> to vector<8x128xbf16>
    %c0_61 = arith.constant 0 : index
    %141 = arith.index_cast %c2_i32 : i32 to index
    %c0_62 = arith.constant 0 : index
    %c0_63 = arith.constant 0 : index
    %142 = vector.load %arg6[%c0_61, %141, %c0_62, %c0_63] : memref<1x8x8x128xbf16, #tpu.memory_space<vmem>>, vector<1x1x8x128xbf16>
    %143 = vector.shape_cast %142 : vector<1x1x8x128xbf16> to vector<8x128xbf16>
    %144 = vector.shape_cast %140 : vector<8x128xbf16> to vector<1x1x8x128xbf16>
    tpu.vector_store %arg6[%c0_61, %141, %c0_62, %c0_63], %144 {strides = array<i32>} : memref<1x8x8x128xbf16, #tpu.memory_space<vmem>>, vector<1x1x8x128xbf16>,
    %c3_i32 = arith.constant 3 : i32
    %c8_i32_64 = arith.constant 8 : i32
    %145 = arith.muli %c3_i32, %c8_i32_64 : i32
    %146 = tpu.assume_multiple %145, 8 : i32
    %147 = arith.index_cast %146 : i32 to index
    %c0_65 = arith.constant 0 : index
    %148 = vector.load %arg7[%147, %c0_65] : memref<64x512xf32, #tpu.memory_space<vmem>>, vector<8x512xf32>
    %149 = arith.truncf %139 : vector<8x128xf32> to vector<8x128xbf16>
    %c0_66 = arith.constant 0 : index
    %c0_67 = arith.constant 0 : index
    %150 = vector.load %arg5[%c0_66, %c0_67] : memref<128x512xbf16, #tpu.memory_space<vmem>>, vector<128x512xbf16>
    %cst_68 = arith.constant dense<0.000000e+00> : vector<8x512xf32>
    %151 = tpu.matmul %149, %150, %cst_68 {dimension_numbers = #tpu.dot_dimension_numbers<[1], [0], [0], [1], [0, 0, 1, 1], [], []>} : vector<8x128xbf16>, vector<128x512xbf16>, vector<8x512xf32> -> vector<8x512xf32>
    %152 = arith.addf %148, %151 : vector<8x512xf32>
    %153 = vector.extract_strided_slice %152 {offsets = [0, 0], sizes = [8, 128], strides = [1, 1]} : vector<8x512xf32> to vector<8x128xf32>
    %cst_69 = arith.constant 5.000000e-01 : f32
    %154 = vector.broadcast %cst_69 : f32 to vector<8x128xf32>
    %155 = arith.mulf %154, %153 : vector<8x128xf32>
    %156 = math.tanh %155 : vector<8x128xf32>
    %cst_70 = arith.constant 5.000000e-01 : f32
    %157 = vector.broadcast %cst_70 : f32 to vector<8x128xf32>
    %158 = arith.mulf %157, %156 : vector<8x128xf32>
    %cst_71 = arith.constant 5.000000e-01 : f32
    %159 = vector.broadcast %cst_71 : f32 to vector<8x128xf32>
    %160 = arith.addf %158, %159 : vector<8x128xf32>
    %161 = vector.extract_strided_slice %152 {offsets = [0, 128], sizes = [8, 128], strides = [1, 1]} : vector<8x512xf32> to vector<8x128xf32>
    %cst_72 = arith.constant 5.000000e-01 : f32
    %162 = vector.broadcast %cst_72 : f32 to vector<8x128xf32>
    %163 = arith.mulf %162, %161 : vector<8x128xf32>
    %164 = math.tanh %163 : vector<8x128xf32>
    %cst_73 = arith.constant 5.000000e-01 : f32
    %165 = vector.broadcast %cst_73 : f32 to vector<8x128xf32>
    %166 = arith.mulf %165, %164 : vector<8x128xf32>
    %cst_74 = arith.constant 5.000000e-01 : f32
    %167 = vector.broadcast %cst_74 : f32 to vector<8x128xf32>
    %168 = arith.addf %166, %167 : vector<8x128xf32>
    %169 = vector.extract_strided_slice %152 {offsets = [0, 256], sizes = [8, 128], strides = [1, 1]} : vector<8x512xf32> to vector<8x128xf32>
    %170 = math.tanh %169 : vector<8x128xf32>
    %171 = vector.extract_strided_slice %152 {offsets = [0, 384], sizes = [8, 128], strides = [1, 1]} : vector<8x512xf32> to vector<8x128xf32>
    %cst_75 = arith.constant 5.000000e-01 : f32
    %172 = vector.broadcast %cst_75 : f32 to vector<8x128xf32>
    %173 = arith.mulf %172, %171 : vector<8x128xf32>
    %174 = math.tanh %173 : vector<8x128xf32>
    %cst_76 = arith.constant 5.000000e-01 : f32
    %175 = vector.broadcast %cst_76 : f32 to vector<8x128xf32>
    %176 = arith.mulf %175, %174 : vector<8x128xf32>
    %cst_77 = arith.constant 5.000000e-01 : f32
    %177 = vector.broadcast %cst_77 : f32 to vector<8x128xf32>
    %178 = arith.addf %176, %177 : vector<8x128xf32>
    %179 = arith.mulf %168, %137 : vector<8x128xf32>
    %180 = arith.mulf %160, %170 : vector<8x128xf32>
    %181 = arith.addf %179, %180 : vector<8x128xf32>
    %182 = math.tanh %181 : vector<8x128xf32>
    %183 = arith.mulf %178, %182 : vector<8x128xf32>
    %184 = arith.truncf %183 : vector<8x128xf32> to vector<8x128xbf16>
    %c0_78 = arith.constant 0 : index
    %185 = arith.index_cast %c3_i32 : i32 to index
    %c0_79 = arith.constant 0 : index
    %c0_80 = arith.constant 0 : index
    %186 = vector.load %arg6[%c0_78, %185, %c0_79, %c0_80] : memref<1x8x8x128xbf16, #tpu.memory_space<vmem>>, vector<1x1x8x128xbf16>
    %187 = vector.shape_cast %186 : vector<1x1x8x128xbf16> to vector<8x128xbf16>
    %188 = vector.shape_cast %184 : vector<8x128xbf16> to vector<1x1x8x128xbf16>
    tpu.vector_store %arg6[%c0_78, %185, %c0_79, %c0_80], %188 {strides = array<i32>} : memref<1x8x8x128xbf16, #tpu.memory_space<vmem>>, vector<1x1x8x128xbf16>,
    %c4_i32 = arith.constant 4 : i32
    %c8_i32_81 = arith.constant 8 : i32
    %189 = arith.muli %c4_i32, %c8_i32_81 : i32
    %190 = tpu.assume_multiple %189, 8 : i32
    %191 = arith.index_cast %190 : i32 to index
    %c0_82 = arith.constant 0 : index
    %192 = vector.load %arg7[%191, %c0_82] : memref<64x512xf32, #tpu.memory_space<vmem>>, vector<8x512xf32>
    %193 = arith.truncf %183 : vector<8x128xf32> to vector<8x128xbf16>
    %c0_83 = arith.constant 0 : index
    %c0_84 = arith.constant 0 : index
    %194 = vector.load %arg5[%c0_83, %c0_84] : memref<128x512xbf16, #tpu.memory_space<vmem>>, vector<128x512xbf16>
    %cst_85 = arith.constant dense<0.000000e+00> : vector<8x512xf32>
    %195 = tpu.matmul %193, %194, %cst_85 {dimension_numbers = #tpu.dot_dimension_numbers<[1], [0], [0], [1], [0, 0, 1, 1], [], []>} : vector<8x128xbf16>, vector<128x512xbf16>, vector<8x512xf32> -> vector<8x512xf32>
    %196 = arith.addf %192, %195 : vector<8x512xf32>
    %197 = vector.extract_strided_slice %196 {offsets = [0, 0], sizes = [8, 128], strides = [1, 1]} : vector<8x512xf32> to vector<8x128xf32>
    %cst_86 = arith.constant 5.000000e-01 : f32
    %198 = vector.broadcast %cst_86 : f32 to vector<8x128xf32>
    %199 = arith.mulf %198, %197 : vector<8x128xf32>
    %200 = math.tanh %199 : vector<8x128xf32>
    %cst_87 = arith.constant 5.000000e-01 : f32
    %201 = vector.broadcast %cst_87 : f32 to vector<8x128xf32>
    %202 = arith.mulf %201, %200 : vector<8x128xf32>
    %cst_88 = arith.constant 5.000000e-01 : f32
    %203 = vector.broadcast %cst_88 : f32 to vector<8x128xf32>
    %204 = arith.addf %202, %203 : vector<8x128xf32>
    %205 = vector.extract_strided_slice %196 {offsets = [0, 128], sizes = [8, 128], strides = [1, 1]} : vector<8x512xf32> to vector<8x128xf32>
    %cst_89 = arith.constant 5.000000e-01 : f32
    %206 = vector.broadcast %cst_89 : f32 to vector<8x128xf32>
    %207 = arith.mulf %206, %205 : vector<8x128xf32>
    %208 = math.tanh %207 : vector<8x128xf32>
    %cst_90 = arith.constant 5.000000e-01 : f32
    %209 = vector.broadcast %cst_90 : f32 to vector<8x128xf32>
    %210 = arith.mulf %209, %208 : vector<8x128xf32>
    %cst_91 = arith.constant 5.000000e-01 : f32
    %211 = vector.broadcast %cst_91 : f32 to vector<8x128xf32>
    %212 = arith.addf %210, %211 : vector<8x128xf32>
    %213 = vector.extract_strided_slice %196 {offsets = [0, 256], sizes = [8, 128], strides = [1, 1]} : vector<8x512xf32> to vector<8x128xf32>
    %214 = math.tanh %213 : vector<8x128xf32>
    %215 = vector.extract_strided_slice %196 {offsets = [0, 384], sizes = [8, 128], strides = [1, 1]} : vector<8x512xf32> to vector<8x128xf32>
    %cst_92 = arith.constant 5.000000e-01 : f32
    %216 = vector.broadcast %cst_92 : f32 to vector<8x128xf32>
    %217 = arith.mulf %216, %215 : vector<8x128xf32>
    %218 = math.tanh %217 : vector<8x128xf32>
    %cst_93 = arith.constant 5.000000e-01 : f32
    %219 = vector.broadcast %cst_93 : f32 to vector<8x128xf32>
    %220 = arith.mulf %219, %218 : vector<8x128xf32>
    %cst_94 = arith.constant 5.000000e-01 : f32
    %221 = vector.broadcast %cst_94 : f32 to vector<8x128xf32>
    %222 = arith.addf %220, %221 : vector<8x128xf32>
    %223 = arith.mulf %212, %181 : vector<8x128xf32>
    %224 = arith.mulf %204, %214 : vector<8x128xf32>
    %225 = arith.addf %223, %224 : vector<8x128xf32>
    %226 = math.tanh %225 : vector<8x128xf32>
    %227 = arith.mulf %222, %226 : vector<8x128xf32>
    %228 = arith.truncf %227 : vector<8x128xf32> to vector<8x128xbf16>
    %c0_95 = arith.constant 0 : index
    %229 = arith.index_cast %c4_i32 : i32 to index
    %c0_96 = arith.constant 0 : index
    %c0_97 = arith.constant 0 : index
    %230 = vector.load %arg6[%c0_95, %229, %c0_96, %c0_97] : memref<1x8x8x128xbf16, #tpu.memory_space<vmem>>, vector<1x1x8x128xbf16>
    %231 = vector.shape_cast %230 : vector<1x1x8x128xbf16> to vector<8x128xbf16>
    %232 = vector.shape_cast %228 : vector<8x128xbf16> to vector<1x1x8x128xbf16>
    tpu.vector_store %arg6[%c0_95, %229, %c0_96, %c0_97], %232 {strides = array<i32>} : memref<1x8x8x128xbf16, #tpu.memory_space<vmem>>, vector<1x1x8x128xbf16>,
    %c5_i32 = arith.constant 5 : i32
    %c8_i32_98 = arith.constant 8 : i32
    %233 = arith.muli %c5_i32, %c8_i32_98 : i32
    %234 = tpu.assume_multiple %233, 8 : i32
    %235 = arith.index_cast %234 : i32 to index
    %c0_99 = arith.constant 0 : index
    %236 = vector.load %arg7[%235, %c0_99] : memref<64x512xf32, #tpu.memory_space<vmem>>, vector<8x512xf32>
    %237 = arith.truncf %227 : vector<8x128xf32> to vector<8x128xbf16>
    %c0_100 = arith.constant 0 : index
    %c0_101 = arith.constant 0 : index
    %238 = vector.load %arg5[%c0_100, %c0_101] : memref<128x512xbf16, #tpu.memory_space<vmem>>, vector<128x512xbf16>
    %cst_102 = arith.constant dense<0.000000e+00> : vector<8x512xf32>
    %239 = tpu.matmul %237, %238, %cst_102 {dimension_numbers = #tpu.dot_dimension_numbers<[1], [0], [0], [1], [0, 0, 1, 1], [], []>} : vector<8x128xbf16>, vector<128x512xbf16>, vector<8x512xf32> -> vector<8x512xf32>
    %240 = arith.addf %236, %239 : vector<8x512xf32>
    %241 = vector.extract_strided_slice %240 {offsets = [0, 0], sizes = [8, 128], strides = [1, 1]} : vector<8x512xf32> to vector<8x128xf32>
    %cst_103 = arith.constant 5.000000e-01 : f32
    %242 = vector.broadcast %cst_103 : f32 to vector<8x128xf32>
    %243 = arith.mulf %242, %241 : vector<8x128xf32>
    %244 = math.tanh %243 : vector<8x128xf32>
    %cst_104 = arith.constant 5.000000e-01 : f32
    %245 = vector.broadcast %cst_104 : f32 to vector<8x128xf32>
    %246 = arith.mulf %245, %244 : vector<8x128xf32>
    %cst_105 = arith.constant 5.000000e-01 : f32
    %247 = vector.broadcast %cst_105 : f32 to vector<8x128xf32>
    %248 = arith.addf %246, %247 : vector<8x128xf32>
    %249 = vector.extract_strided_slice %240 {offsets = [0, 128], sizes = [8, 128], strides = [1, 1]} : vector<8x512xf32> to vector<8x128xf32>
    %cst_106 = arith.constant 5.000000e-01 : f32
    %250 = vector.broadcast %cst_106 : f32 to vector<8x128xf32>
    %251 = arith.mulf %250, %249 : vector<8x128xf32>
    %252 = math.tanh %251 : vector<8x128xf32>
    %cst_107 = arith.constant 5.000000e-01 : f32
    %253 = vector.broadcast %cst_107 : f32 to vector<8x128xf32>
    %254 = arith.mulf %253, %252 : vector<8x128xf32>
    %cst_108 = arith.constant 5.000000e-01 : f32
    %255 = vector.broadcast %cst_108 : f32 to vector<8x128xf32>
    %256 = arith.addf %254, %255 : vector<8x128xf32>
    %257 = vector.extract_strided_slice %240 {offsets = [0, 256], sizes = [8, 128], strides = [1, 1]} : vector<8x512xf32> to vector<8x128xf32>
    %258 = math.tanh %257 : vector<8x128xf32>
    %259 = vector.extract_strided_slice %240 {offsets = [0, 384], sizes = [8, 128], strides = [1, 1]} : vector<8x512xf32> to vector<8x128xf32>
    %cst_109 = arith.constant 5.000000e-01 : f32
    %260 = vector.broadcast %cst_109 : f32 to vector<8x128xf32>
    %261 = arith.mulf %260, %259 : vector<8x128xf32>
    %262 = math.tanh %261 : vector<8x128xf32>
    %cst_110 = arith.constant 5.000000e-01 : f32
    %263 = vector.broadcast %cst_110 : f32 to vector<8x128xf32>
    %264 = arith.mulf %263, %262 : vector<8x128xf32>
    %cst_111 = arith.constant 5.000000e-01 : f32
    %265 = vector.broadcast %cst_111 : f32 to vector<8x128xf32>
    %266 = arith.addf %264, %265 : vector<8x128xf32>
    %267 = arith.mulf %256, %225 : vector<8x128xf32>
    %268 = arith.mulf %248, %258 : vector<8x128xf32>
    %269 = arith.addf %267, %268 : vector<8x128xf32>
    %270 = math.tanh %269 : vector<8x128xf32>
    %271 = arith.mulf %266, %270 : vector<8x128xf32>
    %272 = arith.truncf %271 : vector<8x128xf32> to vector<8x128xbf16>
    %c0_112 = arith.constant 0 : index
    %273 = arith.index_cast %c5_i32 : i32 to index
    %c0_113 = arith.constant 0 : index
    %c0_114 = arith.constant 0 : index
    %274 = vector.load %arg6[%c0_112, %273, %c0_113, %c0_114] : memref<1x8x8x128xbf16, #tpu.memory_space<vmem>>, vector<1x1x8x128xbf16>
    %275 = vector.shape_cast %274 : vector<1x1x8x128xbf16> to vector<8x128xbf16>
    %276 = vector.shape_cast %272 : vector<8x128xbf16> to vector<1x1x8x128xbf16>
    tpu.vector_store %arg6[%c0_112, %273, %c0_113, %c0_114], %276 {strides = array<i32>} : memref<1x8x8x128xbf16, #tpu.memory_space<vmem>>, vector<1x1x8x128xbf16>,
    %c6_i32 = arith.constant 6 : i32
    %c8_i32_115 = arith.constant 8 : i32
    %277 = arith.muli %c6_i32, %c8_i32_115 : i32
    %278 = tpu.assume_multiple %277, 8 : i32
    %279 = arith.index_cast %278 : i32 to index
    %c0_116 = arith.constant 0 : index
    %280 = vector.load %arg7[%279, %c0_116] : memref<64x512xf32, #tpu.memory_space<vmem>>, vector<8x512xf32>
    %281 = arith.truncf %271 : vector<8x128xf32> to vector<8x128xbf16>
    %c0_117 = arith.constant 0 : index
    %c0_118 = arith.constant 0 : index
    %282 = vector.load %arg5[%c0_117, %c0_118] : memref<128x512xbf16, #tpu.memory_space<vmem>>, vector<128x512xbf16>
    %cst_119 = arith.constant dense<0.000000e+00> : vector<8x512xf32>
    %283 = tpu.matmul %281, %282, %cst_119 {dimension_numbers = #tpu.dot_dimension_numbers<[1], [0], [0], [1], [0, 0, 1, 1], [], []>} : vector<8x128xbf16>, vector<128x512xbf16>, vector<8x512xf32> -> vector<8x512xf32>
    %284 = arith.addf %280, %283 : vector<8x512xf32>
    %285 = vector.extract_strided_slice %284 {offsets = [0, 0], sizes = [8, 128], strides = [1, 1]} : vector<8x512xf32> to vector<8x128xf32>
    %cst_120 = arith.constant 5.000000e-01 : f32
    %286 = vector.broadcast %cst_120 : f32 to vector<8x128xf32>
    %287 = arith.mulf %286, %285 : vector<8x128xf32>
    %288 = math.tanh %287 : vector<8x128xf32>
    %cst_121 = arith.constant 5.000000e-01 : f32
    %289 = vector.broadcast %cst_121 : f32 to vector<8x128xf32>
    %290 = arith.mulf %289, %288 : vector<8x128xf32>
    %cst_122 = arith.constant 5.000000e-01 : f32
    %291 = vector.broadcast %cst_122 : f32 to vector<8x128xf32>
    %292 = arith.addf %290, %291 : vector<8x128xf32>
    %293 = vector.extract_strided_slice %284 {offsets = [0, 128], sizes = [8, 128], strides = [1, 1]} : vector<8x512xf32> to vector<8x128xf32>
    %cst_123 = arith.constant 5.000000e-01 : f32
    %294 = vector.broadcast %cst_123 : f32 to vector<8x128xf32>
    %295 = arith.mulf %294, %293 : vector<8x128xf32>
    %296 = math.tanh %295 : vector<8x128xf32>
    %cst_124 = arith.constant 5.000000e-01 : f32
    %297 = vector.broadcast %cst_124 : f32 to vector<8x128xf32>
    %298 = arith.mulf %297, %296 : vector<8x128xf32>
    %cst_125 = arith.constant 5.000000e-01 : f32
    %299 = vector.broadcast %cst_125 : f32 to vector<8x128xf32>
    %300 = arith.addf %298, %299 : vector<8x128xf32>
    %301 = vector.extract_strided_slice %284 {offsets = [0, 256], sizes = [8, 128], strides = [1, 1]} : vector<8x512xf32> to vector<8x128xf32>
    %302 = math.tanh %301 : vector<8x128xf32>
    %303 = vector.extract_strided_slice %284 {offsets = [0, 384], sizes = [8, 128], strides = [1, 1]} : vector<8x512xf32> to vector<8x128xf32>
    %cst_126 = arith.constant 5.000000e-01 : f32
    %304 = vector.broadcast %cst_126 : f32 to vector<8x128xf32>
    %305 = arith.mulf %304, %303 : vector<8x128xf32>
    %306 = math.tanh %305 : vector<8x128xf32>
    %cst_127 = arith.constant 5.000000e-01 : f32
    %307 = vector.broadcast %cst_127 : f32 to vector<8x128xf32>
    %308 = arith.mulf %307, %306 : vector<8x128xf32>
    %cst_128 = arith.constant 5.000000e-01 : f32
    %309 = vector.broadcast %cst_128 : f32 to vector<8x128xf32>
    %310 = arith.addf %308, %309 : vector<8x128xf32>
    %311 = arith.mulf %300, %269 : vector<8x128xf32>
    %312 = arith.mulf %292, %302 : vector<8x128xf32>
    %313 = arith.addf %311, %312 : vector<8x128xf32>
    %314 = math.tanh %313 : vector<8x128xf32>
    %315 = arith.mulf %310, %314 : vector<8x128xf32>
    %316 = arith.truncf %315 : vector<8x128xf32> to vector<8x128xbf16>
    %c0_129 = arith.constant 0 : index
    %317 = arith.index_cast %c6_i32 : i32 to index
    %c0_130 = arith.constant 0 : index
    %c0_131 = arith.constant 0 : index
    %318 = vector.load %arg6[%c0_129, %317, %c0_130, %c0_131] : memref<1x8x8x128xbf16, #tpu.memory_space<vmem>>, vector<1x1x8x128xbf16>
    %319 = vector.shape_cast %318 : vector<1x1x8x128xbf16> to vector<8x128xbf16>
    %320 = vector.shape_cast %316 : vector<8x128xbf16> to vector<1x1x8x128xbf16>
    tpu.vector_store %arg6[%c0_129, %317, %c0_130, %c0_131], %320 {strides = array<i32>} : memref<1x8x8x128xbf16, #tpu.memory_space<vmem>>, vector<1x1x8x128xbf16>,
    %c7_i32 = arith.constant 7 : i32
    %c8_i32_132 = arith.constant 8 : i32
    %321 = arith.muli %c7_i32, %c8_i32_132 : i32
    %322 = tpu.assume_multiple %321, 8 : i32
    %323 = arith.index_cast %322 : i32 to index
    %c0_133 = arith.constant 0 : index
    %324 = vector.load %arg7[%323, %c0_133] : memref<64x512xf32, #tpu.memory_space<vmem>>, vector<8x512xf32>
    %325 = arith.truncf %315 : vector<8x128xf32> to vector<8x128xbf16>
    %c0_134 = arith.constant 0 : index
    %c0_135 = arith.constant 0 : index
    %326 = vector.load %arg5[%c0_134, %c0_135] : memref<128x512xbf16, #tpu.memory_space<vmem>>, vector<128x512xbf16>
    %cst_136 = arith.constant dense<0.000000e+00> : vector<8x512xf32>
    %327 = tpu.matmul %325, %326, %cst_136 {dimension_numbers = #tpu.dot_dimension_numbers<[1], [0], [0], [1], [0, 0, 1, 1], [], []>} : vector<8x128xbf16>, vector<128x512xbf16>, vector<8x512xf32> -> vector<8x512xf32>
    %328 = arith.addf %324, %327 : vector<8x512xf32>
    %329 = vector.extract_strided_slice %328 {offsets = [0, 0], sizes = [8, 128], strides = [1, 1]} : vector<8x512xf32> to vector<8x128xf32>
    %cst_137 = arith.constant 5.000000e-01 : f32
    %330 = vector.broadcast %cst_137 : f32 to vector<8x128xf32>
    %331 = arith.mulf %330, %329 : vector<8x128xf32>
    %332 = math.tanh %331 : vector<8x128xf32>
    %cst_138 = arith.constant 5.000000e-01 : f32
    %333 = vector.broadcast %cst_138 : f32 to vector<8x128xf32>
    %334 = arith.mulf %333, %332 : vector<8x128xf32>
    %cst_139 = arith.constant 5.000000e-01 : f32
    %335 = vector.broadcast %cst_139 : f32 to vector<8x128xf32>
    %336 = arith.addf %334, %335 : vector<8x128xf32>
    %337 = vector.extract_strided_slice %328 {offsets = [0, 128], sizes = [8, 128], strides = [1, 1]} : vector<8x512xf32> to vector<8x128xf32>
    %cst_140 = arith.constant 5.000000e-01 : f32
    %338 = vector.broadcast %cst_140 : f32 to vector<8x128xf32>
    %339 = arith.mulf %338, %337 : vector<8x128xf32>
    %340 = math.tanh %339 : vector<8x128xf32>
    %cst_141 = arith.constant 5.000000e-01 : f32
    %341 = vector.broadcast %cst_141 : f32 to vector<8x128xf32>
    %342 = arith.mulf %341, %340 : vector<8x128xf32>
    %cst_142 = arith.constant 5.000000e-01 : f32
    %343 = vector.broadcast %cst_142 : f32 to vector<8x128xf32>
    %344 = arith.addf %342, %343 : vector<8x128xf32>
    %345 = vector.extract_strided_slice %328 {offsets = [0, 256], sizes = [8, 128], strides = [1, 1]} : vector<8x512xf32> to vector<8x128xf32>
    %346 = math.tanh %345 : vector<8x128xf32>
    %347 = vector.extract_strided_slice %328 {offsets = [0, 384], sizes = [8, 128], strides = [1, 1]} : vector<8x512xf32> to vector<8x128xf32>
    %cst_143 = arith.constant 5.000000e-01 : f32
    %348 = vector.broadcast %cst_143 : f32 to vector<8x128xf32>
    %349 = arith.mulf %348, %347 : vector<8x128xf32>
    %350 = math.tanh %349 : vector<8x128xf32>
    %cst_144 = arith.constant 5.000000e-01 : f32
    %351 = vector.broadcast %cst_144 : f32 to vector<8x128xf32>
    %352 = arith.mulf %351, %350 : vector<8x128xf32>
    %cst_145 = arith.constant 5.000000e-01 : f32
    %353 = vector.broadcast %cst_145 : f32 to vector<8x128xf32>
    %354 = arith.addf %352, %353 : vector<8x128xf32>
    %355 = arith.mulf %344, %313 : vector<8x128xf32>
    %356 = arith.mulf %336, %346 : vector<8x128xf32>
    %357 = arith.addf %355, %356 : vector<8x128xf32>
    %358 = math.tanh %357 : vector<8x128xf32>
    %359 = arith.mulf %354, %358 : vector<8x128xf32>
    %360 = arith.truncf %359 : vector<8x128xf32> to vector<8x128xbf16>
    %c0_146 = arith.constant 0 : index
    %361 = arith.index_cast %c7_i32 : i32 to index
    %c0_147 = arith.constant 0 : index
    %c0_148 = arith.constant 0 : index
    %362 = vector.load %arg6[%c0_146, %361, %c0_147, %c0_148] : memref<1x8x8x128xbf16, #tpu.memory_space<vmem>>, vector<1x1x8x128xbf16>
    %363 = vector.shape_cast %362 : vector<1x1x8x128xbf16> to vector<8x128xbf16>
    %364 = vector.shape_cast %360 : vector<8x128xbf16> to vector<1x1x8x128xbf16>
    tpu.vector_store %arg6[%c0_146, %361, %c0_147, %c0_148], %364 {strides = array<i32>} : memref<1x8x8x128xbf16, #tpu.memory_space<vmem>>, vector<1x1x8x128xbf16>,
    %c8_i32_149 = arith.constant 8 : i32
    %c0_150 = arith.constant 0 : index
    %c0_151 = arith.constant 0 : index
    %365 = vector.load %arg8[%c0_150, %c0_151] : memref<8x128xf32, #tpu.memory_space<vmem>>, vector<8x128xf32>
    tpu.vector_store %arg8[%c0_150, %c0_151], %359 {strides = array<i32>} : memref<8x128xf32, #tpu.memory_space<vmem>>, vector<8x128xf32>,
    %c0_152 = arith.constant 0 : index
    %c0_153 = arith.constant 0 : index
    %366 = vector.load %arg9[%c0_152, %c0_153] : memref<8x128xf32, #tpu.memory_space<vmem>>, vector<8x128xf32>
    tpu.vector_store %arg9[%c0_152, %c0_153], %357 {strides = array<i32>} : memref<8x128xf32, #tpu.memory_space<vmem>>, vector<8x128xf32>,
    return
  }
  func.func @transform_0(%arg0: i32, %arg1: i32) -> (i32, i32, i32) {
    %c0_i32 = arith.constant 0 : i32
    %c0_i32_0 = arith.constant 0 : i32
    return %arg0, %arg1, %c0_i32 : i32, i32, i32
  }
  func.func @transform_1(%arg0: i32, %arg1: i32) -> (i32, i32) {
    %c0_i32 = arith.constant 0 : i32
    %c0_i32_0 = arith.constant 0 : i32
    %c0_i32_1 = arith.constant 0 : i32
    return %c0_i32, %c0_i32_0 : i32, i32
  }
  func.func @transform_2(%arg0: i32, %arg1: i32) -> (i32, i32) {
    %c0_i32 = arith.constant 0 : i32
    %c0_i32_0 = arith.constant 0 : i32
    %c0_i32_1 = arith.constant 0 : i32
    return %c0_i32, %c0_i32_0 : i32, i32
  }
  func.func @transform_3(%arg0: i32, %arg1: i32) -> (i32, i32) {
    %c0_i32 = arith.constant 0 : i32
    %c0_i32_0 = arith.constant 0 : i32
    %c0_i32_1 = arith.constant 0 : i32
    return %c0_i32, %c0_i32_0 : i32, i32
  }
  func.func @transform_4(%arg0: i32, %arg1: i32) -> (i32, i32, i32, i32) {
    %c0_i32 = arith.constant 0 : i32
    %c0_i32_0 = arith.constant 0 : i32
    %c0_i32_1 = arith.constant 0 : i32
    return %arg0, %arg1, %c0_i32, %c0_i32_0 : i32, i32, i32, i32
  }
}

module attributes {stable_mosaic.version = 11 : i64} {
  func.func @matmul_bias_kernel(%arg0: i32, %arg1: i32, %arg2: i32, %arg3: memref<64x128xbf16, #tpu.memory_space<vmem>>, %arg4: memref<128x128xbf16, #tpu.memory_space<vmem>>, %arg5: memref<1x128xf32, #tpu.memory_space<vmem>>, %arg6: memref<64x128xf32, #tpu.memory_space<vmem>>, %arg7: memref<64x128xf32, #tpu.memory_space<vmem>>) attributes {dimension_semantics = [#tpu.dimension_semantics<parallel>, #tpu.dimension_semantics<parallel>, #tpu.dimension_semantics<arbitrary>], iteration_bounds = array<i64: 1, 1, 1>, scalar_prefetch = 0 : i64, scratch_operands = 1 : i64, tpu.core_type = #tpu.core_type<tc>, window_params = [{transform_indices = @transform_0, window_bounds = array<i64: 64, 128>}, {transform_indices = @transform_1, window_bounds = array<i64: 128, 128>}, {transform_indices = @transform_2, window_bounds = array<i64: 1, 128>}, {transform_indices = @transform_3, window_bounds = array<i64: 64, 128>}]} {
    %c0_i32 = arith.constant 0 : i32
    %0 = arith.cmpi eq, %arg2, %c0_i32 : i32
    %1 = arith.extui %0 : i1 to i32
    %c0_i32_0 = arith.constant 0 : i32
    %2 = arith.cmpi ne, %1, %c0_i32_0 : i32
    scf.if %2 {
      %cst_10 = arith.constant 0.000000e+00 : f32
      %12 = vector.broadcast %cst_10 : f32 to vector<64x128xf32>
      %c0_11 = arith.constant 0 : index
      %c0_12 = arith.constant 0 : index
      %13 = vector.load %arg7[%c0_11, %c0_12] : memref<64x128xf32, #tpu.memory_space<vmem>>, vector<64x128xf32>
      tpu.vector_store %arg7[%c0_11, %c0_12], %12 {strides = array<i32>} : memref<64x128xf32, #tpu.memory_space<vmem>>, vector<64x128xf32>,
    } else {
    }
    %c0 = arith.constant 0 : index
    %c0_1 = arith.constant 0 : index
    %3 = vector.load %arg7[%c0, %c0_1] : memref<64x128xf32, #tpu.memory_space<vmem>>, vector<64x128xf32>
    %c0_2 = arith.constant 0 : index
    %c0_3 = arith.constant 0 : index
    %4 = vector.load %arg3[%c0_2, %c0_3] : memref<64x128xbf16, #tpu.memory_space<vmem>>, vector<64x128xbf16>
    %c0_4 = arith.constant 0 : index
    %c0_5 = arith.constant 0 : index
    %5 = vector.load %arg4[%c0_4, %c0_5] : memref<128x128xbf16, #tpu.memory_space<vmem>>, vector<128x128xbf16>
    %cst = arith.constant dense<0.000000e+00> : vector<64x128xf32>
    %6 = tpu.matmul %4, %5, %cst {dimension_numbers = #tpu.dot_dimension_numbers<[1], [0], [0], [1], [0, 0, 1, 1], [], []>} : vector<64x128xbf16>, vector<128x128xbf16>, vector<64x128xf32> -> vector<64x128xf32>
    %7 = arith.addf %3, %6 : vector<64x128xf32>
    %c0_6 = arith.constant 0 : index
    %c0_7 = arith.constant 0 : index
    %8 = vector.load %arg7[%c0_6, %c0_7] : memref<64x128xf32, #tpu.memory_space<vmem>>, vector<64x128xf32>
    tpu.vector_store %arg7[%c0_6, %c0_7], %7 {strides = array<i32>} : memref<64x128xf32, #tpu.memory_space<vmem>>, vector<64x128xf32>,
    %c0_i32_8 = arith.constant 0 : i32
    %9 = arith.cmpi eq, %arg2, %c0_i32_8 : i32
    %10 = arith.extui %9 : i1 to i32
    %c0_i32_9 = arith.constant 0 : i32
    %11 = arith.cmpi ne, %10, %c0_i32_9 : i32
    scf.if %11 {
      %c0_10 = arith.constant 0 : index
      %c0_11 = arith.constant 0 : index
      %12 = vector.load %arg7[%c0_10, %c0_11] : memref<64x128xf32, #tpu.memory_space<vmem>>, vector<64x128xf32>
      %c0_12 = arith.constant 0 : index
      %c0_13 = arith.constant 0 : index
      %13 = vector.load %arg5[%c0_12, %c0_13] : memref<1x128xf32, #tpu.memory_space<vmem>>, vector<1x128xf32>
      %14 = vector.broadcast %13 : vector<1x128xf32> to vector<64x128xf32>
      %15 = arith.addf %12, %14 : vector<64x128xf32>
      %c0_14 = arith.constant 0 : index
      %c0_15 = arith.constant 0 : index
      %16 = vector.load %arg6[%c0_14, %c0_15] : memref<64x128xf32, #tpu.memory_space<vmem>>, vector<64x128xf32>
      tpu.vector_store %arg6[%c0_14, %c0_15], %15 {strides = array<i32>} : memref<64x128xf32, #tpu.memory_space<vmem>>, vector<64x128xf32>,
    } else {
    }
    return
  }
  func.func @transform_0(%arg0: i32, %arg1: i32, %arg2: i32) -> (i32, i32) {
    %c0_i32 = arith.constant 0 : i32
    return %arg0, %arg2 : i32, i32
  }
  func.func @transform_1(%arg0: i32, %arg1: i32, %arg2: i32) -> (i32, i32) {
    %c0_i32 = arith.constant 0 : i32
    return %arg2, %arg1 : i32, i32
  }
  func.func @transform_2(%arg0: i32, %arg1: i32, %arg2: i32) -> (i32, i32) {
    %c0_i32 = arith.constant 0 : i32
    %c0_i32_0 = arith.constant 0 : i32
    return %c0_i32, %arg1 : i32, i32
  }
  func.func @transform_3(%arg0: i32, %arg1: i32, %arg2: i32) -> (i32, i32) {
    %c0_i32 = arith.constant 0 : i32
    return %arg0, %arg1 : i32, i32
  }
}

module attributes {stable_mosaic.version = 11 : i64} {
  func.func @lstm_layer_kernel(%arg0: i32, %arg1: i32, %arg2: memref<1x64x128xbf16, #tpu.memory_space<vmem>>, %arg3: memref<128x512xbf16, #tpu.memory_space<vmem>>, %arg4: memref<1x512xf32, #tpu.memory_space<vmem>>, %arg5: memref<128x512xbf16, #tpu.memory_space<vmem>>, %arg6: memref<1x8x8x128xbf16, #tpu.memory_space<vmem>>, %arg7: memref<64x512xf32, #tpu.memory_space<vmem>>, %arg8: memref<8x128xf32, #tpu.memory_space<vmem>>, %arg9: memref<8x128xf32, #tpu.memory_space<vmem>>) attributes {dimension_semantics = [#tpu.dimension_semantics<parallel>, #tpu.dimension_semantics<arbitrary>], iteration_bounds = array<i64: 1, 1>, scalar_prefetch = 0 : i64, scratch_operands = 3 : i64, tpu.core_type = #tpu.core_type<tc>, window_params = [{transform_indices = @transform_0, window_bounds = array<i64: 1, 64, 128>}, {pipeline_mode = #tpu.pipeline_mode<synchronous>, transform_indices = @transform_1, window_bounds = array<i64: 128, 512>}, {pipeline_mode = #tpu.pipeline_mode<synchronous>, transform_indices = @transform_2, window_bounds = array<i64: 1, 512>}, {pipeline_mode = #tpu.pipeline_mode<synchronous>, transform_indices = @transform_3, window_bounds = array<i64: 128, 512>}, {transform_indices = @transform_4, window_bounds = array<i64: 1, 8, 8, 128>}]} {
    %c0_i32 = arith.constant 0 : i32
    %0 = arith.cmpi eq, %arg1, %c0_i32 : i32
    %1 = arith.extui %0 : i1 to i32
    %c0_i32_0 = arith.constant 0 : i32
    %2 = arith.cmpi ne, %1, %c0_i32_0 : i32
    scf.if %2 {
      %cst_154 = arith.constant 0.000000e+00 : f32
      %367 = vector.broadcast %cst_154 : f32 to vector<8x128xf32>
      %c0_155 = arith.constant 0 : index
      %c0_156 = arith.constant 0 : index
      %368 = vector.load %arg8[%c0_155, %c0_156] : memref<8x128xf32, #tpu.memory_space<vmem>>, vector<8x128xf32>
      tpu.vector_store %arg8[%c0_155, %c0_156], %367 {strides = array<i32>} : memref<8x128xf32, #tpu.memory_space<vmem>>, vector<8x128xf32>,
      %cst_157 = arith.constant 0.000000e+00 : f32
      %369 = vector.broadcast %cst_157 : f32 to vector<8x128xf32>
      %c0_158 = arith.constant 0 : index
      %c0_159 = arith.constant 0 : index
      %370 = vector.load %arg9[%c0_158, %c0_159] : memref<8x128xf32, #tpu.memory_space<vmem>>, vector<8x128xf32>
      tpu.vector_store %arg9[%c0_158, %c0_159], %369 {strides = array<i32>} : memref<8x128xf32, #tpu.memory_space<vmem>>, vector<8x128xf32>,
    } else {
    }
    %c0 = arith.constant 0 : index
    %c0_1 = arith.constant 0 : index
    %c0_2 = arith.constant 0 : index
    %3 = vector.load %arg2[%c0, %c0_1, %c0_2] : memref<1x64x128xbf16, #tpu.memory_space<vmem>>, vector<1x64x128xbf16>
    %4 = vector.shape_cast %3 : vector<1x64x128xbf16> to vector<64x128xbf16>
    %c0_3 = arith.constant 0 : index
    %c0_4 = arith.constant 0 : index
    %5 = vector.load %arg3[%c0_3, %c0_4] : memref<128x512xbf16, #tpu.memory_space<vmem>>, vector<128x512xbf16>
    %cst = arith.constant dense<0.000000e+00> : vector<64x512xf32>
    %6 = tpu.matmul %4, %5, %cst {dimension_numbers = #tpu.dot_dimension_numbers<[1], [0], [0], [1], [0, 0, 1, 1], [], []>} : vector<64x128xbf16>, vector<128x512xbf16>, vector<64x512xf32> -> vector<64x512xf32>
    %c0_5 = arith.constant 0 : index
    %c0_6 = arith.constant 0 : index
    %7 = vector.load %arg4[%c0_5, %c0_6] : memref<1x512xf32, #tpu.memory_space<vmem>>, vector<1x512xf32>
    %8 = vector.broadcast %7 : vector<1x512xf32> to vector<64x512xf32>
    %9 = arith.addf %6, %8 : vector<64x512xf32>
    %c0_7 = arith.constant 0 : index
    %c0_8 = arith.constant 0 : index
    %10 = vector.load %arg7[%c0_7, %c0_8] : memref<64x512xf32, #tpu.memory_space<vmem>>, vector<64x512xf32>
    tpu.vector_store %arg7[%c0_7, %c0_8], %9 {strides = array<i32>} : memref<64x512xf32, #tpu.memory_space<vmem>>, vector<64x512xf32>,
    %c0_9 = arith.constant 0 : index
    %c0_10 = arith.constant 0 : index
    %11 = vector.load %arg8[%c0_9, %c0_10] : memref<8x128xf32, #tpu.memory_space<vmem>>, vector<8x128xf32>
    %c0_11 = arith.constant 0 : index
    %c0_12 = arith.constant 0 : index
    %12 = vector.load %arg9[%c0_11, %c0_12] : memref<8x128xf32, #tpu.memory_space<vmem>>, vector<8x128xf32>
    %c0_i32_13 = arith.constant 0 : i32
    %c8_i32 = arith.constant 8 : i32
    %13 = arith.muli %c0_i32_13, %c8_i32 : i32
    %14 = tpu.assume_multiple %13, 8 : i32
    %15 = arith.index_cast %14 : i32 to index
    %c0_14 = arith.constant 0 : index
    %16 = vector.load %arg7[%15, %c0_14] : memref<64x512xf32, #tpu.memory_space<vmem>>, vector<8x512xf32>
    %17 = arith.truncf %11 : vector<8x128xf32> to vector<8x128xbf16>
    %c0_15 = arith.constant 0 : index
    %c0_16 = arith.constant 0 : index
    %18 = vector.load %arg5[%c0_15, %c0_16] : memref<128x512xbf16, #tpu.memory_space<vmem>>, vector<128x512xbf16>
    %cst_17 = arith.constant dense<0.000000e+00> : vector<8x512xf32>
    %19 = tpu.matmul %17, %18, %cst_17 {dimension_numbers = #tpu.dot_dimension_numbers<[1], [0], [0], [1], [0, 0, 1, 1], [], []>} : vector<8x128xbf16>, vector<128x512xbf16>, vector<8x512xf32> -> vector<8x512xf32>
    %20 = arith.addf %16, %19 : vector<8x512xf32>
    %21 = vector.extract_strided_slice %20 {offsets = [0, 0], sizes = [8, 128], strides = [1, 1]} : vector<8x512xf32> to vector<8x128xf32>
    %cst_18 = arith.constant 5.000000e-01 : f32
    %22 = vector.broadcast %cst_18 : f32 to vector<8x128xf32>
    %23 = arith.mulf %22, %21 : vector<8x128xf32>
    %24 = math.tanh %23 : vector<8x128xf32>
    %cst_19 = arith.constant 5.000000e-01 : f32
    %25 = vector.broadcast %cst_19 : f32 to vector<8x128xf32>
    %26 = arith.mulf %25, %24 : vector<8x128xf32>
    %cst_20 = arith.constant 5.000000e-01 : f32
    %27 = vector.broadcast %cst_20 : f32 to vector<8x128xf32>
    %28 = arith.addf %26, %27 : vector<8x128xf32>
    %29 = vector.extract_strided_slice %20 {offsets = [0, 128], sizes = [8, 128], strides = [1, 1]} : vector<8x512xf32> to vector<8x128xf32>
    %cst_21 = arith.constant 5.000000e-01 : f32
    %30 = vector.broadcast %cst_21 : f32 to vector<8x128xf32>
    %31 = arith.mulf %30, %29 : vector<8x128xf32>
    %32 = math.tanh %31 : vector<8x128xf32>
    %cst_22 = arith.constant 5.000000e-01 : f32
    %33 = vector.broadcast %cst_22 : f32 to vector<8x128xf32>
    %34 = arith.mulf %33, %32 : vector<8x128xf32>
    %cst_23 = arith.constant 5.000000e-01 : f32
    %35 = vector.broadcast %cst_23 : f32 to vector<8x128xf32>
    %36 = arith.addf %34, %35 : vector<8x128xf32>
    %37 = vector.extract_strided_slice %20 {offsets = [0, 256], sizes = [8, 128], strides = [1, 1]} : vector<8x512xf32> to vector<8x128xf32>
    %38 = math.tanh %37 : vector<8x128xf32>
    %39 = vector.extract_strided_slice %20 {offsets = [0, 384], sizes = [8, 128], strides = [1, 1]} : vector<8x512xf32> to vector<8x128xf32>
    %cst_24 = arith.constant 5.000000e-01 : f32
    %40 = vector.broadcast %cst_24 : f32 to vector<8x128xf32>
    %41 = arith.mulf %40, %39 : vector<8x128xf32>
    %42 = math.tanh %41 : vector<8x128xf32>
    %cst_25 = arith.constant 5.000000e-01 : f32
    %43 = vector.broadcast %cst_25 : f32 to vector<8x128xf32>
    %44 = arith.mulf %43, %42 : vector<8x128xf32>
    %cst_26 = arith.constant 5.000000e-01 : f32
    %45 = vector.broadcast %cst_26 : f32 to vector<8x128xf32>
    %46 = arith.addf %44, %45 : vector<8x128xf32>
    %47 = arith.mulf %36, %12 : vector<8x128xf32>
    %48 = arith.mulf %28, %38 : vector<8x128xf32>
    %49 = arith.addf %47, %48 : vector<8x128xf32>
    %50 = math.tanh %49 : vector<8x128xf32>
    %51 = arith.mulf %46, %50 : vector<8x128xf32>
    %52 = arith.truncf %51 : vector<8x128xf32> to vector<8x128xbf16>
    %c0_27 = arith.constant 0 : index
    %53 = arith.index_cast %c0_i32_13 : i32 to index
    %c0_28 = arith.constant 0 : index
    %c0_29 = arith.constant 0 : index
    %54 = vector.load %arg6[%c0_27, %53, %c0_28, %c0_29] : memref<1x8x8x128xbf16, #tpu.memory_space<vmem>>, vector<1x1x8x128xbf16>
    %55 = vector.shape_cast %54 : vector<1x1x8x128xbf16> to vector<8x128xbf16>
    %56 = vector.shape_cast %52 : vector<8x128xbf16> to vector<1x1x8x128xbf16>
    tpu.vector_store %arg6[%c0_27, %53, %c0_28, %c0_29], %56 {strides = array<i32>} : memref<1x8x8x128xbf16, #tpu.memory_space<vmem>>, vector<1x1x8x128xbf16>,
    %c1_i32 = arith.constant 1 : i32
    %c8_i32_30 = arith.constant 8 : i32
    %57 = arith.muli %c1_i32, %c8_i32_30 : i32
    %58 = tpu.assume_multiple %57, 8 : i32
    %59 = arith.index_cast %58 : i32 to index
    %c0_31 = arith.constant 0 : index
    %60 = vector.load %arg7[%59, %c0_31] : memref<64x512xf32, #tpu.memory_space<vmem>>, vector<8x512xf32>
    %61 = arith.truncf %51 : vector<8x128xf32> to vector<8x128xbf16>
    %c0_32 = arith.constant 0 : index
    %c0_33 = arith.constant 0 : index
    %62 = vector.load %arg5[%c0_32, %c0_33] : memref<128x512xbf16, #tpu.memory_space<vmem>>, vector<128x512xbf16>
    %cst_34 = arith.constant dense<0.000000e+00> : vector<8x512xf32>
    %63 = tpu.matmul %61, %62, %cst_34 {dimension_numbers = #tpu.dot_dimension_numbers<[1], [0], [0], [1], [0, 0, 1, 1], [], []>} : vector<8x128xbf16>, vector<128x512xbf16>, vector<8x512xf32> -> vector<8x512xf32>
    %64 = arith.addf %60, %63 : vector<8x512xf32>
    %65 = vector.extract_strided_slice %64 {offsets = [0, 0], sizes = [8, 128], strides = [1, 1]} : vector<8x512xf32> to vector<8x128xf32>
    %cst_35 = arith.constant 5.000000e-01 : f32
    %66 = vector.broadcast %cst_35 : f32 to vector<8x128xf32>
    %67 = arith.mulf %66, %65 : vector<8x128xf32>
    %68 = math.tanh %67 : vector<8x128xf32>
    %cst_36 = arith.constant 5.000000e-01 : f32
    %69 = vector.broadcast %cst_36 : f32 to vector<8x128xf32>
    %70 = arith.mulf %69, %68 : vector<8x128xf32>
    %cst_37 = arith.constant 5.000000e-01 : f32
    %71 = vector.broadcast %cst_37 : f32 to vector<8x128xf32>
    %72 = arith.addf %70, %71 : vector<8x128xf32>
    %73 = vector.extract_strided_slice %64 {offsets = [0, 128], sizes = [8, 128], strides = [1, 1]} : vector<8x512xf32> to vector<8x128xf32>
    %cst_38 = arith.constant 5.000000e-01 : f32
    %74 = vector.broadcast %cst_38 : f32 to vector<8x128xf32>
    %75 = arith.mulf %74, %73 : vector<8x128xf32>
    %76 = math.tanh %75 : vector<8x128xf32>
    %cst_39 = arith.constant 5.000000e-01 : f32
    %77 = vector.broadcast %cst_39 : f32 to vector<8x128xf32>
    %78 = arith.mulf %77, %76 : vector<8x128xf32>
    %cst_40 = arith.constant 5.000000e-01 : f32
    %79 = vector.broadcast %cst_40 : f32 to vector<8x128xf32>
    %80 = arith.addf %78, %79 : vector<8x128xf32>
    %81 = vector.extract_strided_slice %64 {offsets = [0, 256], sizes = [8, 128], strides = [1, 1]} : vector<8x512xf32> to vector<8x128xf32>
    %82 = math.tanh %81 : vector<8x128xf32>
    %83 = vector.extract_strided_slice %64 {offsets = [0, 384], sizes = [8, 128], strides = [1, 1]} : vector<8x512xf32> to vector<8x128xf32>
    %cst_41 = arith.constant 5.000000e-01 : f32
    %84 = vector.broadcast %cst_41 : f32 to vector<8x128xf32>
    %85 = arith.mulf %84, %83 : vector<8x128xf32>
    %86 = math.tanh %85 : vector<8x128xf32>
    %cst_42 = arith.constant 5.000000e-01 : f32
    %87 = vector.broadcast %cst_42 : f32 to vector<8x128xf32>
    %88 = arith.mulf %87, %86 : vector<8x128xf32>
    %cst_43 = arith.constant 5.000000e-01 : f32
    %89 = vector.broadcast %cst_43 : f32 to vector<8x128xf32>
    %90 = arith.addf %88, %89 : vector<8x128xf32>
    %91 = arith.mulf %80, %49 : vector<8x128xf32>
    %92 = arith.mulf %72, %82 : vector<8x128xf32>
    %93 = arith.addf %91, %92 : vector<8x128xf32>
    %94 = math.tanh %93 : vector<8x128xf32>
    %95 = arith.mulf %90, %94 : vector<8x128xf32>
    %96 = arith.truncf %95 : vector<8x128xf32> to vector<8x128xbf16>
    %c0_44 = arith.constant 0 : index
    %97 = arith.index_cast %c1_i32 : i32 to index
    %c0_45 = arith.constant 0 : index
    %c0_46 = arith.constant 0 : index
    %98 = vector.load %arg6[%c0_44, %97, %c0_45, %c0_46] : memref<1x8x8x128xbf16, #tpu.memory_space<vmem>>, vector<1x1x8x128xbf16>
    %99 = vector.shape_cast %98 : vector<1x1x8x128xbf16> to vector<8x128xbf16>
    %100 = vector.shape_cast %96 : vector<8x128xbf16> to vector<1x1x8x128xbf16>
    tpu.vector_store %arg6[%c0_44, %97, %c0_45, %c0_46], %100 {strides = array<i32>} : memref<1x8x8x128xbf16, #tpu.memory_space<vmem>>, vector<1x1x8x128xbf16>,
    %c2_i32 = arith.constant 2 : i32
    %c8_i32_47 = arith.constant 8 : i32
    %101 = arith.muli %c2_i32, %c8_i32_47 : i32
    %102 = tpu.assume_multiple %101, 8 : i32
    %103 = arith.index_cast %102 : i32 to index
    %c0_48 = arith.constant 0 : index
    %104 = vector.load %arg7[%103, %c0_48] : memref<64x512xf32, #tpu.memory_space<vmem>>, vector<8x512xf32>
    %105 = arith.truncf %95 : vector<8x128xf32> to vector<8x128xbf16>
    %c0_49 = arith.constant 0 : index
    %c0_50 = arith.constant 0 : index
    %106 = vector.load %arg5[%c0_49, %c0_50] : memref<128x512xbf16, #tpu.memory_space<vmem>>, vector<128x512xbf16>
    %cst_51 = arith.constant dense<0.000000e+00> : vector<8x512xf32>
    %107 = tpu.matmul %105, %106, %cst_51 {dimension_numbers = #tpu.dot_dimension_numbers<[1], [0], [0], [1], [0, 0, 1, 1], [], []>} : vector<8x128xbf16>, vector<128x512xbf16>, vector<8x512xf32> -> vector<8x512xf32>
    %108 = arith.addf %104, %107 : vector<8x512xf32>
    %109 = vector.extract_strided_slice %108 {offsets = [0, 0], sizes = [8, 128], strides = [1, 1]} : vector<8x512xf32> to vector<8x128xf32>
    %cst_52 = arith.constant 5.000000e-01 : f32
    %110 = vector.broadcast %cst_52 : f32 to vector<8x128xf32>
    %111 = arith.mulf %110, %109 : vector<8x128xf32>
    %112 = math.tanh %111 : vector<8x128xf32>
    %cst_53 = arith.constant 5.000000e-01 : f32
    %113 = vector.broadcast %cst_53 : f32 to vector<8x128xf32>
    %114 = arith.mulf %113, %112 : vector<8x128xf32>
    %cst_54 = arith.constant 5.000000e-01 : f32
    %115 = vector.broadcast %cst_54 : f32 to vector<8x128xf32>
    %116 = arith.addf %114, %115 : vector<8x128xf32>
    %117 = vector.extract_strided_slice %108 {offsets = [0, 128], sizes = [8, 128], strides = [1, 1]} : vector<8x512xf32> to vector<8x128xf32>
    %cst_55 = arith.constant 5.000000e-01 : f32
    %118 = vector.broadcast %cst_55 : f32 to vector<8x128xf32>
    %119 = arith.mulf %118, %117 : vector<8x128xf32>
    %120 = math.tanh %119 : vector<8x128xf32>
    %cst_56 = arith.constant 5.000000e-01 : f32
    %121 = vector.broadcast %cst_56 : f32 to vector<8x128xf32>
    %122 = arith.mulf %121, %120 : vector<8x128xf32>
    %cst_57 = arith.constant 5.000000e-01 : f32
    %123 = vector.broadcast %cst_57 : f32 to vector<8x128xf32>
    %124 = arith.addf %122, %123 : vector<8x128xf32>
    %125 = vector.extract_strided_slice %108 {offsets = [0, 256], sizes = [8, 128], strides = [1, 1]} : vector<8x512xf32> to vector<8x128xf32>
    %126 = math.tanh %125 : vector<8x128xf32>
    %127 = vector.extract_strided_slice %108 {offsets = [0, 384], sizes = [8, 128], strides = [1, 1]} : vector<8x512xf32> to vector<8x128xf32>
    %cst_58 = arith.constant 5.000000e-01 : f32
    %128 = vector.broadcast %cst_58 : f32 to vector<8x128xf32>
    %129 = arith.mulf %128, %127 : vector<8x128xf32>
    %130 = math.tanh %129 : vector<8x128xf32>
    %cst_59 = arith.constant 5.000000e-01 : f32
    %131 = vector.broadcast %cst_59 : f32 to vector<8x128xf32>
    %132 = arith.mulf %131, %130 : vector<8x128xf32>
    %cst_60 = arith.constant 5.000000e-01 : f32
    %133 = vector.broadcast %cst_60 : f32 to vector<8x128xf32>
    %134 = arith.addf %132, %133 : vector<8x128xf32>
    %135 = arith.mulf %124, %93 : vector<8x128xf32>
    %136 = arith.mulf %116, %126 : vector<8x128xf32>
    %137 = arith.addf %135, %136 : vector<8x128xf32>
    %138 = math.tanh %137 : vector<8x128xf32>
    %139 = arith.mulf %134, %138 : vector<8x128xf32>
    %140 = arith.truncf %139 : vector<8x128xf32> to vector<8x128xbf16>
    %c0_61 = arith.constant 0 : index
    %141 = arith.index_cast %c2_i32 : i32 to index
    %c0_62 = arith.constant 0 : index
    %c0_63 = arith.constant 0 : index
    %142 = vector.load %arg6[%c0_61, %141, %c0_62, %c0_63] : memref<1x8x8x128xbf16, #tpu.memory_space<vmem>>, vector<1x1x8x128xbf16>
    %143 = vector.shape_cast %142 : vector<1x1x8x128xbf16> to vector<8x128xbf16>
    %144 = vector.shape_cast %140 : vector<8x128xbf16> to vector<1x1x8x128xbf16>
    tpu.vector_store %arg6[%c0_61, %141, %c0_62, %c0_63], %144 {strides = array<i32>} : memref<1x8x8x128xbf16, #tpu.memory_space<vmem>>, vector<1x1x8x128xbf16>,
    %c3_i32 = arith.constant 3 : i32
    %c8_i32_64 = arith.constant 8 : i32
    %145 = arith.muli %c3_i32, %c8_i32_64 : i32
    %146 = tpu.assume_multiple %145, 8 : i32
    %147 = arith.index_cast %146 : i32 to index
    %c0_65 = arith.constant 0 : index
    %148 = vector.load %arg7[%147, %c0_65] : memref<64x512xf32, #tpu.memory_space<vmem>>, vector<8x512xf32>
    %149 = arith.truncf %139 : vector<8x128xf32> to vector<8x128xbf16>
    %c0_66 = arith.constant 0 : index
    %c0_67 = arith.constant 0 : index
    %150 = vector.load %arg5[%c0_66, %c0_67] : memref<128x512xbf16, #tpu.memory_space<vmem>>, vector<128x512xbf16>
    %cst_68 = arith.constant dense<0.000000e+00> : vector<8x512xf32>
    %151 = tpu.matmul %149, %150, %cst_68 {dimension_numbers = #tpu.dot_dimension_numbers<[1], [0], [0], [1], [0, 0, 1, 1], [], []>} : vector<8x128xbf16>, vector<128x512xbf16>, vector<8x512xf32> -> vector<8x512xf32>
    %152 = arith.addf %148, %151 : vector<8x512xf32>
    %153 = vector.extract_strided_slice %152 {offsets = [0, 0], sizes = [8, 128], strides = [1, 1]} : vector<8x512xf32> to vector<8x128xf32>
    %cst_69 = arith.constant 5.000000e-01 : f32
    %154 = vector.broadcast %cst_69 : f32 to vector<8x128xf32>
    %155 = arith.mulf %154, %153 : vector<8x128xf32>
    %156 = math.tanh %155 : vector<8x128xf32>
    %cst_70 = arith.constant 5.000000e-01 : f32
    %157 = vector.broadcast %cst_70 : f32 to vector<8x128xf32>
    %158 = arith.mulf %157, %156 : vector<8x128xf32>
    %cst_71 = arith.constant 5.000000e-01 : f32
    %159 = vector.broadcast %cst_71 : f32 to vector<8x128xf32>
    %160 = arith.addf %158, %159 : vector<8x128xf32>
    %161 = vector.extract_strided_slice %152 {offsets = [0, 128], sizes = [8, 128], strides = [1, 1]} : vector<8x512xf32> to vector<8x128xf32>
    %cst_72 = arith.constant 5.000000e-01 : f32
    %162 = vector.broadcast %cst_72 : f32 to vector<8x128xf32>
    %163 = arith.mulf %162, %161 : vector<8x128xf32>
    %164 = math.tanh %163 : vector<8x128xf32>
    %cst_73 = arith.constant 5.000000e-01 : f32
    %165 = vector.broadcast %cst_73 : f32 to vector<8x128xf32>
    %166 = arith.mulf %165, %164 : vector<8x128xf32>
    %cst_74 = arith.constant 5.000000e-01 : f32
    %167 = vector.broadcast %cst_74 : f32 to vector<8x128xf32>
    %168 = arith.addf %166, %167 : vector<8x128xf32>
    %169 = vector.extract_strided_slice %152 {offsets = [0, 256], sizes = [8, 128], strides = [1, 1]} : vector<8x512xf32> to vector<8x128xf32>
    %170 = math.tanh %169 : vector<8x128xf32>
    %171 = vector.extract_strided_slice %152 {offsets = [0, 384], sizes = [8, 128], strides = [1, 1]} : vector<8x512xf32> to vector<8x128xf32>
    %cst_75 = arith.constant 5.000000e-01 : f32
    %172 = vector.broadcast %cst_75 : f32 to vector<8x128xf32>
    %173 = arith.mulf %172, %171 : vector<8x128xf32>
    %174 = math.tanh %173 : vector<8x128xf32>
    %cst_76 = arith.constant 5.000000e-01 : f32
    %175 = vector.broadcast %cst_76 : f32 to vector<8x128xf32>
    %176 = arith.mulf %175, %174 : vector<8x128xf32>
    %cst_77 = arith.constant 5.000000e-01 : f32
    %177 = vector.broadcast %cst_77 : f32 to vector<8x128xf32>
    %178 = arith.addf %176, %177 : vector<8x128xf32>
    %179 = arith.mulf %168, %137 : vector<8x128xf32>
    %180 = arith.mulf %160, %170 : vector<8x128xf32>
    %181 = arith.addf %179, %180 : vector<8x128xf32>
    %182 = math.tanh %181 : vector<8x128xf32>
    %183 = arith.mulf %178, %182 : vector<8x128xf32>
    %184 = arith.truncf %183 : vector<8x128xf32> to vector<8x128xbf16>
    %c0_78 = arith.constant 0 : index
    %185 = arith.index_cast %c3_i32 : i32 to index
    %c0_79 = arith.constant 0 : index
    %c0_80 = arith.constant 0 : index
    %186 = vector.load %arg6[%c0_78, %185, %c0_79, %c0_80] : memref<1x8x8x128xbf16, #tpu.memory_space<vmem>>, vector<1x1x8x128xbf16>
    %187 = vector.shape_cast %186 : vector<1x1x8x128xbf16> to vector<8x128xbf16>
    %188 = vector.shape_cast %184 : vector<8x128xbf16> to vector<1x1x8x128xbf16>
    tpu.vector_store %arg6[%c0_78, %185, %c0_79, %c0_80], %188 {strides = array<i32>} : memref<1x8x8x128xbf16, #tpu.memory_space<vmem>>, vector<1x1x8x128xbf16>,
    %c4_i32 = arith.constant 4 : i32
    %c8_i32_81 = arith.constant 8 : i32
    %189 = arith.muli %c4_i32, %c8_i32_81 : i32
    %190 = tpu.assume_multiple %189, 8 : i32
    %191 = arith.index_cast %190 : i32 to index
    %c0_82 = arith.constant 0 : index
    %192 = vector.load %arg7[%191, %c0_82] : memref<64x512xf32, #tpu.memory_space<vmem>>, vector<8x512xf32>
    %193 = arith.truncf %183 : vector<8x128xf32> to vector<8x128xbf16>
    %c0_83 = arith.constant 0 : index
    %c0_84 = arith.constant 0 : index
    %194 = vector.load %arg5[%c0_83, %c0_84] : memref<128x512xbf16, #tpu.memory_space<vmem>>, vector<128x512xbf16>
    %cst_85 = arith.constant dense<0.000000e+00> : vector<8x512xf32>
    %195 = tpu.matmul %193, %194, %cst_85 {dimension_numbers = #tpu.dot_dimension_numbers<[1], [0], [0], [1], [0, 0, 1, 1], [], []>} : vector<8x128xbf16>, vector<128x512xbf16>, vector<8x512xf32> -> vector<8x512xf32>
    %196 = arith.addf %192, %195 : vector<8x512xf32>
    %197 = vector.extract_strided_slice %196 {offsets = [0, 0], sizes = [8, 128], strides = [1, 1]} : vector<8x512xf32> to vector<8x128xf32>
    %cst_86 = arith.constant 5.000000e-01 : f32
    %198 = vector.broadcast %cst_86 : f32 to vector<8x128xf32>
    %199 = arith.mulf %198, %197 : vector<8x128xf32>
    %200 = math.tanh %199 : vector<8x128xf32>
    %cst_87 = arith.constant 5.000000e-01 : f32
    %201 = vector.broadcast %cst_87 : f32 to vector<8x128xf32>
    %202 = arith.mulf %201, %200 : vector<8x128xf32>
    %cst_88 = arith.constant 5.000000e-01 : f32
    %203 = vector.broadcast %cst_88 : f32 to vector<8x128xf32>
    %204 = arith.addf %202, %203 : vector<8x128xf32>
    %205 = vector.extract_strided_slice %196 {offsets = [0, 128], sizes = [8, 128], strides = [1, 1]} : vector<8x512xf32> to vector<8x128xf32>
    %cst_89 = arith.constant 5.000000e-01 : f32
    %206 = vector.broadcast %cst_89 : f32 to vector<8x128xf32>
    %207 = arith.mulf %206, %205 : vector<8x128xf32>
    %208 = math.tanh %207 : vector<8x128xf32>
    %cst_90 = arith.constant 5.000000e-01 : f32
    %209 = vector.broadcast %cst_90 : f32 to vector<8x128xf32>
    %210 = arith.mulf %209, %208 : vector<8x128xf32>
    %cst_91 = arith.constant 5.000000e-01 : f32
    %211 = vector.broadcast %cst_91 : f32 to vector<8x128xf32>
    %212 = arith.addf %210, %211 : vector<8x128xf32>
    %213 = vector.extract_strided_slice %196 {offsets = [0, 256], sizes = [8, 128], strides = [1, 1]} : vector<8x512xf32> to vector<8x128xf32>
    %214 = math.tanh %213 : vector<8x128xf32>
    %215 = vector.extract_strided_slice %196 {offsets = [0, 384], sizes = [8, 128], strides = [1, 1]} : vector<8x512xf32> to vector<8x128xf32>
    %cst_92 = arith.constant 5.000000e-01 : f32
    %216 = vector.broadcast %cst_92 : f32 to vector<8x128xf32>
    %217 = arith.mulf %216, %215 : vector<8x128xf32>
    %218 = math.tanh %217 : vector<8x128xf32>
    %cst_93 = arith.constant 5.000000e-01 : f32
    %219 = vector.broadcast %cst_93 : f32 to vector<8x128xf32>
    %220 = arith.mulf %219, %218 : vector<8x128xf32>
    %cst_94 = arith.constant 5.000000e-01 : f32
    %221 = vector.broadcast %cst_94 : f32 to vector<8x128xf32>
    %222 = arith.addf %220, %221 : vector<8x128xf32>
    %223 = arith.mulf %212, %181 : vector<8x128xf32>
    %224 = arith.mulf %204, %214 : vector<8x128xf32>
    %225 = arith.addf %223, %224 : vector<8x128xf32>
    %226 = math.tanh %225 : vector<8x128xf32>
    %227 = arith.mulf %222, %226 : vector<8x128xf32>
    %228 = arith.truncf %227 : vector<8x128xf32> to vector<8x128xbf16>
    %c0_95 = arith.constant 0 : index
    %229 = arith.index_cast %c4_i32 : i32 to index
    %c0_96 = arith.constant 0 : index
    %c0_97 = arith.constant 0 : index
    %230 = vector.load %arg6[%c0_95, %229, %c0_96, %c0_97] : memref<1x8x8x128xbf16, #tpu.memory_space<vmem>>, vector<1x1x8x128xbf16>
    %231 = vector.shape_cast %230 : vector<1x1x8x128xbf16> to vector<8x128xbf16>
    %232 = vector.shape_cast %228 : vector<8x128xbf16> to vector<1x1x8x128xbf16>
    tpu.vector_store %arg6[%c0_95, %229, %c0_96, %c0_97], %232 {strides = array<i32>} : memref<1x8x8x128xbf16, #tpu.memory_space<vmem>>, vector<1x1x8x128xbf16>,
    %c5_i32 = arith.constant 5 : i32
    %c8_i32_98 = arith.constant 8 : i32
    %233 = arith.muli %c5_i32, %c8_i32_98 : i32
    %234 = tpu.assume_multiple %233, 8 : i32
    %235 = arith.index_cast %234 : i32 to index
    %c0_99 = arith.constant 0 : index
    %236 = vector.load %arg7[%235, %c0_99] : memref<64x512xf32, #tpu.memory_space<vmem>>, vector<8x512xf32>
    %237 = arith.truncf %227 : vector<8x128xf32> to vector<8x128xbf16>
    %c0_100 = arith.constant 0 : index
    %c0_101 = arith.constant 0 : index
    %238 = vector.load %arg5[%c0_100, %c0_101] : memref<128x512xbf16, #tpu.memory_space<vmem>>, vector<128x512xbf16>
    %cst_102 = arith.constant dense<0.000000e+00> : vector<8x512xf32>
    %239 = tpu.matmul %237, %238, %cst_102 {dimension_numbers = #tpu.dot_dimension_numbers<[1], [0], [0], [1], [0, 0, 1, 1], [], []>} : vector<8x128xbf16>, vector<128x512xbf16>, vector<8x512xf32> -> vector<8x512xf32>
    %240 = arith.addf %236, %239 : vector<8x512xf32>
    %241 = vector.extract_strided_slice %240 {offsets = [0, 0], sizes = [8, 128], strides = [1, 1]} : vector<8x512xf32> to vector<8x128xf32>
    %cst_103 = arith.constant 5.000000e-01 : f32
    %242 = vector.broadcast %cst_103 : f32 to vector<8x128xf32>
    %243 = arith.mulf %242, %241 : vector<8x128xf32>
    %244 = math.tanh %243 : vector<8x128xf32>
    %cst_104 = arith.constant 5.000000e-01 : f32
    %245 = vector.broadcast %cst_104 : f32 to vector<8x128xf32>
    %246 = arith.mulf %245, %244 : vector<8x128xf32>
    %cst_105 = arith.constant 5.000000e-01 : f32
    %247 = vector.broadcast %cst_105 : f32 to vector<8x128xf32>
    %248 = arith.addf %246, %247 : vector<8x128xf32>
    %249 = vector.extract_strided_slice %240 {offsets = [0, 128], sizes = [8, 128], strides = [1, 1]} : vector<8x512xf32> to vector<8x128xf32>
    %cst_106 = arith.constant 5.000000e-01 : f32
    %250 = vector.broadcast %cst_106 : f32 to vector<8x128xf32>
    %251 = arith.mulf %250, %249 : vector<8x128xf32>
    %252 = math.tanh %251 : vector<8x128xf32>
    %cst_107 = arith.constant 5.000000e-01 : f32
    %253 = vector.broadcast %cst_107 : f32 to vector<8x128xf32>
    %254 = arith.mulf %253, %252 : vector<8x128xf32>
    %cst_108 = arith.constant 5.000000e-01 : f32
    %255 = vector.broadcast %cst_108 : f32 to vector<8x128xf32>
    %256 = arith.addf %254, %255 : vector<8x128xf32>
    %257 = vector.extract_strided_slice %240 {offsets = [0, 256], sizes = [8, 128], strides = [1, 1]} : vector<8x512xf32> to vector<8x128xf32>
    %258 = math.tanh %257 : vector<8x128xf32>
    %259 = vector.extract_strided_slice %240 {offsets = [0, 384], sizes = [8, 128], strides = [1, 1]} : vector<8x512xf32> to vector<8x128xf32>
    %cst_109 = arith.constant 5.000000e-01 : f32
    %260 = vector.broadcast %cst_109 : f32 to vector<8x128xf32>
    %261 = arith.mulf %260, %259 : vector<8x128xf32>
    %262 = math.tanh %261 : vector<8x128xf32>
    %cst_110 = arith.constant 5.000000e-01 : f32
    %263 = vector.broadcast %cst_110 : f32 to vector<8x128xf32>
    %264 = arith.mulf %263, %262 : vector<8x128xf32>
    %cst_111 = arith.constant 5.000000e-01 : f32
    %265 = vector.broadcast %cst_111 : f32 to vector<8x128xf32>
    %266 = arith.addf %264, %265 : vector<8x128xf32>
    %267 = arith.mulf %256, %225 : vector<8x128xf32>
    %268 = arith.mulf %248, %258 : vector<8x128xf32>
    %269 = arith.addf %267, %268 : vector<8x128xf32>
    %270 = math.tanh %269 : vector<8x128xf32>
    %271 = arith.mulf %266, %270 : vector<8x128xf32>
    %272 = arith.truncf %271 : vector<8x128xf32> to vector<8x128xbf16>
    %c0_112 = arith.constant 0 : index
    %273 = arith.index_cast %c5_i32 : i32 to index
    %c0_113 = arith.constant 0 : index
    %c0_114 = arith.constant 0 : index
    %274 = vector.load %arg6[%c0_112, %273, %c0_113, %c0_114] : memref<1x8x8x128xbf16, #tpu.memory_space<vmem>>, vector<1x1x8x128xbf16>
    %275 = vector.shape_cast %274 : vector<1x1x8x128xbf16> to vector<8x128xbf16>
    %276 = vector.shape_cast %272 : vector<8x128xbf16> to vector<1x1x8x128xbf16>
    tpu.vector_store %arg6[%c0_112, %273, %c0_113, %c0_114], %276 {strides = array<i32>} : memref<1x8x8x128xbf16, #tpu.memory_space<vmem>>, vector<1x1x8x128xbf16>,
    %c6_i32 = arith.constant 6 : i32
    %c8_i32_115 = arith.constant 8 : i32
    %277 = arith.muli %c6_i32, %c8_i32_115 : i32
    %278 = tpu.assume_multiple %277, 8 : i32
    %279 = arith.index_cast %278 : i32 to index
    %c0_116 = arith.constant 0 : index
    %280 = vector.load %arg7[%279, %c0_116] : memref<64x512xf32, #tpu.memory_space<vmem>>, vector<8x512xf32>
    %281 = arith.truncf %271 : vector<8x128xf32> to vector<8x128xbf16>
    %c0_117 = arith.constant 0 : index
    %c0_118 = arith.constant 0 : index
    %282 = vector.load %arg5[%c0_117, %c0_118] : memref<128x512xbf16, #tpu.memory_space<vmem>>, vector<128x512xbf16>
    %cst_119 = arith.constant dense<0.000000e+00> : vector<8x512xf32>
    %283 = tpu.matmul %281, %282, %cst_119 {dimension_numbers = #tpu.dot_dimension_numbers<[1], [0], [0], [1], [0, 0, 1, 1], [], []>} : vector<8x128xbf16>, vector<128x512xbf16>, vector<8x512xf32> -> vector<8x512xf32>
    %284 = arith.addf %280, %283 : vector<8x512xf32>
    %285 = vector.extract_strided_slice %284 {offsets = [0, 0], sizes = [8, 128], strides = [1, 1]} : vector<8x512xf32> to vector<8x128xf32>
    %cst_120 = arith.constant 5.000000e-01 : f32
    %286 = vector.broadcast %cst_120 : f32 to vector<8x128xf32>
    %287 = arith.mulf %286, %285 : vector<8x128xf32>
    %288 = math.tanh %287 : vector<8x128xf32>
    %cst_121 = arith.constant 5.000000e-01 : f32
    %289 = vector.broadcast %cst_121 : f32 to vector<8x128xf32>
    %290 = arith.mulf %289, %288 : vector<8x128xf32>
    %cst_122 = arith.constant 5.000000e-01 : f32
    %291 = vector.broadcast %cst_122 : f32 to vector<8x128xf32>
    %292 = arith.addf %290, %291 : vector<8x128xf32>
    %293 = vector.extract_strided_slice %284 {offsets = [0, 128], sizes = [8, 128], strides = [1, 1]} : vector<8x512xf32> to vector<8x128xf32>
    %cst_123 = arith.constant 5.000000e-01 : f32
    %294 = vector.broadcast %cst_123 : f32 to vector<8x128xf32>
    %295 = arith.mulf %294, %293 : vector<8x128xf32>
    %296 = math.tanh %295 : vector<8x128xf32>
    %cst_124 = arith.constant 5.000000e-01 : f32
    %297 = vector.broadcast %cst_124 : f32 to vector<8x128xf32>
    %298 = arith.mulf %297, %296 : vector<8x128xf32>
    %cst_125 = arith.constant 5.000000e-01 : f32
    %299 = vector.broadcast %cst_125 : f32 to vector<8x128xf32>
    %300 = arith.addf %298, %299 : vector<8x128xf32>
    %301 = vector.extract_strided_slice %284 {offsets = [0, 256], sizes = [8, 128], strides = [1, 1]} : vector<8x512xf32> to vector<8x128xf32>
    %302 = math.tanh %301 : vector<8x128xf32>
    %303 = vector.extract_strided_slice %284 {offsets = [0, 384], sizes = [8, 128], strides = [1, 1]} : vector<8x512xf32> to vector<8x128xf32>
    %cst_126 = arith.constant 5.000000e-01 : f32
    %304 = vector.broadcast %cst_126 : f32 to vector<8x128xf32>
    %305 = arith.mulf %304, %303 : vector<8x128xf32>
    %306 = math.tanh %305 : vector<8x128xf32>
    %cst_127 = arith.constant 5.000000e-01 : f32
    %307 = vector.broadcast %cst_127 : f32 to vector<8x128xf32>
    %308 = arith.mulf %307, %306 : vector<8x128xf32>
    %cst_128 = arith.constant 5.000000e-01 : f32
    %309 = vector.broadcast %cst_128 : f32 to vector<8x128xf32>
    %310 = arith.addf %308, %309 : vector<8x128xf32>
    %311 = arith.mulf %300, %269 : vector<8x128xf32>
    %312 = arith.mulf %292, %302 : vector<8x128xf32>
    %313 = arith.addf %311, %312 : vector<8x128xf32>
    %314 = math.tanh %313 : vector<8x128xf32>
    %315 = arith.mulf %310, %314 : vector<8x128xf32>
    %316 = arith.truncf %315 : vector<8x128xf32> to vector<8x128xbf16>
    %c0_129 = arith.constant 0 : index
    %317 = arith.index_cast %c6_i32 : i32 to index
    %c0_130 = arith.constant 0 : index
    %c0_131 = arith.constant 0 : index
    %318 = vector.load %arg6[%c0_129, %317, %c0_130, %c0_131] : memref<1x8x8x128xbf16, #tpu.memory_space<vmem>>, vector<1x1x8x128xbf16>
    %319 = vector.shape_cast %318 : vector<1x1x8x128xbf16> to vector<8x128xbf16>
    %320 = vector.shape_cast %316 : vector<8x128xbf16> to vector<1x1x8x128xbf16>
    tpu.vector_store %arg6[%c0_129, %317, %c0_130, %c0_131], %320 {strides = array<i32>} : memref<1x8x8x128xbf16, #tpu.memory_space<vmem>>, vector<1x1x8x128xbf16>,
    %c7_i32 = arith.constant 7 : i32
    %c8_i32_132 = arith.constant 8 : i32
    %321 = arith.muli %c7_i32, %c8_i32_132 : i32
    %322 = tpu.assume_multiple %321, 8 : i32
    %323 = arith.index_cast %322 : i32 to index
    %c0_133 = arith.constant 0 : index
    %324 = vector.load %arg7[%323, %c0_133] : memref<64x512xf32, #tpu.memory_space<vmem>>, vector<8x512xf32>
    %325 = arith.truncf %315 : vector<8x128xf32> to vector<8x128xbf16>
    %c0_134 = arith.constant 0 : index
    %c0_135 = arith.constant 0 : index
    %326 = vector.load %arg5[%c0_134, %c0_135] : memref<128x512xbf16, #tpu.memory_space<vmem>>, vector<128x512xbf16>
    %cst_136 = arith.constant dense<0.000000e+00> : vector<8x512xf32>
    %327 = tpu.matmul %325, %326, %cst_136 {dimension_numbers = #tpu.dot_dimension_numbers<[1], [0], [0], [1], [0, 0, 1, 1], [], []>} : vector<8x128xbf16>, vector<128x512xbf16>, vector<8x512xf32> -> vector<8x512xf32>
    %328 = arith.addf %324, %327 : vector<8x512xf32>
    %329 = vector.extract_strided_slice %328 {offsets = [0, 0], sizes = [8, 128], strides = [1, 1]} : vector<8x512xf32> to vector<8x128xf32>
    %cst_137 = arith.constant 5.000000e-01 : f32
    %330 = vector.broadcast %cst_137 : f32 to vector<8x128xf32>
    %331 = arith.mulf %330, %329 : vector<8x128xf32>
    %332 = math.tanh %331 : vector<8x128xf32>
    %cst_138 = arith.constant 5.000000e-01 : f32
    %333 = vector.broadcast %cst_138 : f32 to vector<8x128xf32>
    %334 = arith.mulf %333, %332 : vector<8x128xf32>
    %cst_139 = arith.constant 5.000000e-01 : f32
    %335 = vector.broadcast %cst_139 : f32 to vector<8x128xf32>
    %336 = arith.addf %334, %335 : vector<8x128xf32>
    %337 = vector.extract_strided_slice %328 {offsets = [0, 128], sizes = [8, 128], strides = [1, 1]} : vector<8x512xf32> to vector<8x128xf32>
    %cst_140 = arith.constant 5.000000e-01 : f32
    %338 = vector.broadcast %cst_140 : f32 to vector<8x128xf32>
    %339 = arith.mulf %338, %337 : vector<8x128xf32>
    %340 = math.tanh %339 : vector<8x128xf32>
    %cst_141 = arith.constant 5.000000e-01 : f32
    %341 = vector.broadcast %cst_141 : f32 to vector<8x128xf32>
    %342 = arith.mulf %341, %340 : vector<8x128xf32>
    %cst_142 = arith.constant 5.000000e-01 : f32
    %343 = vector.broadcast %cst_142 : f32 to vector<8x128xf32>
    %344 = arith.addf %342, %343 : vector<8x128xf32>
    %345 = vector.extract_strided_slice %328 {offsets = [0, 256], sizes = [8, 128], strides = [1, 1]} : vector<8x512xf32> to vector<8x128xf32>
    %346 = math.tanh %345 : vector<8x128xf32>
    %347 = vector.extract_strided_slice %328 {offsets = [0, 384], sizes = [8, 128], strides = [1, 1]} : vector<8x512xf32> to vector<8x128xf32>
    %cst_143 = arith.constant 5.000000e-01 : f32
    %348 = vector.broadcast %cst_143 : f32 to vector<8x128xf32>
    %349 = arith.mulf %348, %347 : vector<8x128xf32>
    %350 = math.tanh %349 : vector<8x128xf32>
    %cst_144 = arith.constant 5.000000e-01 : f32
    %351 = vector.broadcast %cst_144 : f32 to vector<8x128xf32>
    %352 = arith.mulf %351, %350 : vector<8x128xf32>
    %cst_145 = arith.constant 5.000000e-01 : f32
    %353 = vector.broadcast %cst_145 : f32 to vector<8x128xf32>
    %354 = arith.addf %352, %353 : vector<8x128xf32>
    %355 = arith.mulf %344, %313 : vector<8x128xf32>
    %356 = arith.mulf %336, %346 : vector<8x128xf32>
    %357 = arith.addf %355, %356 : vector<8x128xf32>
    %358 = math.tanh %357 : vector<8x128xf32>
    %359 = arith.mulf %354, %358 : vector<8x128xf32>
    %360 = arith.truncf %359 : vector<8x128xf32> to vector<8x128xbf16>
    %c0_146 = arith.constant 0 : index
    %361 = arith.index_cast %c7_i32 : i32 to index
    %c0_147 = arith.constant 0 : index
    %c0_148 = arith.constant 0 : index
    %362 = vector.load %arg6[%c0_146, %361, %c0_147, %c0_148] : memref<1x8x8x128xbf16, #tpu.memory_space<vmem>>, vector<1x1x8x128xbf16>
    %363 = vector.shape_cast %362 : vector<1x1x8x128xbf16> to vector<8x128xbf16>
    %364 = vector.shape_cast %360 : vector<8x128xbf16> to vector<1x1x8x128xbf16>
    tpu.vector_store %arg6[%c0_146, %361, %c0_147, %c0_148], %364 {strides = array<i32>} : memref<1x8x8x128xbf16, #tpu.memory_space<vmem>>, vector<1x1x8x128xbf16>,
    %c8_i32_149 = arith.constant 8 : i32
    %c0_150 = arith.constant 0 : index
    %c0_151 = arith.constant 0 : index
    %365 = vector.load %arg8[%c0_150, %c0_151] : memref<8x128xf32, #tpu.memory_space<vmem>>, vector<8x128xf32>
    tpu.vector_store %arg8[%c0_150, %c0_151], %359 {strides = array<i32>} : memref<8x128xf32, #tpu.memory_space<vmem>>, vector<8x128xf32>,
    %c0_152 = arith.constant 0 : index
    %c0_153 = arith.constant 0 : index
    %366 = vector.load %arg9[%c0_152, %c0_153] : memref<8x128xf32, #tpu.memory_space<vmem>>, vector<8x128xf32>
    tpu.vector_store %arg9[%c0_152, %c0_153], %357 {strides = array<i32>} : memref<8x128xf32, #tpu.memory_space<vmem>>, vector<8x128xf32>,
    return
  }
  func.func @transform_0(%arg0: i32, %arg1: i32) -> (i32, i32, i32) {
    %c0_i32 = arith.constant 0 : i32
    %c0_i32_0 = arith.constant 0 : i32
    return %arg0, %arg1, %c0_i32 : i32, i32, i32
  }
  func.func @transform_1(%arg0: i32, %arg1: i32) -> (i32, i32) {
    %c0_i32 = arith.constant 0 : i32
    %c0_i32_0 = arith.constant 0 : i32
    %c0_i32_1 = arith.constant 0 : i32
    return %c0_i32, %c0_i32_0 : i32, i32
  }
  func.func @transform_2(%arg0: i32, %arg1: i32) -> (i32, i32) {
    %c0_i32 = arith.constant 0 : i32
    %c0_i32_0 = arith.constant 0 : i32
    %c0_i32_1 = arith.constant 0 : i32
    return %c0_i32, %c0_i32_0 : i32, i32
  }
  func.func @transform_3(%arg0: i32, %arg1: i32) -> (i32, i32) {
    %c0_i32 = arith.constant 0 : i32
    %c0_i32_0 = arith.constant 0 : i32
    %c0_i32_1 = arith.constant 0 : i32
    return %c0_i32, %c0_i32_0 : i32, i32
  }
  func.func @transform_4(%arg0: i32, %arg1: i32) -> (i32, i32, i32, i32) {
    %c0_i32 = arith.constant 0 : i32
    %c0_i32_0 = arith.constant 0 : i32
    %c0_i32_1 = arith.constant 0 : i32
    return %arg0, %arg1, %c0_i32, %c0_i32_0 : i32, i32, i32, i32
  }
}

</mosaic_0001>

<bundles_post_ra>
// kernel: lstm_language_model_forward.5
= control target key start
LH: loop header
LB: loop body
LE: loop exit
PB: predicated region body
PF: predicated region fallthrough
CT: control target
= control target key end

     0   :  { %s410_s1 = inlined_call_operand.vmem [shape: bf16[128,128], index: 1, kind: input, shape index: {}]   ;;  %s411_s0 = inlined_call_operand.vmem [shape: bf16[64,128], index: 0, kind: input, shape index: {}]   ;;  %s412_s2 = inlined_call_operand.vmem [shape: f32[1,128], index: 2, kind: input, shape index: {}]   ;;  %s413_s3 = inlined_call_operand.vmem [shape: f32[64,128], index: 3, kind: output, shape index: {}]  }
   0x1   :  { %v315_v0 = vld [vmem:[%s410_s1] sm:$0xff]   ;;  %v316_v1 = vld [vmem:[%s410_s1 + $0x8] sm:$0xff]   ;;  %v317_v2 = vld [vmem:[%s410_s1 + $0x10] sm:$0xff]  }
   0x2   :  { %275 = vmatprep.subr.bf16.mxu0 %v315_v0  ;;  %299 = vmatprep.subr.bf16.mxu1 %v315_v0  ;;  %v318_v3 = vld [vmem:[%s410_s1 + $0x18] sm:$0xff]   ;;  %v323_v4 = vld [vmem:[%s411_s0] sm:$0xff]   ;;  %v324_v5 = vld [vmem:[%s411_s0 + $0x10] sm:$0xff]  }
   0x3   :  { %276 = vmatpush3.bf16.msra.mxu0 %v315_v0  ;;  %307 = vmatpush3.bf16.msra.mxu1 %v315_v0  ;;  %v319_v6 = vld [vmem:[%s410_s1 + $0x20] sm:$0xff]   ;;  %v320_v7 = vld [vmem:[%s410_s1 + $0x28] sm:$0xff]   ;;  %v321_v8 = vld [vmem:[%s410_s1 + $0x30] sm:$0xff]  }
   0x4   :  { %277 = vmatprep.subr.bf16.mxu0 %v316_v1  ;;  %300 = vmatprep.subr.bf16.mxu1 %v316_v1  ;;  %v322_v9 = vld [vmem:[%s410_s1 + $0x38] sm:$0xff]   ;;  %v325_v10 = vld [vmem:[%s411_s0 + $0x8] sm:$0xff]   ;;  %v262_v12 = vld [vmem:[%s412_s2] ss:$0 sm:$0xff] }
   0x5   :  { %291 = vmatprep.mubr.bf16.mxu0 %v323_v4  ;;  %295 = vmatprep.mubr.bf16.mxu1 %v324_v5  ;;  %v326_v11 = vld [vmem:[%s411_s0 + $0x18] sm:$0xff]  }
   0x7   :  { %278 = vmatpush3.bf16.msra.mxu0 %v316_v1  ;;  %308 = vmatpush3.bf16.msra.mxu1 %v316_v1 }
   0x8   :  { %279 = vmatprep.subr.bf16.mxu0 %v317_v2  ;;  %301 = vmatprep.subr.bf16.mxu1 %v317_v2 }
   0xb   :  { %280 = vmatpush3.bf16.msra.mxu0 %v317_v2  ;;  %309 = vmatpush3.bf16.msra.mxu1 %v317_v2 }
   0xc   :  { %281 = vmatprep.subr.bf16.mxu0 %v318_v3  ;;  %302 = vmatprep.subr.bf16.mxu1 %v318_v3 }
   0xf   :  { %282 = vmatpush3.bf16.msra.mxu0 %v318_v3  ;;  %310 = vmatpush3.bf16.msra.mxu1 %v318_v3 }
  0x10   :  { %283 = vmatprep.subr.bf16.mxu0 %v319_v6  ;;  %303 = vmatprep.subr.bf16.mxu1 %v319_v6 }
  0x13   :  { %284 = vmatpush3.bf16.msra.mxu0 %v319_v6  ;;  %311 = vmatpush3.bf16.msra.mxu1 %v319_v6 }
  0x14   :  { %285 = vmatprep.subr.bf16.mxu0 %v320_v7  ;;  %304 = vmatprep.subr.bf16.mxu1 %v320_v7 }
  0x17   :  { %286 = vmatpush3.bf16.msra.mxu0 %v320_v7  ;;  %312 = vmatpush3.bf16.msra.mxu1 %v320_v7 }
  0x18   :  { %287 = vmatprep.subr.bf16.mxu0 %v321_v8  ;;  %305 = vmatprep.subr.bf16.mxu1 %v321_v8 }
  0x1b   :  { %288 = vmatpush3.bf16.msra.mxu0 %v321_v8  ;;  %313 = vmatpush3.bf16.msra.mxu1 %v321_v8 }
  0x1c   :  { %289 = vmatprep.subr.bf16.mxu0 %v322_v9  ;;  %306 = vmatprep.subr.bf16.mxu1 %v322_v9 }
  0x1f   :  { %290 = vmatpush3.bf16.msra.mxu0 %v322_v9  ;;  %314 = vmatpush3.bf16.msra.mxu1 %v322_v9 }
  0x22   :  { %292 = vmatmul.mubr.bf16.vlgmr.msra.gmra.mrb[0].mxu0 %v325_v10  ;;  %296 = vmatmul.mubr.bf16.vlgmr.msra.gmra.mrb[0].mxu1 %v326_v11 }
  0xf5   :  { %v293_v13 = vpop.f32.mrb[0].mxu0  ;;  %v297_v14 = vpop.f32.mrb[0].mxu1 }
  0xf6   :  { %v232_v15 = vadd.f32 %v293_v13, %v262_v12  ;;  %v236_v16 = vadd.f32 %v297_v14, %v262_v12  ;;  %v165_v17 = vpop.f32.mrb[1].mxu0  ;;  %v181_v18 = vpop.f32.mrb[1].mxu1 }
  0xf7   :  { %v230_v19 = vadd.f32 %v262_v12, %v165_v17  ;;  %v234_v20 = vadd.f32 %v262_v12, %v181_v18  ;;  %v294_v21 = vpop.f32.mrb[2].mxu0  ;;  %v298_v22 = vpop.f32.mrb[2].mxu1 }
  0xf8   :  { %240 = vst [vmem:[%s413_s3 + $0x10] sm:$0xff] %v232_v15  ;;  %244 = vst [vmem:[%s413_s3 + $0x30] sm:$0xff] %v236_v16  ;;  %v233_v23 = vadd.f32 %v294_v21, %v262_v12  ;;  %v237_v24 = vadd.f32 %v298_v22, %v262_v12  ;;  %v168_v25 = vpop.f32.mrb[3].mxu0  ;;  %v184_v26 = vpop.f32.mrb[3].mxu1 }
  0xf9   :  { %238 = vst [vmem:[%s413_s3] sm:$0xff] %v230_v19  ;;  %242 = vst [vmem:[%s413_s3 + $0x20] sm:$0xff] %v234_v20  ;;  %v231_v27 = vadd.f32 %v262_v12, %v168_v25  ;;  %v235_v28 = vadd.f32 %v262_v12, %v184_v26 }
  0xfa   :  { %241 = vst [vmem:[%s413_s3 + $0x18] sm:$0xff] %v233_v23  ;;  %245 = vst [vmem:[%s413_s3 + $0x38] sm:$0xff] %v237_v24 }
  0xfb   :  { %239 = vst [vmem:[%s413_s3 + $0x8] sm:$0xff] %v231_v27  ;;  %243 = vst [vmem:[%s413_s3 + $0x28] sm:$0xff] %v235_v28 }

// kernel: lstm_language_model_forward.4
= control target key start
LH: loop header
LB: loop body
LE: loop exit
PB: predicated region body
PF: predicated region fallthrough
CT: control target
= control target key end

     0   :  { %v4341_v1 = vmov 0   ;;  %s4336_s1 = inlined_call_operand.vmem [shape: bf16[128,512], index: 1, kind: input, shape index: {}]   ;;  %s4337_s0 = inlined_call_operand.vmem [shape: bf16[1,64,128], index: 0, kind: input, shape index: {}]   ;;  %s4338_s3 = inlined_call_operand.vmem [shape: bf16[128,512], index: 3, kind: input, shape index: {}]   ;;  %s4339_s2 = inlined_call_operand.vmem [shape: f32[1,512], index: 2, kind: input, shape index: {}]   ;;  %s4340_s4 = inlined_call_operand.vmem [shape: bf16[1,8,8,128], index: 4, kind: output, shape index: {}]  }
   0x1   :  { %v3212_v0 = vld [vmem:[%s4336_s1 + $0x4] ss:$16 sps:$4 sm:$0xff]   ;;  %302 = vmatprep.mubr.bf16.mxu0 %v4341_v1  ;;  %375 = vmatprep.mubr.bf16.mxu1 %v4341_v1  ;;  %v3214_v2 = vld [vmem:[%s4336_s1 + $0xc] ss:$16 sps:$4 sm:$0xff]   ;;  %v3216_v3 = vld [vmem:[%s4336_s1] ss:$16 sps:$4 sm:$0xff]  }
   0x2   :  { %270 = vmatprep.subr.bf16.mxu0 %v3212_v0  ;;  %v3217_v4 = vld [vmem:[%s4336_s1 + $0x8] ss:$16 sps:$4 sm:$0xff]   ;;  %343 = vmatprep.subr.bf16.mxu1 %v3214_v2  ;;  %v3218_v5 = vld [vmem:[%s4336_s1 + $0x24] ss:$16 sps:$4 sm:$0xff]   ;;  %v3220_v6 = vld [vmem:[%s4336_s1 + $0x2c] ss:$16 sps:$4 sm:$0xff]  }
   0x3   :  { %271 = vmatpush1.bf16.msra.mxu0 %v3216_v3  ;;  %344 = vmatpush1.bf16.msra.mxu1 %v3217_v4  ;;  %v3222_v7 = vld [vmem:[%s4336_s1 + $0x20] ss:$16 sps:$4 sm:$0xff]   ;;  %v3223_v8 = vld [vmem:[%s4336_s1 + $0x28] ss:$16 sps:$4 sm:$0xff]   ;;  %v3224_v9 = vld [vmem:[%s4336_s1 + $0x44] ss:$16 sps:$4 sm:$0xff]  }
   0x4   :  { %272 = vmatprep.subr.bf16.mxu0 %v3218_v5  ;;  %345 = vmatprep.subr.bf16.mxu1 %v3220_v6  ;;  %v3226_v10 = vld [vmem:[%s4336_s1 + $0x4c] ss:$16 sps:$4 sm:$0xff]   ;;  %v3228_v11 = vld [vmem:[%s4336_s1 + $0x40] ss:$16 sps:$4 sm:$0xff]   ;;  %v3229_v12 = vld [vmem:[%s4336_s1 + $0x48] ss:$16 sps:$4 sm:$0xff]  }
   0x5   :  { %v3230_v13 = vld [vmem:[%s4336_s1 + $0x64] ss:$16 sps:$4 sm:$0xff]   ;;  %v3232_v14 = vld [vmem:[%s4336_s1 + $0x6c] ss:$16 sps:$4 sm:$0xff]   ;;  %v3234_v15 = vld [vmem:[%s4336_s1 + $0x60] ss:$16 sps:$4 sm:$0xff]  }
   0x6   :  { %v3235_v16 = vld [vmem:[%s4336_s1 + $0x68] ss:$16 sps:$4 sm:$0xff]   ;;  %v3236_v17 = vld [vmem:[%s4336_s1 + $0x84] ss:$16 sps:$4 sm:$0xff]   ;;  %v3238_v18 = vld [vmem:[%s4336_s1 + $0x8c] ss:$16 sps:$4 sm:$0xff]  }
   0x7   :  { %273 = vmatpush1.bf16.msra.mxu0 %v3222_v7  ;;  %346 = vmatpush1.bf16.msra.mxu1 %v3223_v8  ;;  %v3240_v19 = vld [vmem:[%s4336_s1 + $0x80] ss:$16 sps:$4 sm:$0xff]   ;;  %v3241_v20 = vld [vmem:[%s4336_s1 + $0x88] ss:$16 sps:$4 sm:$0xff]   ;;  %v3242_v21 = vld [vmem:[%s4336_s1 + $0xa4] ss:$16 sps:$4 sm:$0xff]   ;;  %v66_v7 = vlaneseq }
   0x8   :  { %274 = vmatprep.subr.bf16.mxu0 %v3224_v9  ;;  %347 = vmatprep.subr.bf16.mxu1 %v3226_v10  ;;  %v3244_v22 = vld [vmem:[%s4336_s1 + $0xac] ss:$16 sps:$4 sm:$0xff]   ;;  %v3246_v23 = vld [vmem:[%s4336_s1 + $0xa0] ss:$16 sps:$4 sm:$0xff]   ;;  %v3247_v24 = vld [vmem:[%s4336_s1 + $0xa8] ss:$16 sps:$4 sm:$0xff]  }
   0x9   :  { %v3248_v25 = vld [vmem:[%s4336_s1 + $0xc4] ss:$16 sps:$4 sm:$0xff]   ;;  %v3250_v26 = vld [vmem:[%s4336_s1 + $0xcc] ss:$16 sps:$4 sm:$0xff]   ;;  %v3252_v27 = vld [vmem:[%s4336_s1 + $0xc0] ss:$16 sps:$4 sm:$0xff]  }
   0xa   :  { %v3253_v28 = vld [vmem:[%s4336_s1 + $0xc8] ss:$16 sps:$4 sm:$0xff]   ;;  %v3254_v29 = vld [vmem:[%s4336_s1 + $0xe4] ss:$16 sps:$4 sm:$0xff]   ;;  %v3256_v30 = vld [vmem:[%s4336_s1 + $0xec] ss:$16 sps:$4 sm:$0xff]  }
   0xb   :  { %275 = vmatpush1.bf16.msra.mxu0 %v3228_v11  ;;  %348 = vmatpush1.bf16.msra.mxu1 %v3229_v12  ;;  %v3258_v31 = vld [vmem:[%s4336_s1 + $0xe0] ss:$16 sps:$4 sm:$0xff]   ;;  %v3259_v32 = vld [vmem:[%s4336_s1 + $0xe8] ss:$16 sps:$4 sm:$0xff]   ;;  %v3568_v33 = vld [vmem:[%s4338_s3 + $0x4] ss:$16 sps:$4 sm:$0xff]  }
   0xc   :  { %276 = vmatprep.subr.bf16.mxu0 %v3230_v13  ;;  %349 = vmatprep.subr.bf16.mxu1 %v3232_v14  ;;  %v3573_v34 = vld [vmem:[%s4338_s3 + $0xc] ss:$16 sps:$4 sm:$0xff]   ;;  %v3260_v35 = vld [vmem:[%s4337_s0] sm:$0xff]   ;;  %v3586_v37 = vld [vmem:[%s4338_s3 + $0x8] ss:$16 sps:$4 sm:$0xff]   ;;  %v3441_v6 = vmov 0.0|0.0  }
   0xd   :  { %v3581_v36 = vld [vmem:[%s4338_s3] ss:$16 sps:$4 sm:$0xff]   ;;  %v3593_v38 = vld [vmem:[%s4338_s3 + $0x24] ss:$16 sps:$4 sm:$0xff]   ;;  %v3598_v39 = vld [vmem:[%s4338_s3 + $0x2c] ss:$16 sps:$4 sm:$0xff]  }
   0xe   :  { %v3603_v40 = vld [vmem:[%s4338_s3 + $0x20] ss:$16 sps:$4 sm:$0xff]   ;;  %v3610_v41 = vld [vmem:[%s4338_s3 + $0x28] ss:$16 sps:$4 sm:$0xff]   ;;  %v3617_v42 = vld [vmem:[%s4338_s3 + $0x44] ss:$16 sps:$4 sm:$0xff]  }
   0xf   :  { %277 = vmatpush1.bf16.msra.mxu0 %v3234_v15  ;;  %350 = vmatpush1.bf16.msra.mxu1 %v3235_v16  ;;  %v3622_v43 = vld [vmem:[%s4338_s3 + $0x4c] ss:$16 sps:$4 sm:$0xff]   ;;  %v3632_v45 = vld [vmem:[%s4338_s3 + $0x40] ss:$16 sps:$4 sm:$0xff]   ;;  %v3637_v46 = vld [vmem:[%s4338_s3 + $0x48] ss:$16 sps:$4 sm:$0xff]  }
  0x10   :  { %278 = vmatprep.subr.bf16.mxu0 %v3236_v17  ;;  %351 = vmatprep.subr.bf16.mxu1 %v3238_v18  ;;  %v3273_v44 = vld [vmem:[%s4337_s0 + $0x8] sm:$0xff]   ;;  %v3644_v47 = vld [vmem:[%s4338_s3 + $0x64] ss:$16 sps:$4 sm:$0xff]   ;;  %v3656_v49 = vld [vmem:[%s4338_s3 + $0x60] ss:$16 sps:$4 sm:$0xff]   ;;  %v67_v8 = vshrl.u32 %v66_v7, 7 }
  0x11   :  { %v3651_v48 = vld [vmem:[%s4338_s3 + $0x6c] ss:$16 sps:$4 sm:$0xff]   ;;  %v3661_v50 = vld [vmem:[%s4338_s3 + $0x68] ss:$16 sps:$4 sm:$0xff]   ;;  %v3668_v51 = vld [vmem:[%s4338_s3 + $0x84] ss:$16 sps:$4 sm:$0xff]  }
  0x12   :  { %v3675_v52 = vld [vmem:[%s4338_s3 + $0x8c] ss:$16 sps:$4 sm:$0xff]   ;;  %v3286_v53 = vld [vmem:[%s4337_s0 + $0x10] sm:$0xff]   ;;  %v3690_v55 = vld [vmem:[%s4338_s3 + $0x88] ss:$16 sps:$4 sm:$0xff]   ;;  %v76_v9 = vsub.s32 2, %v67_v8 }
  0x13   :  { %279 = vmatpush1.bf16.msra.mxu0 %v3240_v19  ;;  %352 = vmatpush1.bf16.msra.mxu1 %v3241_v20  ;;  %v3685_v54 = vld [vmem:[%s4338_s3 + $0x80] ss:$16 sps:$4 sm:$0xff]   ;;  %v3695_v56 = vld [vmem:[%s4338_s3 + $0xa4] ss:$16 sps:$4 sm:$0xff]   ;;  %v3700_v57 = vld [vmem:[%s4338_s3 + $0xac] ss:$16 sps:$4 sm:$0xff]  }
  0x14   :  { %280 = vmatprep.subr.bf16.mxu0 %v3242_v21  ;;  %353 = vmatprep.subr.bf16.mxu1 %v3244_v22  ;;  %v3709_v58 = vld [vmem:[%s4338_s3 + $0xa0] ss:$16 sps:$4 sm:$0xff]   ;;  %v3714_v59 = vld [vmem:[%s4338_s3 + $0xa8] ss:$16 sps:$4 sm:$0xff]   ;;  %v3719_v60 = vld [vmem:[%s4338_s3 + $0xc4] ss:$16 sps:$4 sm:$0xff]  }
  0x15   :  { %v3724_v61 = vld [vmem:[%s4338_s3 + $0xcc] ss:$16 sps:$4 sm:$0xff]   ;;  %v3738_v63 = vld [vmem:[%s4338_s3 + $0xc0] ss:$16 sps:$4 sm:$0xff]   ;;  %v3743_v0 = vld [vmem:[%s4338_s3 + $0xc8] ss:$16 sps:$4 sm:$0xff]  }
  0x16   :  { %v3299_v62 = vld [vmem:[%s4337_s0 + $0x18] sm:$0xff]   ;;  %v3748_v2 = vld [vmem:[%s4338_s3 + $0xe4] ss:$16 sps:$4 sm:$0xff]   ;;  %v3764_v4 = vld [vmem:[%s4338_s3 + $0xe0] ss:$16 sps:$4 sm:$0xff]   ;;  %v80_v10 = vsub.s32 3, %v67_v8 }
  0x17   :  { %281 = vmatpush1.bf16.msra.mxu0 %v3246_v23  ;;  %354 = vmatpush1.bf16.msra.mxu1 %v3247_v24  ;;  %v3757_v3 = vld [vmem:[%s4338_s3 + $0xec] ss:$16 sps:$4 sm:$0xff]   ;;  %v3769_v5 = vld [vmem:[%s4338_s3 + $0xe8] ss:$16 sps:$4 sm:$0xff]   ;;  %v68_v11 = vsub.s32 0, %v67_v8  ;;  %v72_v13 = vsub.s32 1, %v67_v8 }
  0x18   :  { %282 = vmatprep.subr.bf16.mxu0 %v3248_v25  ;;  %355 = vmatprep.subr.bf16.mxu1 %v3250_v26  ;;  %v64_v12 = vld [vmem:[%s4339_s2] sm:$0xf] }
  0x19   :  { %v3816_v14 = vrot.slane %v64_v12, %v76_v9  ;;  %v3822_v17 = vrot.slane %v64_v12, %v80_v10  ;;  %v69_v18 = vrot.slane %v64_v12, %v68_v11  ;;  %v73_v21 = vrot.slane %v64_v12, %v72_v13 }
  0x1b   :  { %283 = vmatpush1.bf16.msra.mxu0 %v3252_v27  ;;  %356 = vmatpush1.bf16.msra.mxu1 %v3253_v28 }
  0x1c   :  { %284 = vmatprep.subr.bf16.mxu0 %v3254_v29  ;;  %357 = vmatprep.subr.bf16.mxu1 %v3256_v30 }
  0x1f   :  { %285 = vmatpush1.bf16.msra.mxu0 %v3258_v31  ;;  %358 = vmatpush1.bf16.msra.mxu1 %v3259_v32 }
  0x20   :  { %650 = vmatprep.subr.bf16.mxu0 %v3568_v33  ;;  %691 = vmatprep.subr.bf16.mxu1 %v3573_v34 }
  0x22   :  { %303 = vmatmul.mubr.bf16.vlgmr.msra.gmra.mrb[0].mxu0 %v3260_v35  ;;  %376 = vmatmul.mubr.bf16.vlgmr.msra.gmra.mrb[0].mxu1 %v3260_v35 }
  0x23   :  { %651 = vmatpush1.bf16.msra.mxu0 %v3581_v36  ;;  %692 = vmatpush1.bf16.msra.mxu1 %v3586_v37 }
  0x24   :  { %652 = vmatprep.subr.bf16.mxu0 %v3593_v38  ;;  %693 = vmatprep.subr.bf16.mxu1 %v3598_v39 }
  0x25   :  { %312 = vmatprep.mubr.bf16.mxu0 %v4341_v1  ;;  %385 = vmatprep.mubr.bf16.mxu1 %v4341_v1 }
  0x27   :  { %653 = vmatpush1.bf16.msra.mxu0 %v3603_v40  ;;  %694 = vmatpush1.bf16.msra.mxu1 %v3610_v41 }
  0x28   :  { %654 = vmatprep.subr.bf16.mxu0 %v3617_v42  ;;  %695 = vmatprep.subr.bf16.mxu1 %v3622_v43 }
  0x2a   :  { %313 = vmatmul.mubr.bf16.gmra.mrb[4].mxu0 %v3273_v44  ;;  %386 = vmatmul.mubr.bf16.gmra.mrb[4].mxu1 %v3273_v44 }
  0x2b   :  { %655 = vmatpush1.bf16.msra.mxu0 %v3632_v45  ;;  %696 = vmatpush1.bf16.msra.mxu1 %v3637_v46 }
  0x2c   :  { %656 = vmatprep.subr.bf16.mxu0 %v3644_v47  ;;  %697 = vmatprep.subr.bf16.mxu1 %v3651_v48 }
  0x2d   :  { %322 = vmatprep.mubr.bf16.mxu0 %v4341_v1  ;;  %395 = vmatprep.mubr.bf16.mxu1 %v4341_v1 }
  0x2f   :  { %657 = vmatpush1.bf16.msra.mxu0 %v3656_v49  ;;  %698 = vmatpush1.bf16.msra.mxu1 %v3661_v50 }
  0x30   :  { %658 = vmatprep.subr.bf16.mxu0 %v3668_v51  ;;  %699 = vmatprep.subr.bf16.mxu1 %v3675_v52 }
  0x32   :  { %323 = vmatmul.mubr.bf16.gmra.mrb[8].mxu0 %v3286_v53  ;;  %396 = vmatmul.mubr.bf16.gmra.mrb[8].mxu1 %v3286_v53 }
  0x33   :  { %659 = vmatpush1.bf16.msra.mxu0 %v3685_v54  ;;  %700 = vmatpush1.bf16.msra.mxu1 %v3690_v55 }
  0x34   :  { %660 = vmatprep.subr.bf16.mxu0 %v3695_v56  ;;  %701 = vmatprep.subr.bf16.mxu1 %v3700_v57 }
  0x35   :  { %332 = vmatprep.mubr.bf16.mxu0 %v4341_v1  ;;  %405 = vmatprep.mubr.bf16.mxu1 %v4341_v1 }
  0x37   :  { %661 = vmatpush1.bf16.msra.mxu0 %v3709_v58  ;;  %702 = vmatpush1.bf16.msra.mxu1 %v3714_v59 }
  0x38   :  { %662 = vmatprep.subr.bf16.mxu0 %v3719_v60  ;;  %703 = vmatprep.subr.bf16.mxu1 %v3724_v61 }
  0x3a   :  { %333 = vmatmul.mubr.bf16.gmra.mrb[12].mxu0 %v3299_v62  ;;  %406 = vmatmul.mubr.bf16.gmra.mrb[12].mxu1 %v3299_v62 }
  0x3b   :  { %663 = vmatpush1.bf16.msra.mxu0 %v3738_v63  ;;  %704 = vmatpush1.bf16.msra.mxu1 %v3743_v0 }
  0x3c   :  { %664 = vmatprep.subr.bf16.mxu0 %v3748_v2  ;;  %705 = vmatprep.subr.bf16.mxu1 %v3757_v3 }
  0x3d   :  { %682 = vmatprep.mubr.bf16.mxu0 %v4341_v1  ;;  %723 = vmatprep.mubr.bf16.mxu1 %v4341_v1 }
  0x3f   :  { %665 = vmatpush1.bf16.msra.mxu0 %v3764_v4  ;;  %706 = vmatpush1.bf16.msra.mxu1 %v3769_v5 }
  0x40   :  { %955 = vmatprep.subr.bf16.mxu0 %v3568_v33  ;;  %996 = vmatprep.subr.bf16.mxu1 %v3573_v34 }
  0x42   :  { %683 = vmatmul.mubr.bf16.vlgmr.msra.gmra.mrb[16].mxu0 %v3441_v6  ;;  %724 = vmatmul.mubr.bf16.vlgmr.msra.gmra.mrb[16].mxu1 %v3441_v6 }
  0x43   :  { %956 = vmatpush1.bf16.msra.mxu0 %v3581_v36  ;;  %997 = vmatpush1.bf16.msra.mxu1 %v3586_v37 }
  0x44   :  { %957 = vmatprep.subr.bf16.mxu0 %v3593_v38  ;;  %998 = vmatprep.subr.bf16.mxu1 %v3598_v39 }
  0x45   :  { %987 = vmatprep.mubr.bf16.mxu0 %v4341_v1  ;;  %1028 = vmatprep.mubr.bf16.mxu1 %v4341_v1 }
  0x47   :  { %958 = vmatpush1.bf16.msra.mxu0 %v3603_v40  ;;  %999 = vmatpush1.bf16.msra.mxu1 %v3610_v41 }
  0x48   :  { %959 = vmatprep.subr.bf16.mxu0 %v3617_v42  ;;  %1000 = vmatprep.subr.bf16.mxu1 %v3622_v43 }
  0x4b   :  { %960 = vmatpush1.bf16.msra.mxu0 %v3632_v45  ;;  %1001 = vmatpush1.bf16.msra.mxu1 %v3637_v46 }
  0x4c   :  { %961 = vmatprep.subr.bf16.mxu0 %v3644_v47  ;;  %1002 = vmatprep.subr.bf16.mxu1 %v3651_v48 }
  0x4f   :  { %962 = vmatpush1.bf16.msra.mxu0 %v3656_v49  ;;  %1003 = vmatpush1.bf16.msra.mxu1 %v3661_v50 }
  0x50   :  { %963 = vmatprep.subr.bf16.mxu0 %v3668_v51  ;;  %1004 = vmatprep.subr.bf16.mxu1 %v3675_v52 }
  0x53   :  { %964 = vmatpush1.bf16.msra.mxu0 %v3685_v54  ;;  %1005 = vmatpush1.bf16.msra.mxu1 %v3690_v55 }
  0x54   :  { %965 = vmatprep.subr.bf16.mxu0 %v3695_v56  ;;  %1006 = vmatprep.subr.bf16.mxu1 %v3700_v57 }
  0x57   :  { %966 = vmatpush1.bf16.msra.mxu0 %v3709_v58  ;;  %1007 = vmatpush1.bf16.msra.mxu1 %v3714_v59 }
  0x58   :  { %967 = vmatprep.subr.bf16.mxu0 %v3719_v60  ;;  %1008 = vmatprep.subr.bf16.mxu1 %v3724_v61 }
  0x5b   :  { %968 = vmatpush1.bf16.msra.mxu0 %v3738_v63  ;;  %1009 = vmatpush1.bf16.msra.mxu1 %v3743_v0 }
  0x5c   :  { %969 = vmatprep.subr.bf16.mxu0 %v3748_v2  ;;  %1010 = vmatprep.subr.bf16.mxu1 %v3757_v3 }
  0x5f   :  { %970 = vmatpush1.bf16.msra.mxu0 %v3764_v4  ;;  %1011 = vmatpush1.bf16.msra.mxu1 %v3769_v5 }
  0x60   :  { %1261 = vmatprep.subr.bf16.mxu0 %v3568_v33  ;;  %1302 = vmatprep.subr.bf16.mxu1 %v3573_v34 }
  0xf5   :  { %v3818_v15 = vpop.f32.mrb[0].mxu0  ;;  %v3820_v16 = vpop.f32.mrb[0].mxu1 }
  0xf6   :  { %v306_v19 = vpop.f32.mrb[1].mxu0  ;;  %v379_v20 = vpop.f32.mrb[1].mxu1 }
  0xf7   :  { %v308_v22 = vpop.f32.mrb[2].mxu0  ;;  %v381_v23 = vpop.f32.mrb[2].mxu1 }
  0xf8   :  { %v3824_v24 = vadd.f32 %v308_v22, %v69_v18  ;;  %v310_v25 = vpop.f32.mrb[3].mxu0  ;;  %v3827_v26 = vadd.f32 %v381_v23, %v3816_v14  ;;  %v383_v27 = vpop.f32.mrb[3].mxu1 }
  0xf9   :  { %v3829_v28 = vadd.f32 %v310_v25, %v73_v21  ;;  %v3832_v29 = vadd.f32 %v383_v27, %v3822_v17 }
  0xfd   :  { %v314_v30 = vpop.f32.mrb[4].mxu0  ;;  %v387_v31 = vpop.f32.mrb[4].mxu1 }
  0xfe   :  { %v3834_v32 = vadd.f32 %v314_v30, %v69_v18  ;;  %v316_v35 = vpop.f32.mrb[5].mxu0  ;;  %v3837_v44 = vadd.f32 %v387_v31, %v3816_v14  ;;  %v389_v53 = vpop.f32.mrb[5].mxu1 }
  0xff   :  { %v3839_v62 = vadd.f32 %v316_v35, %v73_v21  ;;  %v318_v6 = vpop.f32.mrb[6].mxu0  ;;  %v3842_v7 = vadd.f32 %v389_v53, %v3822_v17  ;;  %v391_v8 = vpop.f32.mrb[6].mxu1 }
 0x100   :  { %v3844_v9 = vadd.f32 %v318_v6, %v69_v18  ;;  %v320_v10 = vpop.f32.mrb[7].mxu0  ;;  %v3847_v11 = vadd.f32 %v391_v8, %v3816_v14  ;;  %v393_v12 = vpop.f32.mrb[7].mxu1 }
 0x101   :  { %4343 = vst [vmem:[#allocation5_spill] sm:$0xff] %v3842_v7  ;;  %v3849_v13 = vadd.f32 %v320_v10, %v73_v21  ;;  %v3852_v22 = vadd.f32 %v393_v12, %v3822_v17 }
 0x102   :  { %4344 = vst [vmem:[#allocation6_spill] sm:$0xff] %v3844_v9  ;;  %4345 = vst [vmem:[#allocation7_spill] sm:$0xff] %v3847_v11 }
 0x103   :  { %4346 = vst [vmem:[#allocation8_spill] sm:$0xff] %v3849_v13  ;;  %4347 = vst [vmem:[#allocation9_spill] sm:$0xff] %v3852_v22 }
 0x105   :  { %v324_v23 = vpop.f32.mrb[8].mxu0  ;;  %v397_v25 = vpop.f32.mrb[8].mxu1 }
 0x106   :  { %v3854_v27 = vadd.f32 %v324_v23, %v69_v18  ;;  %v326_v30 = vpop.f32.mrb[9].mxu0  ;;  %v3857_v31 = vadd.f32 %v397_v25, %v3816_v14  ;;  %v399_v35 = vpop.f32.mrb[9].mxu1 }
 0x107   :  { %v3859_v53 = vadd.f32 %v326_v30, %v73_v21  ;;  %v328_v6 = vpop.f32.mrb[10].mxu0  ;;  %v3862_v8 = vadd.f32 %v399_v35, %v3822_v17  ;;  %v401_v10 = vpop.f32.mrb[10].mxu1 }
 0x108   :  { %4348 = vst [vmem:[#allocation10_spill] sm:$0xff] %v3854_v27  ;;  %4349 = vst [vmem:[#allocation11_spill] sm:$0xff] %v3857_v31  ;;  %v3864_v1 = vadd.f32 %v328_v6, %v69_v18  ;;  %v330_v12 = vpop.f32.mrb[11].mxu0  ;;  %v3867_v22 = vadd.f32 %v401_v10, %v3816_v14  ;;  %v403_v23 = vpop.f32.mrb[11].mxu1 }
 0x109   :  { %4350 = vst [vmem:[#allocation12_spill] sm:$0xff] %v3859_v53  ;;  %4351 = vst [vmem:[#allocation13_spill] sm:$0xff] %v3862_v8  ;;  %v3869_v27 = vadd.f32 %v330_v12, %v73_v21  ;;  %v3872_v25 = vadd.f32 %v403_v23, %v3822_v17 }
 0x10a   :  { %4352 = vst [vmem:[#allocation14_spill] sm:$0xff] %v3864_v1  ;;  %4353 = vst [vmem:[#allocation15_spill] sm:$0xff] %v3867_v22 }
 0x10b   :  { %4354 = vst [vmem:[#allocation16_spill] sm:$0xff] %v3869_v27  ;;  %4355 = vst [vmem:[#allocation17_spill] sm:$0xff] %v3872_v25 }
 0x10d   :  { %v334_v31 = vpop.f32.mrb[12].mxu0  ;;  %v407_v30 = vpop.f32.mrb[12].mxu1 }
 0x10e   :  { %v3874_v53 = vadd.f32 %v334_v31, %v69_v18  ;;  %v336_v13 = vpop.f32.mrb[13].mxu0  ;;  %v3877_v35 = vadd.f32 %v407_v30, %v3816_v14  ;;  %v409_v6 = vpop.f32.mrb[13].mxu1 }
 0x10f   :  { %v3879_v1 = vadd.f32 %v336_v13, %v73_v21  ;;  %v338_v8 = vpop.f32.mrb[14].mxu0  ;;  %v3882_v10 = vadd.f32 %v409_v6, %v3822_v17  ;;  %v411_v12 = vpop.f32.mrb[14].mxu1  ;;  %v305_v13 = vadd.f32 %v3818_v15, %v69_v18  ;;  %v307_v6 = vadd.f32 %v306_v19, %v73_v21 }
 0x110   :  { %4356 = vst [vmem:[#allocation18_spill] sm:$0xff] %v3874_v53  ;;  %4357 = vst [vmem:[#allocation19_spill] sm:$0xff] %v3877_v35  ;;  %v3884_v27 = vadd.f32 %v338_v8, %v69_v18  ;;  %v340_v23 = vpop.f32.mrb[15].mxu0  ;;  %v3887_v25 = vadd.f32 %v411_v12, %v3816_v14  ;;  %v413_v31 = vpop.f32.mrb[15].mxu1 }
 0x111   :  { %4358 = vst [vmem:[#allocation20_spill] sm:$0xff] %v3879_v1  ;;  %4359 = vst [vmem:[#allocation21_spill] sm:$0xff] %v3882_v10  ;;  %v3889_v53 = vadd.f32 %v340_v23, %v73_v21  ;;  %v3892_v30 = vadd.f32 %v413_v31, %v3822_v17  ;;  %v378_v1 = vadd.f32 %v3820_v16, %v3816_v14 }
 0x112   :  { %4360 = vst [vmem:[#allocation22_spill] sm:$0xff] %v3884_v27  ;;  %4361 = vst [vmem:[#allocation23_spill] sm:$0xff] %v3887_v25  ;;  %v380_v10 = vadd.f32 %v379_v20, %v3822_v17 }
 0x113   :  { %4362 = vst [vmem:[#allocation24_spill] sm:$0xff] %v3889_v53  ;;  %4363 = vst [vmem:[#allocation25_spill] sm:$0xff] %v3892_v30 }
 0x115   :  { %v684_v8 = vpop.f32.mrb[16].mxu0  ;;  %v725_v27 = vpop.f32.mrb[16].mxu1 }
 0x116   :  { %v732_v35 = vadd.f32 %v684_v8, %v305_v13  ;;  %v734_v22 = vadd.f32 %v725_v27, %v378_v1  ;;  %v686_v12 = vpop.f32.mrb[17].mxu0  ;;  %v727_v25 = vpop.f32.mrb[17].mxu1 }
 0x117   :  { %v733_v11 = vadd.f32 %v686_v12, %v307_v6  ;;  %v735_v23 = vadd.f32 %v727_v25, %v380_v10  ;;  %v688_v53 = vpop.f32.mrb[18].mxu0  ;;  %v729_v9 = vpop.f32.mrb[18].mxu1 }
 0x118   :  { %v736_v31 = vmul.f32 0.5, %v732_v35  ;;  %v689_v30 = vpop.f32.mrb[19].mxu0  ;;  %v730_v7 = vpop.f32.mrb[19].mxu1 }
 0x119   :  { %v740_v15 = vmul.f32 0.5, %v733_v11  ;;  %v745_v14 = vmul.f32 0.5, %v735_v23  ;;  %v4364_v30 = vmov 0  }
 0x11a   :  { %3360 = vtanh.f32 %v736_v31 }
 0x11b   :  { %3362 = vtanh.f32 %v740_v15 }
 0x11c   :  { %3364 = vtanh.f32 %v734_v22 }
 0x11d   :  { %3366 = vtanh.f32 %v745_v14 }
 0x124   :  { %v3361_v16 = vpop.eup %3360 }
 0x125   :  { %v3363_v17 = vpop.eup %3362  ;;  %v738_v18 = vmul.f32 0.5, %v3361_v16 }
 0x126   :  { %v742_v19 = vmul.f32 0.5, %v3363_v17  ;;  %v3365_v20 = vpop.eup %3364 }
 0x127   :  { %v739_v1 = vadd.f32 0.5, %v738_v18  ;;  %v3367_v7 = vpop.eup %3366 }
 0x128   :  { %v743_v21 = vadd.f32 0.5, %v742_v19  ;;  %v747_v9 = vmul.f32 0.5, %v3367_v7 }
 0x129   :  { %v750_v27 = vmul.f32 %v3365_v20, %v739_v1 }
 0x12a   :  { %v749_v25 = vmul.f32 0.0, %v743_v21  ;;  %v748_v11 = vadd.f32 0.5, %v747_v9 }
 0x12c   :  { %v3898_v53 = vadd.f32 %v750_v27, %v749_v25 }
 0x12e   :  { %3368 = vtanh.f32 %v3898_v53 }
 0x138   :  { %v3369_v35 = vpop.eup %3368 }
 0x139   :  { %v753_v22 = vmul.f32 %v3369_v35, %v748_v11 }
 0x13b   :  { %v754_v10 = vpack.c.bf16 %v753_v22, %v753_v22 }
 0x13d   :  { %755 = vst [vmem:[%s4340_s4] sm:$0xf] %v754_v10  ;;  %988 = vmatmul.mubr.bf16.vlgmr.msra.gmra.mrb[20].mxu0 %v754_v10  ;;  %1029 = vmatmul.mubr.bf16.vlgmr.msra.gmra.mrb[20].mxu1 %v754_v10 }
 0x13e   :  { %1262 = vmatpush1.bf16.msra.mxu0 %v3581_v36  ;;  %1303 = vmatpush1.bf16.msra.mxu1 %v3586_v37 }
 0x13f   :  { %1263 = vmatprep.subr.bf16.mxu0 %v3593_v38  ;;  %1304 = vmatprep.subr.bf16.mxu1 %v3598_v39 }
 0x140   :  { %1293 = vmatprep.mubr.bf16.mxu0 %v4364_v30  ;;  %1334 = vmatprep.mubr.bf16.mxu1 %v4364_v30 }
 0x142   :  { %1264 = vmatpush1.bf16.msra.mxu0 %v3603_v40  ;;  %1305 = vmatpush1.bf16.msra.mxu1 %v3610_v41 }
 0x143   :  { %1265 = vmatprep.subr.bf16.mxu0 %v3617_v42  ;;  %1306 = vmatprep.subr.bf16.mxu1 %v3622_v43 }
 0x146   :  { %1266 = vmatpush1.bf16.msra.mxu0 %v3632_v45  ;;  %1307 = vmatpush1.bf16.msra.mxu1 %v3637_v46 }
 0x147   :  { %1267 = vmatprep.subr.bf16.mxu0 %v3644_v47  ;;  %1308 = vmatprep.subr.bf16.mxu1 %v3651_v48 }
 0x14a   :  { %1268 = vmatpush1.bf16.msra.mxu0 %v3656_v49  ;;  %1309 = vmatpush1.bf16.msra.mxu1 %v3661_v50 }
 0x14b   :  { %1269 = vmatprep.subr.bf16.mxu0 %v3668_v51  ;;  %1310 = vmatprep.subr.bf16.mxu1 %v3675_v52 }
 0x14e   :  { %1270 = vmatpush1.bf16.msra.mxu0 %v3685_v54  ;;  %1311 = vmatpush1.bf16.msra.mxu1 %v3690_v55 }
 0x14f   :  { %1271 = vmatprep.subr.bf16.mxu0 %v3695_v56  ;;  %1312 = vmatprep.subr.bf16.mxu1 %v3700_v57 }
 0x152   :  { %1272 = vmatpush1.bf16.msra.mxu0 %v3709_v58  ;;  %1313 = vmatpush1.bf16.msra.mxu1 %v3714_v59 }
 0x153   :  { %1273 = vmatprep.subr.bf16.mxu0 %v3719_v60  ;;  %1314 = vmatprep.subr.bf16.mxu1 %v3724_v61 }
 0x156   :  { %1274 = vmatpush1.bf16.msra.mxu0 %v3738_v63  ;;  %1315 = vmatpush1.bf16.msra.mxu1 %v3743_v0 }
 0x157   :  { %1275 = vmatprep.subr.bf16.mxu0 %v3748_v2  ;;  %1316 = vmatprep.subr.bf16.mxu1 %v3757_v3 }
 0x15a   :  { %1276 = vmatpush1.bf16.msra.mxu0 %v3764_v4  ;;  %1317 = vmatpush1.bf16.msra.mxu1 %v3769_v5 }
 0x15b   :  { %1567 = vmatprep.subr.bf16.mxu0 %v3568_v33  ;;  %1608 = vmatprep.subr.bf16.mxu1 %v3573_v34 }
 0x210   :  { %v989_v13 = vpop.f32.mrb[20].mxu0  ;;  %v1030_v6 = vpop.f32.mrb[20].mxu1 }
 0x211   :  { %v1037_v8 = vadd.f32 %v989_v13, %v3824_v24  ;;  %v1039_v12 = vadd.f32 %v1030_v6, %v3827_v26  ;;  %v991_v23 = vpop.f32.mrb[21].mxu0  ;;  %v1032_v31 = vpop.f32.mrb[21].mxu1 }
 0x212   :  { %v1038_v15 = vadd.f32 %v991_v23, %v3829_v28  ;;  %v1040_v14 = vadd.f32 %v1032_v31, %v3832_v29  ;;  %v993_v16 = vpop.f32.mrb[22].mxu0  ;;  %v1034_v17 = vpop.f32.mrb[22].mxu1  ;;  %v4021_v23 = vld [vmem:[%s4338_s3 + $0x24] ss:$16 sps:$4 sm:$0xff]   ;;  %v4026_v31 = vld [vmem:[%s4338_s3 + $0x2c] ss:$16 sps:$4 sm:$0xff]  }
 0x213   :  { %v1041_v18 = vmul.f32 0.5, %v1037_v8  ;;  %v994_v19 = vpop.f32.mrb[23].mxu0  ;;  %v1035_v1 = vpop.f32.mrb[23].mxu1  ;;  %v4007_v8 = vld [vmem:[%s4338_s3] ss:$16 sps:$4 sm:$0xff]  }
 0x214   :  { %v1045_v33 = vmul.f32 0.5, %v1038_v15  ;;  %v1050_v34 = vmul.f32 0.5, %v1040_v14  ;;  %v4031_v15 = vld [vmem:[%s4338_s3 + $0x20] ss:$16 sps:$4 sm:$0xff]   ;;  %v4036_v14 = vld [vmem:[%s4338_s3 + $0x28] ss:$16 sps:$4 sm:$0xff]  }
 0x215   :  { %3370 = vtanh.f32 %v1041_v18  ;;  %v4045_v16 = vld [vmem:[%s4338_s3 + $0x44] ss:$16 sps:$4 sm:$0xff]   ;;  %v4050_v17 = vld [vmem:[%s4338_s3 + $0x4c] ss:$16 sps:$4 sm:$0xff]   ;;  %v4055_v18 = vld [vmem:[%s4338_s3 + $0x40] ss:$16 sps:$4 sm:$0xff]  }
 0x216   :  { %3372 = vtanh.f32 %v1045_v33  ;;  %v4060_v19 = vld [vmem:[%s4338_s3 + $0x48] ss:$16 sps:$4 sm:$0xff]   ;;  %v4069_v1 = vld [vmem:[%s4338_s3 + $0x64] ss:$16 sps:$4 sm:$0xff]   ;;  %v4074_v33 = vld [vmem:[%s4338_s3 + $0x6c] ss:$16 sps:$4 sm:$0xff]  }
 0x217   :  { %3374 = vtanh.f32 %v1039_v12  ;;  %v4012_v12 = vld [vmem:[%s4338_s3 + $0x8] ss:$16 sps:$4 sm:$0xff]  }
 0x218   :  { %3376 = vtanh.f32 %v1050_v34  ;;  %v4079_v34 = vld [vmem:[%s4338_s3 + $0x60] ss:$16 sps:$4 sm:$0xff]  }
 0x21f   :  { %v3371_v20 = vpop.eup %3370 }
 0x220   :  { %v3373_v24 = vpop.eup %3372  ;;  %v1043_v21 = vmul.f32 0.5, %v3371_v20  ;;  %v4084_v20 = vld [vmem:[%s4338_s3 + $0x68] ss:$16 sps:$4 sm:$0xff]  }
 0x221   :  { %v1047_v26 = vmul.f32 0.5, %v3373_v24  ;;  %v3375_v25 = vpop.eup %3374  ;;  %v4093_v24 = vld [vmem:[%s4338_s3 + $0x84] ss:$16 sps:$4 sm:$0xff]  }
 0x222   :  { %v1044_v27 = vadd.f32 0.5, %v1043_v21  ;;  %v3377_v11 = vpop.eup %3376  ;;  %v4098_v21 = vld [vmem:[%s4338_s3 + $0x8c] ss:$16 sps:$4 sm:$0xff]  }
 0x223   :  { %v1048_v28 = vadd.f32 0.5, %v1047_v26  ;;  %v1052_v35 = vmul.f32 0.5, %v3377_v11  ;;  %v4103_v26 = vld [vmem:[%s4338_s3 + $0x80] ss:$16 sps:$4 sm:$0xff]   ;;  %v4146_v11 = vld [vmem:[%s4338_s3 + $0xcc] ss:$16 sps:$4 sm:$0xff]  }
 0x224   :  { %v1055_v7 = vmul.f32 %v3375_v25, %v1044_v27  ;;  %v4108_v27 = vld [vmem:[%s4338_s3 + $0x88] ss:$16 sps:$4 sm:$0xff]   ;;  %v4117_v25 = vld [vmem:[%s4338_s3 + $0xa4] ss:$16 sps:$4 sm:$0xff]  }
 0x225   :  { %v1054_v29 = vmul.f32 %v1048_v28, %v3898_v53  ;;  %v1053_v22 = vadd.f32 0.5, %v1052_v35  ;;  %v4002_v53 = vld [vmem:[%s4338_s3 + $0xc] ss:$16 sps:$4 sm:$0xff]   ;;  %v4151_v35 = vld [vmem:[%s4338_s3 + $0xc0] ss:$16 sps:$4 sm:$0xff]  }
 0x226   :  { %v4122_v28 = vld [vmem:[%s4338_s3 + $0xac] ss:$16 sps:$4 sm:$0xff]  }
 0x227   :  { %v3943_v9 = vadd.f32 %v1055_v7, %v1054_v29  ;;  %v4127_v7 = vld [vmem:[%s4338_s3 + $0xa0] ss:$16 sps:$4 sm:$0xff]   ;;  %v4132_v29 = vld [vmem:[%s4338_s3 + $0xa8] ss:$16 sps:$4 sm:$0xff]  }
 0x229   :  { %3378 = vtanh.f32 %v3943_v9 }
 0x233   :  { %v3379_v10 = vpop.eup %3378 }
 0x234   :  { %v1058_v13 = vmul.f32 %v3379_v10, %v1053_v22  ;;  %v4156_v22 = vld [vmem:[%s4338_s3 + $0xc8] ss:$16 sps:$4 sm:$0xff]   ;;  %v4165_v10 = vld [vmem:[%s4338_s3 + $0xe4] ss:$16 sps:$4 sm:$0xff]  }
 0x236   :  { %v1059_v6 = vpack.c.bf16 %v1058_v13, %v1058_v13  ;;  %v4170_v13 = vld [vmem:[%s4338_s3 + $0xec] ss:$16 sps:$4 sm:$0xff]  }
 0x238   :  { %3011 = vst [vmem:[%s4340_s4 + $0x4] sm:$0xf] %v1059_v6  ;;  %1294 = vmatmul.mubr.bf16.vlgmr.msra.gmra.mrb[24].mxu0 %v1059_v6  ;;  %1335 = vmatmul.mubr.bf16.vlgmr.msra.gmra.mrb[24].mxu1 %v1059_v6  ;;  %v4175_v6 = vld [vmem:[%s4338_s3 + $0xe0] ss:$16 sps:$4 sm:$0xff]  }
 0x239   :  { %1568 = vmatpush1.bf16.msra.mxu0 %v3581_v36  ;;  %1609 = vmatpush1.bf16.msra.mxu1 %v3586_v37 }
 0x23a   :  { %1569 = vmatprep.subr.bf16.mxu0 %v3593_v38  ;;  %1610 = vmatprep.subr.bf16.mxu1 %v3598_v39 }
 0x23b   :  { %1599 = vmatprep.mubr.bf16.mxu0 %v4364_v30  ;;  %1640 = vmatprep.mubr.bf16.mxu1 %v4364_v30 }
 0x23d   :  { %1570 = vmatpush1.bf16.msra.mxu0 %v3603_v40  ;;  %1611 = vmatpush1.bf16.msra.mxu1 %v3610_v41 }
 0x23e   :  { %1571 = vmatprep.subr.bf16.mxu0 %v3617_v42  ;;  %1612 = vmatprep.subr.bf16.mxu1 %v3622_v43  ;;  %v4365_v43 = vld [vmem:[#allocation5_spill] sm:$0xff] }
 0x241   :  { %1572 = vmatpush1.bf16.msra.mxu0 %v3632_v45  ;;  %1613 = vmatpush1.bf16.msra.mxu1 %v3637_v46 }
 0x242   :  { %1573 = vmatprep.subr.bf16.mxu0 %v3644_v47  ;;  %1614 = vmatprep.subr.bf16.mxu1 %v3651_v48 }
 0x245   :  { %1574 = vmatpush1.bf16.msra.mxu0 %v3656_v49  ;;  %1615 = vmatpush1.bf16.msra.mxu1 %v3661_v50 }
 0x246   :  { %1575 = vmatprep.subr.bf16.mxu0 %v3668_v51  ;;  %1616 = vmatprep.subr.bf16.mxu1 %v3675_v52 }
 0x249   :  { %1576 = vmatpush1.bf16.msra.mxu0 %v3685_v54  ;;  %1617 = vmatpush1.bf16.msra.mxu1 %v3690_v55 }
 0x24a   :  { %1577 = vmatprep.subr.bf16.mxu0 %v3695_v56  ;;  %1618 = vmatprep.subr.bf16.mxu1 %v3700_v57 }
 0x24d   :  { %1578 = vmatpush1.bf16.msra.mxu0 %v3709_v58  ;;  %1619 = vmatpush1.bf16.msra.mxu1 %v3714_v59 }
 0x24e   :  { %1579 = vmatprep.subr.bf16.mxu0 %v3719_v60  ;;  %1620 = vmatprep.subr.bf16.mxu1 %v3724_v61 }
 0x251   :  { %1580 = vmatpush1.bf16.msra.mxu0 %v3738_v63  ;;  %1621 = vmatpush1.bf16.msra.mxu1 %v3743_v0 }
 0x252   :  { %1581 = vmatprep.subr.bf16.mxu0 %v3748_v2  ;;  %1622 = vmatprep.subr.bf16.mxu1 %v3757_v3 }
 0x255   :  { %1582 = vmatpush1.bf16.msra.mxu0 %v3764_v4  ;;  %1623 = vmatpush1.bf16.msra.mxu1 %v3769_v5 }
 0x256   :  { %1914 = vmatprep.subr.bf16.mxu1 %v4002_v53 }
 0x30b   :  { %v1295_v36 = vpop.f32.mrb[24].mxu0  ;;  %v1336_v37 = vpop.f32.mrb[24].mxu1 }
 0x30c   :  { %v1343_v38 = vadd.f32 %v1295_v36, %v3834_v32  ;;  %v1345_v39 = vadd.f32 %v1336_v37, %v3837_v44  ;;  %v1297_v40 = vpop.f32.mrb[25].mxu0  ;;  %v1338_v41 = vpop.f32.mrb[25].mxu1  ;;  %v4180_v36 = vld [vmem:[%s4338_s3 + $0xe8] ss:$16 sps:$4 sm:$0xff]  }
 0x30d   :  { %v1344_v42 = vadd.f32 %v1297_v40, %v3839_v62  ;;  %v1346_v45 = vadd.f32 %v1338_v41, %v4365_v43  ;;  %v1299_v46 = vpop.f32.mrb[26].mxu0  ;;  %v1340_v47 = vpop.f32.mrb[26].mxu1  ;;  %v3997_v62 = vld [vmem:[%s4338_s3 + $0x4] ss:$16 sps:$4 sm:$0xff]  }
 0x30e   :  { %v1347_v48 = vmul.f32 0.5, %v1343_v38  ;;  %v1300_v49 = vpop.f32.mrb[27].mxu0  ;;  %v1341_v50 = vpop.f32.mrb[27].mxu1  ;;  %1873 = vmatprep.subr.bf16.mxu0 %v3997_v62  ;;  %v4367_v41 = vld [vmem:[#allocation7_spill] sm:$0xff]  ;;  %v4368_v46 = vld [vmem:[#allocation8_spill] sm:$0xff] }
 0x30f   :  { %v1351_v51 = vmul.f32 0.5, %v1344_v42  ;;  %v1356_v52 = vmul.f32 0.5, %v1346_v45 }
 0x310   :  { %3380 = vtanh.f32 %v1347_v48  ;;  %v4369_v48 = vld [vmem:[#allocation9_spill] sm:$0xff] }
 0x311   :  { %3382 = vtanh.f32 %v1351_v51 }
 0x312   :  { %3384 = vtanh.f32 %v1345_v39  ;;  %v4366_v39 = vld [vmem:[#allocation6_spill] sm:$0xff] }
 0x313   :  { %3386 = vtanh.f32 %v1356_v52 }
 0x31a   :  { %v3381_v54 = vpop.eup %3380 }
 0x31b   :  { %v3383_v55 = vpop.eup %3382  ;;  %v1349_v56 = vmul.f32 0.5, %v3381_v54 }
 0x31c   :  { %v1353_v57 = vmul.f32 0.5, %v3383_v55  ;;  %v3385_v59 = vpop.eup %3384 }
 0x31d   :  { %v1350_v58 = vadd.f32 0.5, %v1349_v56  ;;  %v3387_v2 = vpop.eup %3386 }
 0x31e   :  { %v1354_v60 = vadd.f32 0.5, %v1353_v57  ;;  %v1358_v3 = vmul.f32 0.5, %v3387_v2 }
 0x31f   :  { %v1361_v61 = vmul.f32 %v3385_v59, %v1350_v58 }
 0x320   :  { %v1360_v63 = vmul.f32 %v1354_v60, %v3943_v9  ;;  %v1359_v4 = vadd.f32 0.5, %v1358_v3  ;;  %v4141_v9 = vld [vmem:[%s4338_s3 + $0xc4] ss:$16 sps:$4 sm:$0xff]  }
 0x322   :  { %v3986_v0 = vadd.f32 %v1361_v61, %v1360_v63 }
 0x324   :  { %3388 = vtanh.f32 %v3986_v0 }
 0x32e   :  { %v3389_v5 = vpop.eup %3388 }
 0x32f   :  { %v1364_v32 = vmul.f32 %v3389_v5, %v1359_v4 }
 0x331   :  { %v1365_v44 = vpack.c.bf16 %v1364_v32, %v1364_v32 }
 0x333   :  { %3044 = vst [vmem:[%s4340_s4 + $0x8] sm:$0xf] %v1365_v44  ;;  %1600 = vmatmul.mubr.bf16.vlgmr.msra.gmra.mrb[28].mxu0 %v1365_v44  ;;  %1641 = vmatmul.mubr.bf16.vlgmr.msra.gmra.mrb[28].mxu1 %v1365_v44 }
 0x334   :  { %1905 = vmatprep.mubr.bf16.mxu0 %v4364_v30  ;;  %1946 = vmatprep.mubr.bf16.mxu1 %v4364_v30 }
 0x335   :  { %1874 = vmatpush1.bf16.msra.mxu0 %v4007_v8  ;;  %1915 = vmatpush1.bf16.msra.mxu1 %v4012_v12 }
 0x336   :  { %1875 = vmatprep.subr.bf16.mxu0 %v4021_v23  ;;  %1916 = vmatprep.subr.bf16.mxu1 %v4026_v31 }
 0x339   :  { %1876 = vmatpush1.bf16.msra.mxu0 %v4031_v15  ;;  %1917 = vmatpush1.bf16.msra.mxu1 %v4036_v14 }
 0x33a   :  { %1877 = vmatprep.subr.bf16.mxu0 %v4045_v16  ;;  %1918 = vmatprep.subr.bf16.mxu1 %v4050_v17 }
 0x33d   :  { %1878 = vmatpush1.bf16.msra.mxu0 %v4055_v18  ;;  %1919 = vmatpush1.bf16.msra.mxu1 %v4060_v19 }
 0x33e   :  { %1879 = vmatprep.subr.bf16.mxu0 %v4069_v1  ;;  %1920 = vmatprep.subr.bf16.mxu1 %v4074_v33 }
 0x341   :  { %1880 = vmatpush1.bf16.msra.mxu0 %v4079_v34  ;;  %1921 = vmatpush1.bf16.msra.mxu1 %v4084_v20 }
 0x342   :  { %1881 = vmatprep.subr.bf16.mxu0 %v4093_v24  ;;  %1922 = vmatprep.subr.bf16.mxu1 %v4098_v21 }
 0x345   :  { %1882 = vmatpush1.bf16.msra.mxu0 %v4103_v26  ;;  %1923 = vmatpush1.bf16.msra.mxu1 %v4108_v27 }
 0x346   :  { %1883 = vmatprep.subr.bf16.mxu0 %v4117_v25  ;;  %1924 = vmatprep.subr.bf16.mxu1 %v4122_v28 }
 0x349   :  { %1884 = vmatpush1.bf16.msra.mxu0 %v4127_v7  ;;  %1925 = vmatpush1.bf16.msra.mxu1 %v4132_v29 }
 0x34a   :  { %1885 = vmatprep.subr.bf16.mxu0 %v4141_v9  ;;  %1926 = vmatprep.subr.bf16.mxu1 %v4146_v11 }
 0x34d   :  { %1886 = vmatpush1.bf16.msra.mxu0 %v4151_v35  ;;  %1927 = vmatpush1.bf16.msra.mxu1 %v4156_v22 }
 0x34e   :  { %1887 = vmatprep.subr.bf16.mxu0 %v4165_v10  ;;  %1928 = vmatprep.subr.bf16.mxu1 %v4170_v13 }
 0x351   :  { %1888 = vmatpush1.bf16.msra.mxu0 %v4175_v6  ;;  %1929 = vmatpush1.bf16.msra.mxu1 %v4180_v36 }
 0x352   :  { %2179 = vmatprep.subr.bf16.mxu0 %v3997_v62  ;;  %2220 = vmatprep.subr.bf16.mxu1 %v4002_v53 }
 0x406   :  { %v1601_v37 = vpop.f32.mrb[28].mxu0  ;;  %v1642_v38 = vpop.f32.mrb[28].mxu1 }
 0x407   :  { %v1649_v40 = vadd.f32 %v1601_v37, %v4366_v39  ;;  %v1651_v42 = vadd.f32 %v1642_v38, %v4367_v41  ;;  %v1603_v43 = vpop.f32.mrb[29].mxu0  ;;  %v1644_v45 = vpop.f32.mrb[29].mxu1 }
 0x408   :  { %v1650_v47 = vadd.f32 %v1603_v43, %v4368_v46  ;;  %v1652_v49 = vadd.f32 %v1644_v45, %v4369_v48  ;;  %v1605_v50 = vpop.f32.mrb[30].mxu0  ;;  %v1646_v51 = vpop.f32.mrb[30].mxu1  ;;  %v4370_v43 = vld [vmem:[#allocation10_spill] sm:$0xff]  ;;  %v4371_v46 = vld [vmem:[#allocation11_spill] sm:$0xff] }
 0x409   :  { %v1653_v52 = vmul.f32 0.5, %v1649_v40  ;;  %v1606_v54 = vpop.f32.mrb[31].mxu0  ;;  %v1647_v55 = vpop.f32.mrb[31].mxu1  ;;  %v4372_v50 = vld [vmem:[#allocation12_spill] sm:$0xff] }
 0x40a   :  { %v1657_v56 = vmul.f32 0.5, %v1650_v47  ;;  %v1662_v57 = vmul.f32 0.5, %v1652_v49 }
 0x40b   :  { %3390 = vtanh.f32 %v1653_v52  ;;  %v4373_v52 = vld [vmem:[#allocation13_spill] sm:$0xff] }
 0x40c   :  { %3392 = vtanh.f32 %v1657_v56 }
 0x40d   :  { %3394 = vtanh.f32 %v1651_v42 }
 0x40e   :  { %3396 = vtanh.f32 %v1662_v57 }
 0x415   :  { %v3391_v58 = vpop.eup %3390 }
 0x416   :  { %v3393_v59 = vpop.eup %3392  ;;  %v1655_v60 = vmul.f32 0.5, %v3391_v58 }
 0x417   :  { %v1659_v61 = vmul.f32 0.5, %v3393_v59  ;;  %v3395_v2 = vpop.eup %3394 }
 0x418   :  { %v1656_v63 = vadd.f32 0.5, %v1655_v60  ;;  %v3397_v44 = vpop.eup %3396 }
 0x419   :  { %v1660_v3 = vadd.f32 0.5, %v1659_v61  ;;  %v1664_v37 = vmul.f32 0.5, %v3397_v44 }
 0x41a   :  { %v1667_v4 = vmul.f32 %v3395_v2, %v1656_v63 }
 0x41b   :  { %v1666_v5 = vmul.f32 %v1660_v3, %v3986_v0  ;;  %v1665_v38 = vadd.f32 0.5, %v1664_v37 }
 0x41d   :  { %v4193_v32 = vadd.f32 %v1667_v4, %v1666_v5 }
 0x41f   :  { %3398 = vtanh.f32 %v4193_v32 }
 0x429   :  { %v3399_v39 = vpop.eup %3398 }
 0x42a   :  { %v1670_v40 = vmul.f32 %v3399_v39, %v1665_v38 }
 0x42c   :  { %v1671_v41 = vpack.c.bf16 %v1670_v40, %v1670_v40 }
 0x42e   :  { %3077 = vst [vmem:[%s4340_s4 + $0xc] sm:$0xf] %v1671_v41  ;;  %1906 = vmatmul.mubr.bf16.vlgmr.msra.gmra.mrb[32].mxu0 %v1671_v41  ;;  %1947 = vmatmul.mubr.bf16.vlgmr.msra.gmra.mrb[32].mxu1 %v1671_v41 }
 0x42f   :  { %2180 = vmatpush1.bf16.msra.mxu0 %v4007_v8  ;;  %2221 = vmatpush1.bf16.msra.mxu1 %v4012_v12 }
 0x430   :  { %2181 = vmatprep.subr.bf16.mxu0 %v4021_v23  ;;  %2222 = vmatprep.subr.bf16.mxu1 %v4026_v31 }
 0x431   :  { %2211 = vmatprep.mubr.bf16.mxu0 %v4364_v30  ;;  %2252 = vmatprep.mubr.bf16.mxu1 %v4364_v30 }
 0x433   :  { %2182 = vmatpush1.bf16.msra.mxu0 %v4031_v15  ;;  %2223 = vmatpush1.bf16.msra.mxu1 %v4036_v14 }
 0x434   :  { %2183 = vmatprep.subr.bf16.mxu0 %v4045_v16  ;;  %2224 = vmatprep.subr.bf16.mxu1 %v4050_v17 }
 0x437   :  { %2184 = vmatpush1.bf16.msra.mxu0 %v4055_v18  ;;  %2225 = vmatpush1.bf16.msra.mxu1 %v4060_v19 }
 0x438   :  { %2185 = vmatprep.subr.bf16.mxu0 %v4069_v1  ;;  %2226 = vmatprep.subr.bf16.mxu1 %v4074_v33 }
 0x43b   :  { %2186 = vmatpush1.bf16.msra.mxu0 %v4079_v34  ;;  %2227 = vmatpush1.bf16.msra.mxu1 %v4084_v20 }
 0x43c   :  { %2187 = vmatprep.subr.bf16.mxu0 %v4093_v24  ;;  %2228 = vmatprep.subr.bf16.mxu1 %v4098_v21 }
 0x43f   :  { %2188 = vmatpush1.bf16.msra.mxu0 %v4103_v26  ;;  %2229 = vmatpush1.bf16.msra.mxu1 %v4108_v27 }
 0x440   :  { %2189 = vmatprep.subr.bf16.mxu0 %v4117_v25  ;;  %2230 = vmatprep.subr.bf16.mxu1 %v4122_v28 }
 0x443   :  { %2190 = vmatpush1.bf16.msra.mxu0 %v4127_v7  ;;  %2231 = vmatpush1.bf16.msra.mxu1 %v4132_v29 }
 0x444   :  { %2191 = vmatprep.subr.bf16.mxu0 %v4141_v9  ;;  %2232 = vmatprep.subr.bf16.mxu1 %v4146_v11 }
 0x447   :  { %2192 = vmatpush1.bf16.msra.mxu0 %v4151_v35  ;;  %2233 = vmatpush1.bf16.msra.mxu1 %v4156_v22 }
 0x448   :  { %2193 = vmatprep.subr.bf16.mxu0 %v4165_v10  ;;  %2234 = vmatprep.subr.bf16.mxu1 %v4170_v13 }
 0x44b   :  { %2194 = vmatpush1.bf16.msra.mxu0 %v4175_v6  ;;  %2235 = vmatpush1.bf16.msra.mxu1 %v4180_v36 }
 0x44c   :  { %2485 = vmatprep.subr.bf16.mxu0 %v3997_v62  ;;  %2526 = vmatprep.subr.bf16.mxu1 %v4002_v53 }
 0x501   :  { %v1907_v0 = vpop.f32.mrb[32].mxu0  ;;  %v1948_v42 = vpop.f32.mrb[32].mxu1 }
 0x502   :  { %v1955_v45 = vadd.f32 %v1907_v0, %v4370_v43  ;;  %v1957_v47 = vadd.f32 %v1948_v42, %v4371_v46  ;;  %v1909_v48 = vpop.f32.mrb[33].mxu0  ;;  %v1950_v49 = vpop.f32.mrb[33].mxu1 }
 0x503   :  { %v1956_v51 = vadd.f32 %v1909_v48, %v4372_v50  ;;  %v1958_v54 = vadd.f32 %v1950_v49, %v4373_v52  ;;  %v1911_v55 = vpop.f32.mrb[34].mxu0  ;;  %v1952_v56 = vpop.f32.mrb[34].mxu1  ;;  %v4374_v48 = vld [vmem:[#allocation14_spill] sm:$0xff]  ;;  %v4375_v50 = vld [vmem:[#allocation15_spill] sm:$0xff] }
 0x504   :  { %v1959_v57 = vmul.f32 0.5, %v1955_v45  ;;  %v1912_v58 = vpop.f32.mrb[35].mxu0  ;;  %v1953_v59 = vpop.f32.mrb[35].mxu1  ;;  %v4376_v55 = vld [vmem:[#allocation16_spill] sm:$0xff] }
 0x505   :  { %v1963_v60 = vmul.f32 0.5, %v1956_v51  ;;  %v1968_v61 = vmul.f32 0.5, %v1958_v54 }
 0x506   :  { %3400 = vtanh.f32 %v1959_v57  ;;  %v4377_v57 = vld [vmem:[#allocation17_spill] sm:$0xff] }
 0x507   :  { %3402 = vtanh.f32 %v1963_v60 }
 0x508   :  { %3404 = vtanh.f32 %v1957_v47 }
 0x509   :  { %3406 = vtanh.f32 %v1968_v61 }
 0x510   :  { %v3401_v63 = vpop.eup %3400 }
 0x511   :  { %v3403_v2 = vpop.eup %3402  ;;  %v1961_v3 = vmul.f32 0.5, %v3401_v63 }
 0x512   :  { %v1965_v4 = vmul.f32 0.5, %v3403_v2  ;;  %v3405_v44 = vpop.eup %3404 }
 0x513   :  { %v1962_v5 = vadd.f32 0.5, %v1961_v3  ;;  %v3407_v41 = vpop.eup %3406 }
 0x514   :  { %v1966_v37 = vadd.f32 0.5, %v1965_v4  ;;  %v1970_v0 = vmul.f32 0.5, %v3407_v41 }
 0x515   :  { %v1973_v38 = vmul.f32 %v3405_v44, %v1962_v5 }
 0x516   :  { %v1972_v39 = vmul.f32 %v1966_v37, %v4193_v32  ;;  %v1971_v42 = vadd.f32 0.5, %v1970_v0 }
 0x518   :  { %v4238_v40 = vadd.f32 %v1973_v38, %v1972_v39 }
 0x51a   :  { %3408 = vtanh.f32 %v4238_v40 }
 0x524   :  { %v3409_v43 = vpop.eup %3408 }
 0x525   :  { %v1976_v45 = vmul.f32 %v3409_v43, %v1971_v42 }
 0x527   :  { %v1977_v46 = vpack.c.bf16 %v1976_v45, %v1976_v45 }
 0x529   :  { %3110 = vst [vmem:[%s4340_s4 + $0x10] sm:$0xf] %v1977_v46  ;;  %2212 = vmatmul.mubr.bf16.vlgmr.msra.gmra.mrb[36].mxu0 %v1977_v46  ;;  %2253 = vmatmul.mubr.bf16.vlgmr.msra.gmra.mrb[36].mxu1 %v1977_v46 }
 0x52a   :  { %2486 = vmatpush1.bf16.msra.mxu0 %v4007_v8  ;;  %2527 = vmatpush1.bf16.msra.mxu1 %v4012_v12 }
 0x52b   :  { %2487 = vmatprep.subr.bf16.mxu0 %v4021_v23  ;;  %2528 = vmatprep.subr.bf16.mxu1 %v4026_v31 }
 0x52c   :  { %2517 = vmatprep.mubr.bf16.mxu0 %v4364_v30  ;;  %2558 = vmatprep.mubr.bf16.mxu1 %v4364_v30 }
 0x52e   :  { %2488 = vmatpush1.bf16.msra.mxu0 %v4031_v15  ;;  %2529 = vmatpush1.bf16.msra.mxu1 %v4036_v14 }
 0x52f   :  { %2489 = vmatprep.subr.bf16.mxu0 %v4045_v16  ;;  %2530 = vmatprep.subr.bf16.mxu1 %v4050_v17 }
 0x532   :  { %2490 = vmatpush1.bf16.msra.mxu0 %v4055_v18  ;;  %2531 = vmatpush1.bf16.msra.mxu1 %v4060_v19 }
 0x533   :  { %2491 = vmatprep.subr.bf16.mxu0 %v4069_v1  ;;  %2532 = vmatprep.subr.bf16.mxu1 %v4074_v33 }
 0x536   :  { %2492 = vmatpush1.bf16.msra.mxu0 %v4079_v34  ;;  %2533 = vmatpush1.bf16.msra.mxu1 %v4084_v20 }
 0x537   :  { %2493 = vmatprep.subr.bf16.mxu0 %v4093_v24  ;;  %2534 = vmatprep.subr.bf16.mxu1 %v4098_v21 }
 0x53a   :  { %2494 = vmatpush1.bf16.msra.mxu0 %v4103_v26  ;;  %2535 = vmatpush1.bf16.msra.mxu1 %v4108_v27 }
 0x53b   :  { %2495 = vmatprep.subr.bf16.mxu0 %v4117_v25  ;;  %2536 = vmatprep.subr.bf16.mxu1 %v4122_v28 }
 0x53e   :  { %2496 = vmatpush1.bf16.msra.mxu0 %v4127_v7  ;;  %2537 = vmatpush1.bf16.msra.mxu1 %v4132_v29 }
 0x53f   :  { %2497 = vmatprep.subr.bf16.mxu0 %v4141_v9  ;;  %2538 = vmatprep.subr.bf16.mxu1 %v4146_v11 }
 0x542   :  { %2498 = vmatpush1.bf16.msra.mxu0 %v4151_v35  ;;  %2539 = vmatpush1.bf16.msra.mxu1 %v4156_v22 }
 0x543   :  { %2499 = vmatprep.subr.bf16.mxu0 %v4165_v10  ;;  %2540 = vmatprep.subr.bf16.mxu1 %v4170_v13 }
 0x546   :  { %2500 = vmatpush1.bf16.msra.mxu0 %v4175_v6  ;;  %2541 = vmatpush1.bf16.msra.mxu1 %v4180_v36 }
 0x547   :  { %2791 = vmatprep.subr.bf16.mxu0 %v3997_v62  ;;  %2832 = vmatprep.subr.bf16.mxu1 %v4002_v53 }
 0x5fc   :  { %v2213_v32 = vpop.f32.mrb[36].mxu0  ;;  %v2254_v47 = vpop.f32.mrb[36].mxu1 }
 0x5fd   :  { %v2261_v49 = vadd.f32 %v2213_v32, %v4374_v48  ;;  %v2263_v51 = vadd.f32 %v2254_v47, %v4375_v50  ;;  %v2215_v52 = vpop.f32.mrb[37].mxu0  ;;  %v2256_v54 = vpop.f32.mrb[37].mxu1 }
 0x5fe   :  { %v2262_v56 = vadd.f32 %v2215_v52, %v4376_v55  ;;  %v2264_v58 = vadd.f32 %v2256_v54, %v4377_v57  ;;  %v2217_v59 = vpop.f32.mrb[38].mxu0  ;;  %v2258_v60 = vpop.f32.mrb[38].mxu1  ;;  %v4382_v55 = vld [vmem:[#allocation22_spill] sm:$0xff]  ;;  %v4383_v57 = vld [vmem:[#allocation23_spill] sm:$0xff] }
 0x5ff   :  { %v2265_v61 = vmul.f32 0.5, %v2261_v49  ;;  %v2218_v63 = vpop.f32.mrb[39].mxu0  ;;  %v2259_v2 = vpop.f32.mrb[39].mxu1 }
 0x600   :  { %v2269_v62 = vmul.f32 0.5, %v2262_v56  ;;  %v2274_v53 = vmul.f32 0.5, %v2264_v58  ;;  %v4385_v2 = vld [vmem:[#allocation25_spill] sm:$0xff] }
 0x601   :  { %3410 = vtanh.f32 %v2265_v61  ;;  %v4384_v61 = vld [vmem:[#allocation24_spill] sm:$0xff] }
 0x602   :  { %3412 = vtanh.f32 %v2269_v62 }
 0x603   :  { %3414 = vtanh.f32 %v2263_v51 }
 0x604   :  { %3416 = vtanh.f32 %v2274_v53 }
 0x60b   :  { %v3411_v3 = vpop.eup %3410 }
 0x60c   :  { %v3413_v4 = vpop.eup %3412  ;;  %v2267_v5 = vmul.f32 0.5, %v3411_v3 }
 0x60d   :  { %v2271_v44 = vmul.f32 0.5, %v3413_v4  ;;  %v3415_v38 = vpop.eup %3414 }
 0x60e   :  { %v2268_v37 = vadd.f32 0.5, %v2267_v5  ;;  %v3417_v43 = vpop.eup %3416 }
 0x60f   :  { %v2272_v39 = vadd.f32 0.5, %v2271_v44  ;;  %v2276_v45 = vmul.f32 0.5, %v3417_v43 }
 0x610   :  { %v2279_v41 = vmul.f32 %v3415_v38, %v2268_v37 }
 0x611   :  { %v2278_v0 = vmul.f32 %v2272_v39, %v4238_v40  ;;  %v2277_v46 = vadd.f32 0.5, %v2276_v45 }
 0x613   :  { %v4283_v42 = vadd.f32 %v2279_v41, %v2278_v0 }
 0x615   :  { %3418 = vtanh.f32 %v4283_v42 }
 0x61f   :  { %v3419_v32 = vpop.eup %3418 }
 0x620   :  { %v2282_v47 = vmul.f32 %v3419_v32, %v2277_v46 }
 0x622   :  { %v2283_v48 = vpack.c.bf16 %v2282_v47, %v2282_v47 }
 0x624   :  { %3143 = vst [vmem:[%s4340_s4 + $0x14] sm:$0xf] %v2283_v48  ;;  %2518 = vmatmul.mubr.bf16.vlgmr.msra.gmra.mrb[40].mxu0 %v2283_v48  ;;  %2559 = vmatmul.mubr.bf16.vlgmr.msra.gmra.mrb[40].mxu1 %v2283_v48 }
 0x625   :  { %2792 = vmatpush1.bf16.msra.mxu0 %v4007_v8  ;;  %2833 = vmatpush1.bf16.msra.mxu1 %v4012_v12  ;;  %v4378_v12 = vld [vmem:[#allocation18_spill] sm:$0xff] }
 0x626   :  { %2793 = vmatprep.subr.bf16.mxu0 %v4021_v23  ;;  %2834 = vmatprep.subr.bf16.mxu1 %v4026_v31  ;;  %v4379_v31 = vld [vmem:[#allocation19_spill] sm:$0xff] }
 0x627   :  { %2823 = vmatprep.mubr.bf16.mxu0 %v4364_v30  ;;  %2864 = vmatprep.mubr.bf16.mxu1 %v4364_v30 }
 0x629   :  { %2794 = vmatpush1.bf16.msra.mxu0 %v4031_v15  ;;  %2835 = vmatpush1.bf16.msra.mxu1 %v4036_v14 }
 0x62a   :  { %2795 = vmatprep.subr.bf16.mxu0 %v4045_v16  ;;  %2836 = vmatprep.subr.bf16.mxu1 %v4050_v17  ;;  %v4380_v17 = vld [vmem:[#allocation20_spill] sm:$0xff] }
 0x62d   :  { %2796 = vmatpush1.bf16.msra.mxu0 %v4055_v18  ;;  %2837 = vmatpush1.bf16.msra.mxu1 %v4060_v19  ;;  %v4381_v19 = vld [vmem:[#allocation21_spill] sm:$0xff] }
 0x62e   :  { %2797 = vmatprep.subr.bf16.mxu0 %v4069_v1  ;;  %2838 = vmatprep.subr.bf16.mxu1 %v4074_v33 }
 0x631   :  { %2798 = vmatpush1.bf16.msra.mxu0 %v4079_v34  ;;  %2839 = vmatpush1.bf16.msra.mxu1 %v4084_v20 }
 0x632   :  { %2799 = vmatprep.subr.bf16.mxu0 %v4093_v24  ;;  %2840 = vmatprep.subr.bf16.mxu1 %v4098_v21 }
 0x635   :  { %2800 = vmatpush1.bf16.msra.mxu0 %v4103_v26  ;;  %2841 = vmatpush1.bf16.msra.mxu1 %v4108_v27 }
 0x636   :  { %2801 = vmatprep.subr.bf16.mxu0 %v4117_v25  ;;  %2842 = vmatprep.subr.bf16.mxu1 %v4122_v28 }
 0x639   :  { %2802 = vmatpush1.bf16.msra.mxu0 %v4127_v7  ;;  %2843 = vmatpush1.bf16.msra.mxu1 %v4132_v29 }
 0x63a   :  { %2803 = vmatprep.subr.bf16.mxu0 %v4141_v9  ;;  %2844 = vmatprep.subr.bf16.mxu1 %v4146_v11 }
 0x63d   :  { %2804 = vmatpush1.bf16.msra.mxu0 %v4151_v35  ;;  %2845 = vmatpush1.bf16.msra.mxu1 %v4156_v22 }
 0x63e   :  { %2805 = vmatprep.subr.bf16.mxu0 %v4165_v10  ;;  %2846 = vmatprep.subr.bf16.mxu1 %v4170_v13 }
 0x641   :  { %2806 = vmatpush1.bf16.msra.mxu0 %v4175_v6  ;;  %2847 = vmatpush1.bf16.msra.mxu1 %v4180_v36 }
 0x6f7   :  { %v2519_v30 = vpop.f32.mrb[40].mxu0  ;;  %v2560_v8 = vpop.f32.mrb[40].mxu1 }
 0x6f8   :  { %v2567_v23 = vadd.f32 %v2519_v30, %v4378_v12  ;;  %v2569_v15 = vadd.f32 %v2560_v8, %v4379_v31  ;;  %v2521_v14 = vpop.f32.mrb[41].mxu0  ;;  %v2562_v16 = vpop.f32.mrb[41].mxu1 }
 0x6f9   :  { %v2568_v18 = vadd.f32 %v2521_v14, %v4380_v17  ;;  %v2570_v1 = vadd.f32 %v2562_v16, %v4381_v19  ;;  %v2523_v33 = vpop.f32.mrb[42].mxu0  ;;  %v2564_v34 = vpop.f32.mrb[42].mxu1 }
 0x6fa   :  { %v2571_v20 = vmul.f32 0.5, %v2567_v23  ;;  %v2524_v24 = vpop.f32.mrb[43].mxu0  ;;  %v2565_v21 = vpop.f32.mrb[43].mxu1 }
 0x6fb   :  { %v2575_v26 = vmul.f32 0.5, %v2568_v18  ;;  %v2580_v27 = vmul.f32 0.5, %v2570_v1 }
 0x6fc   :  { %3420 = vtanh.f32 %v2571_v20 }
 0x6fd   :  { %3422 = vtanh.f32 %v2575_v26 }
 0x6fe   :  { %3424 = vtanh.f32 %v2569_v15 }
 0x6ff   :  { %3426 = vtanh.f32 %v2580_v27 }
 0x706   :  { %v3421_v25 = vpop.eup %3420 }
 0x707   :  { %v3423_v28 = vpop.eup %3422  ;;  %v2573_v7 = vmul.f32 0.5, %v3421_v25 }
 0x708   :  { %v2577_v29 = vmul.f32 0.5, %v3423_v28  ;;  %v3425_v11 = vpop.eup %3424 }
 0x709   :  { %v2574_v9 = vadd.f32 0.5, %v2573_v7  ;;  %v3427_v6 = vpop.eup %3426 }
 0x70a   :  { %v2578_v35 = vadd.f32 0.5, %v2577_v29  ;;  %v2582_v36 = vmul.f32 0.5, %v3427_v6 }
 0x70b   :  { %v2585_v22 = vmul.f32 %v3425_v11, %v2574_v9 }
 0x70c   :  { %v2584_v10 = vmul.f32 %v2578_v35, %v4283_v42  ;;  %v2583_v40 = vadd.f32 0.5, %v2582_v36 }
 0x70e   :  { %v2586_v13 = vadd.f32 %v2585_v22, %v2584_v10 }
 0x710   :  { %3428 = vtanh.f32 %v2586_v13 }
 0x71a   :  { %v3429_v49 = vpop.eup %3428 }
 0x71b   :  { %v2588_v50 = vmul.f32 %v3429_v49, %v2583_v40 }
 0x71d   :  { %v2589_v51 = vpack.c.bf16 %v2588_v50, %v2588_v50 }
 0x71f   :  { %3176 = vst [vmem:[%s4340_s4 + $0x18] sm:$0xf] %v2589_v51  ;;  %2824 = vmatmul.mubr.bf16.vlgmr.msra.gmra.mrb[44].mxu0 %v2589_v51  ;;  %2865 = vmatmul.mubr.bf16.vlgmr.msra.gmra.mrb[44].mxu1 %v2589_v51 }
 0x7f2   :  { %v2825_v52 = vpop.f32.mrb[44].mxu0  ;;  %v2866_v54 = vpop.f32.mrb[44].mxu1 }
 0x7f3   :  { %v2873_v56 = vadd.f32 %v2825_v52, %v4382_v55  ;;  %v2875_v58 = vadd.f32 %v2866_v54, %v4383_v57  ;;  %v2827_v59 = vpop.f32.mrb[45].mxu0  ;;  %v2868_v60 = vpop.f32.mrb[45].mxu1 }
 0x7f4   :  { %v2874_v63 = vadd.f32 %v2827_v59, %v4384_v61  ;;  %v2876_v62 = vadd.f32 %v2868_v60, %v4385_v2  ;;  %v2829_v53 = vpop.f32.mrb[46].mxu0  ;;  %v2870_v3 = vpop.f32.mrb[46].mxu1 }
 0x7f5   :  { %v2877_v4 = vmul.f32 0.5, %v2873_v56  ;;  %v2830_v5 = vpop.f32.mrb[47].mxu0  ;;  %v2871_v44 = vpop.f32.mrb[47].mxu1 }
 0x7f6   :  { %v2881_v37 = vmul.f32 0.5, %v2874_v63  ;;  %v2886_v38 = vmul.f32 0.5, %v2876_v62 }
 0x7f7   :  { %3430 = vtanh.f32 %v2877_v4 }
 0x7f8   :  { %3432 = vtanh.f32 %v2881_v37 }
 0x7f9   :  { %3434 = vtanh.f32 %v2875_v58 }
 0x7fa   :  { %3436 = vtanh.f32 %v2886_v38 }
 0x801   :  { %v3431_v39 = vpop.eup %3430 }
 0x802   :  { %v3433_v41 = vpop.eup %3432  ;;  %v2879_v0 = vmul.f32 0.5, %v3431_v39 }
 0x803   :  { %v2883_v42 = vmul.f32 0.5, %v3433_v41  ;;  %v3435_v45 = vpop.eup %3434 }
 0x804   :  { %v2880_v43 = vadd.f32 0.5, %v2879_v0  ;;  %v3437_v30 = vpop.eup %3436 }
 0x805   :  { %v2884_v46 = vadd.f32 0.5, %v2883_v42  ;;  %v2888_v8 = vmul.f32 0.5, %v3437_v30 }
 0x806   :  { %v2891_v32 = vmul.f32 %v3435_v45, %v2880_v43 }
 0x807   :  { %v2890_v47 = vmul.f32 %v2884_v46, %v2586_v13  ;;  %v2889_v12 = vadd.f32 0.5, %v2888_v8 }
 0x809   :  { %v2892_v48 = vadd.f32 %v2891_v32, %v2890_v47 }
 0x80b   :  { %3438 = vtanh.f32 %v2892_v48 }
 0x815   :  { %v3439_v23 = vpop.eup %3438 }
 0x816   :  { %v2894_v31 = vmul.f32 %v3439_v23, %v2889_v12 }
 0x818   :  { %v2895_v15 = vpack.c.bf16 %v2894_v31, %v2894_v31 }
 0x81a   :  { %3209 = vst [vmem:[%s4340_s4 + $0x1c] sm:$0xf] %v2895_v15 }

// kernel: lstm_language_model_forward.3
= control target key start
LH: loop header
LB: loop body
LE: loop exit
PB: predicated region body
PF: predicated region fallthrough
CT: control target
= control target key end

     0   :  { %9 = vsyncpa [#allocation6], 0  ;;  %s3482_s15 = smov [#allocation5]   ;;  %s4201_s0 = inlined_call_operand.vmem [shape: bf16[1,64,128], index: 0, kind: input, shape index: {}]   ;;  %s4202_s1 = inlined_call_operand.vmem [shape: bf16[128,512], index: 1, kind: input, shape index: {}]   ;;  %s4203_s2 = inlined_call_operand.vmem [shape: f32[1,512], index: 2, kind: input, shape index: {}]   ;;  %s4204_s3 = inlined_call_operand.hbm [shape: bf16[128,512], index: 3, kind: input, shape index: {}]   ;;  %s4205_s4 = inlined_call_operand.vmem [shape: bf16[1,8,8,128], index: 4, kind: output, shape index: {}]  }
   0x1   :  { %s21_s16 = sshll.u32 %s3482_s15, 4  ;;  %s3458_s19 = scalar_lea.hbm %s4204_s3, 4096  ;;  %s22_s16 = int_to_ptr.vmem [resolvable:$true] %s21_s16 }
   0x2   :  { %p3459_p0 = scmp.ne.s32.totalorder %s4204_s3, %s3458_s19  ;;  %p3462_p1 = scmp.lt.u32.totalorder %s3458_s19, %s4204_s3 }
   0x4   :  { %p3464_p2 = pnand %p3462_p1, %p3459_p0 }
   0x6   :  { %3467 = shalt.err (!%p3464_p2)
}
   0x7   :  { %s3468_s24 = scalar_lea.vmem %s22_s16, 4096  ;;  %p3473_p4 = scmp.lt.s32.totalorder %s22_s16, %s22_s16 }
   0x8   :  { %p3469_p3 = scmp.ne.s32.totalorder %s22_s16, %s3468_s24  ;;  %p3474_p5 = scmp.lt.s32.totalorder %s3468_s24, %s3468_s24 }
   0xa   :  { %p3475_p6 = por %p3474_p5, %p3473_p4 }
   0xc   :  { %p3476_p7 = pnand %p3475_p6, %p3469_p3 }
   0xe   :  { %3479 = shalt.err (!%p3476_p7)
}
   0xf   :  { %s3483_s25 = smov 256   ;;  %s3484_s26 = smov 16  }
  0x10   :  { %27 = dma.hbm_to_vmem [thread:$0]  %s4204_s3, 4096, %s22_s16, [#allocation6], %s3483_s25, %s3483_s25, %s3484_s26  }
  0x11   :  { %3480 = dma.done.wait [#allocation6], 4096  }
  0x12   :  { %3481 = vsyncadd [#allocation6], 4294963200  ;;  %v4206_v0 = vmov 0   ;;  %v3230_v1 = vld [vmem:[%s4202_s1 + $0x4] ss:$16 sps:$4 sm:$0xff]   ;;  %v3291_v44 = vld [vmem:[%s4201_s0 + $0x8] sm:$0xff]  }
  0x13   :  { %316 = vmatprep.mubr.bf16.mxu0 %v4206_v0  ;;  %389 = vmatprep.mubr.bf16.mxu1 %v4206_v0  ;;  %v3232_v2 = vld [vmem:[%s4202_s1 + $0xc] ss:$16 sps:$4 sm:$0xff]   ;;  %v3234_v3 = vld [vmem:[%s4202_s1] ss:$16 sps:$4 sm:$0xff]   ;;  %v3235_v4 = vld [vmem:[%s4202_s1 + $0x8] ss:$16 sps:$4 sm:$0xff]  }
  0x14   :  { %284 = vmatprep.subr.bf16.mxu0 %v3230_v1  ;;  %357 = vmatprep.subr.bf16.mxu1 %v3232_v2  ;;  %v3236_v5 = vld [vmem:[%s4202_s1 + $0x24] ss:$16 sps:$4 sm:$0xff]   ;;  %v3238_v6 = vld [vmem:[%s4202_s1 + $0x2c] ss:$16 sps:$4 sm:$0xff]   ;;  %v3240_v7 = vld [vmem:[%s4202_s1 + $0x20] ss:$16 sps:$4 sm:$0xff]  }
  0x15   :  { %285 = vmatpush1.bf16.msra.mxu0 %v3234_v3  ;;  %358 = vmatpush1.bf16.msra.mxu1 %v3235_v4  ;;  %v3241_v8 = vld [vmem:[%s4202_s1 + $0x28] ss:$16 sps:$4 sm:$0xff]   ;;  %v3242_v9 = vld [vmem:[%s4202_s1 + $0x44] ss:$16 sps:$4 sm:$0xff]   ;;  %v3244_v10 = vld [vmem:[%s4202_s1 + $0x4c] ss:$16 sps:$4 sm:$0xff]  }
  0x16   :  { %286 = vmatprep.subr.bf16.mxu0 %v3236_v5  ;;  %359 = vmatprep.subr.bf16.mxu1 %v3238_v6  ;;  %v3246_v11 = vld [vmem:[%s4202_s1 + $0x40] ss:$16 sps:$4 sm:$0xff]   ;;  %v3247_v12 = vld [vmem:[%s4202_s1 + $0x48] ss:$16 sps:$4 sm:$0xff]   ;;  %v3248_v13 = vld [vmem:[%s4202_s1 + $0x64] ss:$16 sps:$4 sm:$0xff]  }
  0x17   :  { %v3250_v14 = vld [vmem:[%s4202_s1 + $0x6c] ss:$16 sps:$4 sm:$0xff]   ;;  %v3252_v15 = vld [vmem:[%s4202_s1 + $0x60] ss:$16 sps:$4 sm:$0xff]   ;;  %v3253_v16 = vld [vmem:[%s4202_s1 + $0x68] ss:$16 sps:$4 sm:$0xff]  }
  0x18   :  { %v3254_v17 = vld [vmem:[%s4202_s1 + $0x84] ss:$16 sps:$4 sm:$0xff]   ;;  %v3256_v18 = vld [vmem:[%s4202_s1 + $0x8c] ss:$16 sps:$4 sm:$0xff]   ;;  %v3258_v19 = vld [vmem:[%s4202_s1 + $0x80] ss:$16 sps:$4 sm:$0xff]  }
  0x19   :  { %287 = vmatpush1.bf16.msra.mxu0 %v3240_v7  ;;  %360 = vmatpush1.bf16.msra.mxu1 %v3241_v8  ;;  %v3259_v20 = vld [vmem:[%s4202_s1 + $0x88] ss:$16 sps:$4 sm:$0xff]   ;;  %v3260_v21 = vld [vmem:[%s4202_s1 + $0xa4] ss:$16 sps:$4 sm:$0xff]   ;;  %v3262_v22 = vld [vmem:[%s4202_s1 + $0xac] ss:$16 sps:$4 sm:$0xff]   ;;  %v80_v7 = vlaneseq }
  0x1a   :  { %288 = vmatprep.subr.bf16.mxu0 %v3242_v9  ;;  %361 = vmatprep.subr.bf16.mxu1 %v3244_v10  ;;  %v3264_v23 = vld [vmem:[%s4202_s1 + $0xa0] ss:$16 sps:$4 sm:$0xff]   ;;  %v3265_v24 = vld [vmem:[%s4202_s1 + $0xa8] ss:$16 sps:$4 sm:$0xff]   ;;  %v3266_v25 = vld [vmem:[%s4202_s1 + $0xc4] ss:$16 sps:$4 sm:$0xff]  }
  0x1b   :  { %v3268_v26 = vld [vmem:[%s4202_s1 + $0xcc] ss:$16 sps:$4 sm:$0xff]   ;;  %v3270_v27 = vld [vmem:[%s4202_s1 + $0xc0] ss:$16 sps:$4 sm:$0xff]   ;;  %v3271_v28 = vld [vmem:[%s4202_s1 + $0xc8] ss:$16 sps:$4 sm:$0xff]  }
  0x1c   :  { %v3272_v29 = vld [vmem:[%s4202_s1 + $0xe4] ss:$16 sps:$4 sm:$0xff]   ;;  %v3274_v30 = vld [vmem:[%s4202_s1 + $0xec] ss:$16 sps:$4 sm:$0xff]   ;;  %v3276_v31 = vld [vmem:[%s4202_s1 + $0xe0] ss:$16 sps:$4 sm:$0xff]  }
  0x1d   :  { %289 = vmatpush1.bf16.msra.mxu0 %v3246_v11  ;;  %362 = vmatpush1.bf16.msra.mxu1 %v3247_v12  ;;  %v3277_v32 = vld [vmem:[%s4202_s1 + $0xe8] ss:$16 sps:$4 sm:$0xff]   ;;  %v3622_v33 = vld [vmem:[#allocation5 + $0x4] ss:$16 sps:$4 sm:$0xff]   ;;  %v3624_v34 = vld [vmem:[#allocation5 + $0xc] ss:$16 sps:$4 sm:$0xff]  }
  0x1e   :  { %290 = vmatprep.subr.bf16.mxu0 %v3248_v13  ;;  %363 = vmatprep.subr.bf16.mxu1 %v3250_v14  ;;  %v3278_v35 = vld [vmem:[%s4201_s0] sm:$0xff]   ;;  %v3631_v37 = vld [vmem:[#allocation5 + $0x8] ss:$16 sps:$4 sm:$0xff]   ;;  %v3637_v39 = vld [vmem:[#allocation5 + $0x2c] ss:$16 sps:$4 sm:$0xff]   ;;  %v3486_v6 = vmov 0.0|0.0  }
  0x1f   :  { %v3629_v36 = vld [vmem:[#allocation5] ss:$16 sps:$4 sm:$0xff]   ;;  %v3635_v38 = vld [vmem:[#allocation5 + $0x24] ss:$16 sps:$4 sm:$0xff]   ;;  %v3643_v41 = vld [vmem:[#allocation5 + $0x28] ss:$16 sps:$4 sm:$0xff]  }
  0x20   :  { %v3639_v40 = vld [vmem:[#allocation5 + $0x20] ss:$16 sps:$4 sm:$0xff]   ;;  %v3647_v42 = vld [vmem:[#allocation5 + $0x44] ss:$16 sps:$4 sm:$0xff]   ;;  %v3649_v43 = vld [vmem:[#allocation5 + $0x4c] ss:$16 sps:$4 sm:$0xff]  }
  0x21   :  { %291 = vmatpush1.bf16.msra.mxu0 %v3252_v15  ;;  %364 = vmatpush1.bf16.msra.mxu1 %v3253_v16  ;;  %v3656_v45 = vld [vmem:[#allocation5 + $0x40] ss:$16 sps:$4 sm:$0xff]   ;;  %v3658_v46 = vld [vmem:[#allocation5 + $0x48] ss:$16 sps:$4 sm:$0xff]   ;;  %v3662_v47 = vld [vmem:[#allocation5 + $0x64] ss:$16 sps:$4 sm:$0xff]  }
  0x22   :  { %292 = vmatprep.subr.bf16.mxu0 %v3254_v17  ;;  %365 = vmatprep.subr.bf16.mxu1 %v3256_v18  ;;  %v3666_v48 = vld [vmem:[#allocation5 + $0x6c] ss:$16 sps:$4 sm:$0xff]   ;;  %v3668_v49 = vld [vmem:[#allocation5 + $0x60] ss:$16 sps:$4 sm:$0xff]   ;;  %v3670_v50 = vld [vmem:[#allocation5 + $0x68] ss:$16 sps:$4 sm:$0xff]  }
  0x23   :  { %v3674_v51 = vld [vmem:[#allocation5 + $0x84] ss:$16 sps:$4 sm:$0xff]   ;;  %v3678_v52 = vld [vmem:[#allocation5 + $0x8c] ss:$16 sps:$4 sm:$0xff]   ;;  %v3685_v54 = vld [vmem:[#allocation5 + $0x80] ss:$16 sps:$4 sm:$0xff]  }
  0x24   :  { %v3304_v53 = vld [vmem:[%s4201_s0 + $0x10] sm:$0xff]   ;;  %v3687_v55 = vld [vmem:[#allocation5 + $0x88] ss:$16 sps:$4 sm:$0xff]   ;;  %v3691_v57 = vld [vmem:[#allocation5 + $0xac] ss:$16 sps:$4 sm:$0xff]   ;;  %v81_v8 = vshrl.u32 %v80_v7, 7 }
  0x25   :  { %293 = vmatpush1.bf16.msra.mxu0 %v3258_v19  ;;  %366 = vmatpush1.bf16.msra.mxu1 %v3259_v20  ;;  %v3689_v56 = vld [vmem:[#allocation5 + $0xa4] ss:$16 sps:$4 sm:$0xff]   ;;  %v3697_v58 = vld [vmem:[#allocation5 + $0xa0] ss:$16 sps:$4 sm:$0xff]   ;;  %v3699_v59 = vld [vmem:[#allocation5 + $0xa8] ss:$16 sps:$4 sm:$0xff]  }
  0x26   :  { %294 = vmatprep.subr.bf16.mxu0 %v3260_v21  ;;  %367 = vmatprep.subr.bf16.mxu1 %v3262_v22  ;;  %v3701_v60 = vld [vmem:[#allocation5 + $0xc4] ss:$16 sps:$4 sm:$0xff]   ;;  %v3703_v61 = vld [vmem:[#allocation5 + $0xcc] ss:$16 sps:$4 sm:$0xff]   ;;  %v3714_v63 = vld [vmem:[#allocation5 + $0xc0] ss:$16 sps:$4 sm:$0xff]  }
  0x27   :  { %v3317_v62 = vld [vmem:[%s4201_s0 + $0x18] sm:$0xff]   ;;  %v3718_v2 = vld [vmem:[#allocation5 + $0xe4] ss:$16 sps:$4 sm:$0xff]   ;;  %v3728_v4 = vld [vmem:[#allocation5 + $0xe0] ss:$16 sps:$4 sm:$0xff]   ;;  %v90_v9 = vsub.s32 2, %v81_v8 }
  0x28   :  { %v3716_v1 = vld [vmem:[#allocation5 + $0xc8] ss:$16 sps:$4 sm:$0xff]   ;;  %v3724_v3 = vld [vmem:[#allocation5 + $0xec] ss:$16 sps:$4 sm:$0xff]   ;;  %v94_v10 = vsub.s32 3, %v81_v8  ;;  %v82_v11 = vsub.s32 0, %v81_v8 }
  0x29   :  { %295 = vmatpush1.bf16.msra.mxu0 %v3264_v23  ;;  %368 = vmatpush1.bf16.msra.mxu1 %v3265_v24  ;;  %v3730_v5 = vld [vmem:[#allocation5 + $0xe8] ss:$16 sps:$4 sm:$0xff]   ;;  %v78_v12 = vld [vmem:[%s4203_s2] sm:$0xf]  ;;  %v86_v13 = vsub.s32 1, %v81_v8 }
  0x2a   :  { %296 = vmatprep.subr.bf16.mxu0 %v3266_v25  ;;  %369 = vmatprep.subr.bf16.mxu1 %v3268_v26  ;;  %v3777_v14 = vrot.slane %v78_v12, %v90_v9  ;;  %v3783_v17 = vrot.slane %v78_v12, %v94_v10  ;;  %v83_v18 = vrot.slane %v78_v12, %v82_v11 }
  0x2b   :  { %v87_v21 = vrot.slane %v78_v12, %v86_v13 }
  0x2d   :  { %297 = vmatpush1.bf16.msra.mxu0 %v3270_v27  ;;  %370 = vmatpush1.bf16.msra.mxu1 %v3271_v28 }
  0x2e   :  { %298 = vmatprep.subr.bf16.mxu0 %v3272_v29  ;;  %371 = vmatprep.subr.bf16.mxu1 %v3274_v30 }
  0x31   :  { %299 = vmatpush1.bf16.msra.mxu0 %v3276_v31  ;;  %372 = vmatpush1.bf16.msra.mxu1 %v3277_v32 }
  0x32   :  { %664 = vmatprep.subr.bf16.mxu0 %v3622_v33  ;;  %705 = vmatprep.subr.bf16.mxu1 %v3624_v34 }
  0x34   :  { %317 = vmatmul.mubr.bf16.vlgmr.msra.gmra.mrb[0].mxu0 %v3278_v35  ;;  %390 = vmatmul.mubr.bf16.vlgmr.msra.gmra.mrb[0].mxu1 %v3278_v35 }
  0x35   :  { %665 = vmatpush1.bf16.msra.mxu0 %v3629_v36  ;;  %706 = vmatpush1.bf16.msra.mxu1 %v3631_v37 }
  0x36   :  { %666 = vmatprep.subr.bf16.mxu0 %v3635_v38  ;;  %707 = vmatprep.subr.bf16.mxu1 %v3637_v39 }
  0x37   :  { %326 = vmatprep.mubr.bf16.mxu0 %v4206_v0  ;;  %399 = vmatprep.mubr.bf16.mxu1 %v4206_v0 }
  0x39   :  { %667 = vmatpush1.bf16.msra.mxu0 %v3639_v40  ;;  %708 = vmatpush1.bf16.msra.mxu1 %v3643_v41 }
  0x3a   :  { %668 = vmatprep.subr.bf16.mxu0 %v3647_v42  ;;  %709 = vmatprep.subr.bf16.mxu1 %v3649_v43 }
  0x3c   :  { %327 = vmatmul.mubr.bf16.gmra.mrb[4].mxu0 %v3291_v44  ;;  %400 = vmatmul.mubr.bf16.gmra.mrb[4].mxu1 %v3291_v44 }
  0x3d   :  { %669 = vmatpush1.bf16.msra.mxu0 %v3656_v45  ;;  %710 = vmatpush1.bf16.msra.mxu1 %v3658_v46 }
  0x3e   :  { %670 = vmatprep.subr.bf16.mxu0 %v3662_v47  ;;  %711 = vmatprep.subr.bf16.mxu1 %v3666_v48 }
  0x3f   :  { %336 = vmatprep.mubr.bf16.mxu0 %v4206_v0  ;;  %409 = vmatprep.mubr.bf16.mxu1 %v4206_v0 }
  0x41   :  { %671 = vmatpush1.bf16.msra.mxu0 %v3668_v49  ;;  %712 = vmatpush1.bf16.msra.mxu1 %v3670_v50 }
  0x42   :  { %672 = vmatprep.subr.bf16.mxu0 %v3674_v51  ;;  %713 = vmatprep.subr.bf16.mxu1 %v3678_v52 }
  0x44   :  { %337 = vmatmul.mubr.bf16.gmra.mrb[8].mxu0 %v3304_v53  ;;  %410 = vmatmul.mubr.bf16.gmra.mrb[8].mxu1 %v3304_v53 }
  0x45   :  { %673 = vmatpush1.bf16.msra.mxu0 %v3685_v54  ;;  %714 = vmatpush1.bf16.msra.mxu1 %v3687_v55 }
  0x46   :  { %674 = vmatprep.subr.bf16.mxu0 %v3689_v56  ;;  %715 = vmatprep.subr.bf16.mxu1 %v3691_v57 }
  0x47   :  { %346 = vmatprep.mubr.bf16.mxu0 %v4206_v0  ;;  %419 = vmatprep.mubr.bf16.mxu1 %v4206_v0 }
  0x49   :  { %675 = vmatpush1.bf16.msra.mxu0 %v3697_v58  ;;  %716 = vmatpush1.bf16.msra.mxu1 %v3699_v59 }
  0x4a   :  { %676 = vmatprep.subr.bf16.mxu0 %v3701_v60  ;;  %717 = vmatprep.subr.bf16.mxu1 %v3703_v61 }
  0x4c   :  { %347 = vmatmul.mubr.bf16.gmra.mrb[12].mxu0 %v3317_v62  ;;  %420 = vmatmul.mubr.bf16.gmra.mrb[12].mxu1 %v3317_v62 }
  0x4d   :  { %677 = vmatpush1.bf16.msra.mxu0 %v3714_v63  ;;  %718 = vmatpush1.bf16.msra.mxu1 %v3716_v1 }
  0x4e   :  { %678 = vmatprep.subr.bf16.mxu0 %v3718_v2  ;;  %719 = vmatprep.subr.bf16.mxu1 %v3724_v3 }
  0x4f   :  { %696 = vmatprep.mubr.bf16.mxu0 %v4206_v0  ;;  %737 = vmatprep.mubr.bf16.mxu1 %v4206_v0 }
  0x51   :  { %679 = vmatpush1.bf16.msra.mxu0 %v3728_v4  ;;  %720 = vmatpush1.bf16.msra.mxu1 %v3730_v5 }
  0x52   :  { %969 = vmatprep.subr.bf16.mxu0 %v3622_v33  ;;  %1010 = vmatprep.subr.bf16.mxu1 %v3624_v34 }
  0x54   :  { %697 = vmatmul.mubr.bf16.vlgmr.msra.gmra.mrb[16].mxu0 %v3486_v6  ;;  %738 = vmatmul.mubr.bf16.vlgmr.msra.gmra.mrb[16].mxu1 %v3486_v6 }
  0x55   :  { %970 = vmatpush1.bf16.msra.mxu0 %v3629_v36  ;;  %1011 = vmatpush1.bf16.msra.mxu1 %v3631_v37 }
  0x56   :  { %971 = vmatprep.subr.bf16.mxu0 %v3635_v38  ;;  %1012 = vmatprep.subr.bf16.mxu1 %v3637_v39 }
  0x57   :  { %1001 = vmatprep.mubr.bf16.mxu0 %v4206_v0  ;;  %1042 = vmatprep.mubr.bf16.mxu1 %v4206_v0 }
  0x59   :  { %972 = vmatpush1.bf16.msra.mxu0 %v3639_v40  ;;  %1013 = vmatpush1.bf16.msra.mxu1 %v3643_v41 }
  0x5a   :  { %973 = vmatprep.subr.bf16.mxu0 %v3647_v42  ;;  %1014 = vmatprep.subr.bf16.mxu1 %v3649_v43 }
  0x5d   :  { %974 = vmatpush1.bf16.msra.mxu0 %v3656_v45  ;;  %1015 = vmatpush1.bf16.msra.mxu1 %v3658_v46 }
  0x5e   :  { %975 = vmatprep.subr.bf16.mxu0 %v3662_v47  ;;  %1016 = vmatprep.subr.bf16.mxu1 %v3666_v48 }
  0x61   :  { %976 = vmatpush1.bf16.msra.mxu0 %v3668_v49  ;;  %1017 = vmatpush1.bf16.msra.mxu1 %v3670_v50 }
  0x62   :  { %977 = vmatprep.subr.bf16.mxu0 %v3674_v51  ;;  %1018 = vmatprep.subr.bf16.mxu1 %v3678_v52 }
  0x65   :  { %978 = vmatpush1.bf16.msra.mxu0 %v3685_v54  ;;  %1019 = vmatpush1.bf16.msra.mxu1 %v3687_v55 }
  0x66   :  { %979 = vmatprep.subr.bf16.mxu0 %v3689_v56  ;;  %1020 = vmatprep.subr.bf16.mxu1 %v3691_v57 }
  0x69   :  { %980 = vmatpush1.bf16.msra.mxu0 %v3697_v58  ;;  %1021 = vmatpush1.bf16.msra.mxu1 %v3699_v59 }
  0x6a   :  { %981 = vmatprep.subr.bf16.mxu0 %v3701_v60  ;;  %1022 = vmatprep.subr.bf16.mxu1 %v3703_v61 }
  0x6d   :  { %982 = vmatpush1.bf16.msra.mxu0 %v3714_v63  ;;  %1023 = vmatpush1.bf16.msra.mxu1 %v3716_v1 }
  0x6e   :  { %983 = vmatprep.subr.bf16.mxu0 %v3718_v2  ;;  %1024 = vmatprep.subr.bf16.mxu1 %v3724_v3 }
  0x71   :  { %984 = vmatpush1.bf16.msra.mxu0 %v3728_v4  ;;  %1025 = vmatpush1.bf16.msra.mxu1 %v3730_v5 }
  0x72   :  { %1275 = vmatprep.subr.bf16.mxu0 %v3622_v33  ;;  %1316 = vmatprep.subr.bf16.mxu1 %v3624_v34 }
 0x107   :  { %v3779_v15 = vpop.f32.mrb[0].mxu0  ;;  %v3781_v16 = vpop.f32.mrb[0].mxu1 }
 0x108   :  { %v320_v19 = vpop.f32.mrb[1].mxu0  ;;  %v393_v20 = vpop.f32.mrb[1].mxu1 }
 0x109   :  { %v322_v22 = vpop.f32.mrb[2].mxu0  ;;  %v395_v23 = vpop.f32.mrb[2].mxu1 }
 0x10a   :  { %v3785_v24 = vadd.f32 %v322_v22, %v83_v18  ;;  %v324_v25 = vpop.f32.mrb[3].mxu0  ;;  %v3788_v26 = vadd.f32 %v395_v23, %v3777_v14  ;;  %v397_v27 = vpop.f32.mrb[3].mxu1 }
 0x10b   :  { %v3790_v28 = vadd.f32 %v324_v25, %v87_v21  ;;  %v3793_v29 = vadd.f32 %v397_v27, %v3783_v17 }
 0x10f   :  { %v328_v30 = vpop.f32.mrb[4].mxu0  ;;  %v401_v31 = vpop.f32.mrb[4].mxu1 }
 0x110   :  { %v3795_v32 = vadd.f32 %v328_v30, %v83_v18  ;;  %v330_v35 = vpop.f32.mrb[5].mxu0  ;;  %v3798_v44 = vadd.f32 %v401_v31, %v3777_v14  ;;  %v403_v53 = vpop.f32.mrb[5].mxu1 }
 0x111   :  { %v3800_v62 = vadd.f32 %v330_v35, %v87_v21  ;;  %v332_v6 = vpop.f32.mrb[6].mxu0  ;;  %v3803_v7 = vadd.f32 %v403_v53, %v3783_v17  ;;  %v405_v8 = vpop.f32.mrb[6].mxu1 }
 0x112   :  { %v3805_v9 = vadd.f32 %v332_v6, %v83_v18  ;;  %v334_v10 = vpop.f32.mrb[7].mxu0  ;;  %v3808_v11 = vadd.f32 %v405_v8, %v3777_v14  ;;  %v407_v12 = vpop.f32.mrb[7].mxu1 }
 0x113   :  { %4208 = vst [vmem:[#allocation8_spill] sm:$0xff] %v3803_v7  ;;  %v3810_v13 = vadd.f32 %v334_v10, %v87_v21  ;;  %v3813_v22 = vadd.f32 %v407_v12, %v3783_v17 }
 0x114   :  { %4209 = vst [vmem:[#allocation9_spill] sm:$0xff] %v3805_v9  ;;  %4210 = vst [vmem:[#allocation10_spill] sm:$0xff] %v3808_v11 }
 0x115   :  { %4211 = vst [vmem:[#allocation11_spill] sm:$0xff] %v3810_v13  ;;  %4212 = vst [vmem:[#allocation12_spill] sm:$0xff] %v3813_v22 }
 0x117   :  { %v338_v23 = vpop.f32.mrb[8].mxu0  ;;  %v411_v25 = vpop.f32.mrb[8].mxu1 }
 0x118   :  { %v3815_v27 = vadd.f32 %v338_v23, %v83_v18  ;;  %v340_v30 = vpop.f32.mrb[9].mxu0  ;;  %v3818_v31 = vadd.f32 %v411_v25, %v3777_v14  ;;  %v413_v35 = vpop.f32.mrb[9].mxu1 }
 0x119   :  { %v3820_v53 = vadd.f32 %v340_v30, %v87_v21  ;;  %v342_v6 = vpop.f32.mrb[10].mxu0  ;;  %v3823_v8 = vadd.f32 %v413_v35, %v3783_v17  ;;  %v415_v10 = vpop.f32.mrb[10].mxu1 }
 0x11a   :  { %4213 = vst [vmem:[#allocation13_spill] sm:$0xff] %v3815_v27  ;;  %4214 = vst [vmem:[#allocation14_spill] sm:$0xff] %v3818_v31  ;;  %v3825_v0 = vadd.f32 %v342_v6, %v83_v18  ;;  %v344_v12 = vpop.f32.mrb[11].mxu0  ;;  %v3828_v22 = vadd.f32 %v415_v10, %v3777_v14  ;;  %v417_v23 = vpop.f32.mrb[11].mxu1 }
 0x11b   :  { %4215 = vst [vmem:[#allocation15_spill] sm:$0xff] %v3820_v53  ;;  %4216 = vst [vmem:[#allocation16_spill] sm:$0xff] %v3823_v8  ;;  %v3830_v27 = vadd.f32 %v344_v12, %v87_v21  ;;  %v3833_v25 = vadd.f32 %v417_v23, %v3783_v17 }
 0x11c   :  { %4217 = vst [vmem:[#allocation17_spill] sm:$0xff] %v3825_v0  ;;  %4218 = vst [vmem:[#allocation18_spill] sm:$0xff] %v3828_v22 }
 0x11d   :  { %4219 = vst [vmem:[#allocation19_spill] sm:$0xff] %v3830_v27  ;;  %4220 = vst [vmem:[#allocation20_spill] sm:$0xff] %v3833_v25 }
 0x11f   :  { %v348_v31 = vpop.f32.mrb[12].mxu0  ;;  %v421_v30 = vpop.f32.mrb[12].mxu1 }
 0x120   :  { %v3835_v53 = vadd.f32 %v348_v31, %v83_v18  ;;  %v350_v13 = vpop.f32.mrb[13].mxu0  ;;  %v3838_v35 = vadd.f32 %v421_v30, %v3777_v14  ;;  %v423_v6 = vpop.f32.mrb[13].mxu1 }
 0x121   :  { %v3840_v0 = vadd.f32 %v350_v13, %v87_v21  ;;  %v352_v8 = vpop.f32.mrb[14].mxu0  ;;  %v3843_v10 = vadd.f32 %v423_v6, %v3783_v17  ;;  %v425_v12 = vpop.f32.mrb[14].mxu1  ;;  %v319_v13 = vadd.f32 %v3779_v15, %v83_v18  ;;  %v321_v6 = vadd.f32 %v320_v19, %v87_v21 }
 0x122   :  { %4221 = vst [vmem:[#allocation21_spill] sm:$0xff] %v3835_v53  ;;  %4222 = vst [vmem:[#allocation22_spill] sm:$0xff] %v3838_v35  ;;  %v3845_v27 = vadd.f32 %v352_v8, %v83_v18  ;;  %v354_v23 = vpop.f32.mrb[15].mxu0  ;;  %v3848_v25 = vadd.f32 %v425_v12, %v3777_v14  ;;  %v427_v31 = vpop.f32.mrb[15].mxu1 }
 0x123   :  { %4223 = vst [vmem:[#allocation23_spill] sm:$0xff] %v3840_v0  ;;  %4224 = vst [vmem:[#allocation24_spill] sm:$0xff] %v3843_v10  ;;  %v3850_v53 = vadd.f32 %v354_v23, %v87_v21  ;;  %v3853_v30 = vadd.f32 %v427_v31, %v3783_v17  ;;  %v392_v0 = vadd.f32 %v3781_v16, %v3777_v14 }
 0x124   :  { %4225 = vst [vmem:[#allocation25_spill] sm:$0xff] %v3845_v27  ;;  %4226 = vst [vmem:[#allocation26_spill] sm:$0xff] %v3848_v25  ;;  %v394_v10 = vadd.f32 %v393_v20, %v3783_v17 }
 0x125   :  { %4227 = vst [vmem:[#allocation27_spill] sm:$0xff] %v3850_v53  ;;  %4228 = vst [vmem:[#allocation28_spill] sm:$0xff] %v3853_v30 }
 0x127   :  { %v698_v8 = vpop.f32.mrb[16].mxu0  ;;  %v739_v27 = vpop.f32.mrb[16].mxu1 }
 0x128   :  { %v746_v35 = vadd.f32 %v698_v8, %v319_v13  ;;  %v748_v22 = vadd.f32 %v739_v27, %v392_v0  ;;  %v700_v12 = vpop.f32.mrb[17].mxu0  ;;  %v741_v25 = vpop.f32.mrb[17].mxu1 }
 0x129   :  { %v747_v11 = vadd.f32 %v700_v12, %v321_v6  ;;  %v749_v23 = vadd.f32 %v741_v25, %v394_v10  ;;  %v702_v53 = vpop.f32.mrb[18].mxu0  ;;  %v743_v9 = vpop.f32.mrb[18].mxu1 }
 0x12a   :  { %v750_v31 = vmul.f32 0.5, %v746_v35  ;;  %v703_v30 = vpop.f32.mrb[19].mxu0  ;;  %v744_v7 = vpop.f32.mrb[19].mxu1 }
 0x12b   :  { %v754_v15 = vmul.f32 0.5, %v747_v11  ;;  %v759_v14 = vmul.f32 0.5, %v749_v23  ;;  %v4229_v30 = vmov 0  }
 0x12c   :  { %3378 = vtanh.f32 %v750_v31 }
 0x12d   :  { %3380 = vtanh.f32 %v754_v15 }
 0x12e   :  { %3382 = vtanh.f32 %v748_v22 }
 0x12f   :  { %3384 = vtanh.f32 %v759_v14 }
 0x136   :  { %v3379_v16 = vpop.eup %3378 }
 0x137   :  { %v3381_v17 = vpop.eup %3380  ;;  %v752_v18 = vmul.f32 0.5, %v3379_v16 }
 0x138   :  { %v756_v19 = vmul.f32 0.5, %v3381_v17  ;;  %v3383_v20 = vpop.eup %3382 }
 0x139   :  { %v753_v0 = vadd.f32 0.5, %v752_v18  ;;  %v3385_v7 = vpop.eup %3384 }
 0x13a   :  { %v757_v21 = vadd.f32 0.5, %v756_v19  ;;  %v761_v9 = vmul.f32 0.5, %v3385_v7 }
 0x13b   :  { %v764_v27 = vmul.f32 %v3383_v20, %v753_v0 }
 0x13c   :  { %v763_v25 = vmul.f32 0.0, %v757_v21  ;;  %v762_v11 = vadd.f32 0.5, %v761_v9 }
 0x13e   :  { %v3859_v53 = vadd.f32 %v764_v27, %v763_v25 }
 0x140   :  { %3386 = vtanh.f32 %v3859_v53 }
 0x14a   :  { %v3387_v35 = vpop.eup %3386 }
 0x14b   :  { %v767_v22 = vmul.f32 %v3387_v35, %v762_v11 }
 0x14d   :  { %v768_v10 = vpack.c.bf16 %v767_v22, %v767_v22 }
 0x14f   :  { %769 = vst [vmem:[%s4205_s4] sm:$0xf] %v768_v10  ;;  %1002 = vmatmul.mubr.bf16.vlgmr.msra.gmra.mrb[20].mxu0 %v768_v10  ;;  %1043 = vmatmul.mubr.bf16.vlgmr.msra.gmra.mrb[20].mxu1 %v768_v10 }
 0x150   :  { %1276 = vmatpush1.bf16.msra.mxu0 %v3629_v36  ;;  %1317 = vmatpush1.bf16.msra.mxu1 %v3631_v37 }
 0x151   :  { %1277 = vmatprep.subr.bf16.mxu0 %v3635_v38  ;;  %1318 = vmatprep.subr.bf16.mxu1 %v3637_v39 }
 0x152   :  { %1307 = vmatprep.mubr.bf16.mxu0 %v4229_v30  ;;  %1348 = vmatprep.mubr.bf16.mxu1 %v4229_v30 }
 0x154   :  { %1278 = vmatpush1.bf16.msra.mxu0 %v3639_v40  ;;  %1319 = vmatpush1.bf16.msra.mxu1 %v3643_v41 }
 0x155   :  { %1279 = vmatprep.subr.bf16.mxu0 %v3647_v42  ;;  %1320 = vmatprep.subr.bf16.mxu1 %v3649_v43 }
 0x158   :  { %1280 = vmatpush1.bf16.msra.mxu0 %v3656_v45  ;;  %1321 = vmatpush1.bf16.msra.mxu1 %v3658_v46 }
 0x159   :  { %1281 = vmatprep.subr.bf16.mxu0 %v3662_v47  ;;  %1322 = vmatprep.subr.bf16.mxu1 %v3666_v48 }
 0x15c   :  { %1282 = vmatpush1.bf16.msra.mxu0 %v3668_v49  ;;  %1323 = vmatpush1.bf16.msra.mxu1 %v3670_v50 }
 0x15d   :  { %1283 = vmatprep.subr.bf16.mxu0 %v3674_v51  ;;  %1324 = vmatprep.subr.bf16.mxu1 %v3678_v52 }
 0x160   :  { %1284 = vmatpush1.bf16.msra.mxu0 %v3685_v54  ;;  %1325 = vmatpush1.bf16.msra.mxu1 %v3687_v55 }
 0x161   :  { %1285 = vmatprep.subr.bf16.mxu0 %v3689_v56  ;;  %1326 = vmatprep.subr.bf16.mxu1 %v3691_v57 }
 0x164   :  { %1286 = vmatpush1.bf16.msra.mxu0 %v3697_v58  ;;  %1327 = vmatpush1.bf16.msra.mxu1 %v3699_v59 }
 0x165   :  { %1287 = vmatprep.subr.bf16.mxu0 %v3701_v60  ;;  %1328 = vmatprep.subr.bf16.mxu1 %v3703_v61 }
 0x168   :  { %1288 = vmatpush1.bf16.msra.mxu0 %v3714_v63  ;;  %1329 = vmatpush1.bf16.msra.mxu1 %v3716_v1 }
 0x169   :  { %1289 = vmatprep.subr.bf16.mxu0 %v3718_v2  ;;  %1330 = vmatprep.subr.bf16.mxu1 %v3724_v3 }
 0x16c   :  { %1290 = vmatpush1.bf16.msra.mxu0 %v3728_v4  ;;  %1331 = vmatpush1.bf16.msra.mxu1 %v3730_v5 }
 0x16d   :  { %1581 = vmatprep.subr.bf16.mxu0 %v3622_v33  ;;  %1622 = vmatprep.subr.bf16.mxu1 %v3624_v34 }
 0x222   :  { %v1003_v13 = vpop.f32.mrb[20].mxu0  ;;  %v1044_v6 = vpop.f32.mrb[20].mxu1 }
 0x223   :  { %v1051_v8 = vadd.f32 %v1003_v13, %v3785_v24  ;;  %v1053_v12 = vadd.f32 %v1044_v6, %v3788_v26  ;;  %v1005_v23 = vpop.f32.mrb[21].mxu0  ;;  %v1046_v31 = vpop.f32.mrb[21].mxu1 }
 0x224   :  { %v1052_v15 = vadd.f32 %v1005_v23, %v3790_v28  ;;  %v1054_v14 = vadd.f32 %v1046_v31, %v3793_v29  ;;  %v1007_v16 = vpop.f32.mrb[22].mxu0  ;;  %v1048_v17 = vpop.f32.mrb[22].mxu1  ;;  %v3967_v23 = vld [vmem:[#allocation5 + $0x24] ss:$16 sps:$4 sm:$0xff]   ;;  %v3969_v31 = vld [vmem:[#allocation5 + $0x2c] ss:$16 sps:$4 sm:$0xff]  }
 0x225   :  { %v1055_v18 = vmul.f32 0.5, %v1051_v8  ;;  %v1008_v19 = vpop.f32.mrb[23].mxu0  ;;  %v1049_v0 = vpop.f32.mrb[23].mxu1  ;;  %v3959_v8 = vld [vmem:[#allocation5] ss:$16 sps:$4 sm:$0xff]  }
 0x226   :  { %v1059_v33 = vmul.f32 0.5, %v1052_v15  ;;  %v1064_v34 = vmul.f32 0.5, %v1054_v14  ;;  %v3971_v15 = vld [vmem:[#allocation5 + $0x20] ss:$16 sps:$4 sm:$0xff]   ;;  %v3973_v14 = vld [vmem:[#allocation5 + $0x28] ss:$16 sps:$4 sm:$0xff]  }
 0x227   :  { %3388 = vtanh.f32 %v1055_v18  ;;  %v3979_v16 = vld [vmem:[#allocation5 + $0x44] ss:$16 sps:$4 sm:$0xff]   ;;  %v3981_v17 = vld [vmem:[#allocation5 + $0x4c] ss:$16 sps:$4 sm:$0xff]   ;;  %v3983_v18 = vld [vmem:[#allocation5 + $0x40] ss:$16 sps:$4 sm:$0xff]  }
 0x228   :  { %3390 = vtanh.f32 %v1059_v33  ;;  %v3985_v19 = vld [vmem:[#allocation5 + $0x48] ss:$16 sps:$4 sm:$0xff]   ;;  %v3991_v0 = vld [vmem:[#allocation5 + $0x64] ss:$16 sps:$4 sm:$0xff]   ;;  %v3993_v33 = vld [vmem:[#allocation5 + $0x6c] ss:$16 sps:$4 sm:$0xff]  }
 0x229   :  { %3392 = vtanh.f32 %v1053_v12  ;;  %v3961_v12 = vld [vmem:[#allocation5 + $0x8] ss:$16 sps:$4 sm:$0xff]  }
 0x22a   :  { %3394 = vtanh.f32 %v1064_v34  ;;  %v3995_v34 = vld [vmem:[#allocation5 + $0x60] ss:$16 sps:$4 sm:$0xff]  }
 0x231   :  { %v3389_v20 = vpop.eup %3388 }
 0x232   :  { %v3391_v24 = vpop.eup %3390  ;;  %v1057_v21 = vmul.f32 0.5, %v3389_v20  ;;  %v3997_v20 = vld [vmem:[#allocation5 + $0x68] ss:$16 sps:$4 sm:$0xff]  }
 0x233   :  { %v1061_v26 = vmul.f32 0.5, %v3391_v24  ;;  %v3393_v25 = vpop.eup %3392  ;;  %v4003_v24 = vld [vmem:[#allocation5 + $0x84] ss:$16 sps:$4 sm:$0xff]  }
 0x234   :  { %v1058_v27 = vadd.f32 0.5, %v1057_v21  ;;  %v3395_v11 = vpop.eup %3394  ;;  %v4005_v21 = vld [vmem:[#allocation5 + $0x8c] ss:$16 sps:$4 sm:$0xff]  }
 0x235   :  { %v1062_v28 = vadd.f32 0.5, %v1061_v26  ;;  %v1066_v35 = vmul.f32 0.5, %v3395_v11  ;;  %v4007_v26 = vld [vmem:[#allocation5 + $0x80] ss:$16 sps:$4 sm:$0xff]   ;;  %v4029_v11 = vld [vmem:[#allocation5 + $0xcc] ss:$16 sps:$4 sm:$0xff]  }
 0x236   :  { %v1069_v7 = vmul.f32 %v3393_v25, %v1058_v27  ;;  %v4009_v27 = vld [vmem:[#allocation5 + $0x88] ss:$16 sps:$4 sm:$0xff]   ;;  %v4015_v25 = vld [vmem:[#allocation5 + $0xa4] ss:$16 sps:$4 sm:$0xff]  }
 0x237   :  { %v1068_v29 = vmul.f32 %v1062_v28, %v3859_v53  ;;  %v1067_v22 = vadd.f32 0.5, %v1066_v35  ;;  %v3957_v53 = vld [vmem:[#allocation5 + $0xc] ss:$16 sps:$4 sm:$0xff]   ;;  %v4031_v35 = vld [vmem:[#allocation5 + $0xc0] ss:$16 sps:$4 sm:$0xff]  }
 0x238   :  { %v4017_v28 = vld [vmem:[#allocation5 + $0xac] ss:$16 sps:$4 sm:$0xff]  }
 0x239   :  { %v3904_v9 = vadd.f32 %v1069_v7, %v1068_v29  ;;  %v4019_v7 = vld [vmem:[#allocation5 + $0xa0] ss:$16 sps:$4 sm:$0xff]   ;;  %v4021_v29 = vld [vmem:[#allocation5 + $0xa8] ss:$16 sps:$4 sm:$0xff]  }
 0x23b   :  { %3396 = vtanh.f32 %v3904_v9 }
 0x245   :  { %v3397_v10 = vpop.eup %3396 }
 0x246   :  { %v1072_v13 = vmul.f32 %v3397_v10, %v1067_v22  ;;  %v4033_v22 = vld [vmem:[#allocation5 + $0xc8] ss:$16 sps:$4 sm:$0xff]   ;;  %v4039_v10 = vld [vmem:[#allocation5 + $0xe4] ss:$16 sps:$4 sm:$0xff]  }
 0x248   :  { %v1073_v6 = vpack.c.bf16 %v1072_v13, %v1072_v13  ;;  %v4041_v13 = vld [vmem:[#allocation5 + $0xec] ss:$16 sps:$4 sm:$0xff]  }
 0x24a   :  { %3026 = vst [vmem:[%s4205_s4 + $0x4] sm:$0xf] %v1073_v6  ;;  %1308 = vmatmul.mubr.bf16.vlgmr.msra.gmra.mrb[24].mxu0 %v1073_v6  ;;  %1349 = vmatmul.mubr.bf16.vlgmr.msra.gmra.mrb[24].mxu1 %v1073_v6  ;;  %v4043_v6 = vld [vmem:[#allocation5 + $0xe0] ss:$16 sps:$4 sm:$0xff]  }
 0x24b   :  { %1582 = vmatpush1.bf16.msra.mxu0 %v3629_v36  ;;  %1623 = vmatpush1.bf16.msra.mxu1 %v3631_v37 }
 0x24c   :  { %1583 = vmatprep.subr.bf16.mxu0 %v3635_v38  ;;  %1624 = vmatprep.subr.bf16.mxu1 %v3637_v39 }
 0x24d   :  { %1613 = vmatprep.mubr.bf16.mxu0 %v4229_v30  ;;  %1654 = vmatprep.mubr.bf16.mxu1 %v4229_v30 }
 0x24f   :  { %1584 = vmatpush1.bf16.msra.mxu0 %v3639_v40  ;;  %1625 = vmatpush1.bf16.msra.mxu1 %v3643_v41 }
 0x250   :  { %1585 = vmatprep.subr.bf16.mxu0 %v3647_v42  ;;  %1626 = vmatprep.subr.bf16.mxu1 %v3649_v43  ;;  %v4230_v43 = vld [vmem:[#allocation8_spill] sm:$0xff] }
 0x253   :  { %1586 = vmatpush1.bf16.msra.mxu0 %v3656_v45  ;;  %1627 = vmatpush1.bf16.msra.mxu1 %v3658_v46 }
 0x254   :  { %1587 = vmatprep.subr.bf16.mxu0 %v3662_v47  ;;  %1628 = vmatprep.subr.bf16.mxu1 %v3666_v48 }
 0x257   :  { %1588 = vmatpush1.bf16.msra.mxu0 %v3668_v49  ;;  %1629 = vmatpush1.bf16.msra.mxu1 %v3670_v50 }
 0x258   :  { %1589 = vmatprep.subr.bf16.mxu0 %v3674_v51  ;;  %1630 = vmatprep.subr.bf16.mxu1 %v3678_v52 }
 0x25b   :  { %1590 = vmatpush1.bf16.msra.mxu0 %v3685_v54  ;;  %1631 = vmatpush1.bf16.msra.mxu1 %v3687_v55 }
 0x25c   :  { %1591 = vmatprep.subr.bf16.mxu0 %v3689_v56  ;;  %1632 = vmatprep.subr.bf16.mxu1 %v3691_v57 }
 0x25f   :  { %1592 = vmatpush1.bf16.msra.mxu0 %v3697_v58  ;;  %1633 = vmatpush1.bf16.msra.mxu1 %v3699_v59 }
 0x260   :  { %1593 = vmatprep.subr.bf16.mxu0 %v3701_v60  ;;  %1634 = vmatprep.subr.bf16.mxu1 %v3703_v61 }
 0x263   :  { %1594 = vmatpush1.bf16.msra.mxu0 %v3714_v63  ;;  %1635 = vmatpush1.bf16.msra.mxu1 %v3716_v1 }
 0x264   :  { %1595 = vmatprep.subr.bf16.mxu0 %v3718_v2  ;;  %1636 = vmatprep.subr.bf16.mxu1 %v3724_v3 }
 0x267   :  { %1596 = vmatpush1.bf16.msra.mxu0 %v3728_v4  ;;  %1637 = vmatpush1.bf16.msra.mxu1 %v3730_v5 }
 0x268   :  { %1928 = vmatprep.subr.bf16.mxu1 %v3957_v53 }
 0x31d   :  { %v1309_v36 = vpop.f32.mrb[24].mxu0  ;;  %v1350_v37 = vpop.f32.mrb[24].mxu1 }
 0x31e   :  { %v1357_v38 = vadd.f32 %v1309_v36, %v3795_v32  ;;  %v1359_v39 = vadd.f32 %v1350_v37, %v3798_v44  ;;  %v1311_v40 = vpop.f32.mrb[25].mxu0  ;;  %v1352_v41 = vpop.f32.mrb[25].mxu1  ;;  %v4045_v36 = vld [vmem:[#allocation5 + $0xe8] ss:$16 sps:$4 sm:$0xff]  }
 0x31f   :  { %v1358_v42 = vadd.f32 %v1311_v40, %v3800_v62  ;;  %v1360_v45 = vadd.f32 %v1352_v41, %v4230_v43  ;;  %v1313_v46 = vpop.f32.mrb[26].mxu0  ;;  %v1354_v47 = vpop.f32.mrb[26].mxu1  ;;  %v3955_v62 = vld [vmem:[#allocation5 + $0x4] ss:$16 sps:$4 sm:$0xff]  }
 0x320   :  { %v1361_v48 = vmul.f32 0.5, %v1357_v38  ;;  %v1314_v49 = vpop.f32.mrb[27].mxu0  ;;  %v1355_v50 = vpop.f32.mrb[27].mxu1  ;;  %1887 = vmatprep.subr.bf16.mxu0 %v3955_v62  ;;  %v4232_v41 = vld [vmem:[#allocation10_spill] sm:$0xff]  ;;  %v4233_v46 = vld [vmem:[#allocation11_spill] sm:$0xff] }
 0x321   :  { %v1365_v51 = vmul.f32 0.5, %v1358_v42  ;;  %v1370_v52 = vmul.f32 0.5, %v1360_v45 }
 0x322   :  { %3398 = vtanh.f32 %v1361_v48  ;;  %v4234_v48 = vld [vmem:[#allocation12_spill] sm:$0xff] }
 0x323   :  { %3400 = vtanh.f32 %v1365_v51 }
 0x324   :  { %3402 = vtanh.f32 %v1359_v39  ;;  %v4231_v39 = vld [vmem:[#allocation9_spill] sm:$0xff] }
 0x325   :  { %3404 = vtanh.f32 %v1370_v52 }
 0x32c   :  { %v3399_v54 = vpop.eup %3398 }
 0x32d   :  { %v3401_v55 = vpop.eup %3400  ;;  %v1363_v56 = vmul.f32 0.5, %v3399_v54 }
 0x32e   :  { %v1367_v57 = vmul.f32 0.5, %v3401_v55  ;;  %v3403_v59 = vpop.eup %3402 }
 0x32f   :  { %v1364_v58 = vadd.f32 0.5, %v1363_v56  ;;  %v3405_v2 = vpop.eup %3404 }
 0x330   :  { %v1368_v60 = vadd.f32 0.5, %v1367_v57  ;;  %v1372_v3 = vmul.f32 0.5, %v3405_v2 }
 0x331   :  { %v1375_v61 = vmul.f32 %v3403_v59, %v1364_v58 }
 0x332   :  { %v1374_v63 = vmul.f32 %v1368_v60, %v3904_v9  ;;  %v1373_v4 = vadd.f32 0.5, %v1372_v3  ;;  %v4027_v9 = vld [vmem:[#allocation5 + $0xc4] ss:$16 sps:$4 sm:$0xff]  }
 0x334   :  { %v3947_v1 = vadd.f32 %v1375_v61, %v1374_v63 }
 0x336   :  { %3406 = vtanh.f32 %v3947_v1 }
 0x340   :  { %v3407_v5 = vpop.eup %3406 }
 0x341   :  { %v1378_v32 = vmul.f32 %v3407_v5, %v1373_v4 }
 0x343   :  { %v1379_v44 = vpack.c.bf16 %v1378_v32, %v1378_v32 }
 0x345   :  { %3059 = vst [vmem:[%s4205_s4 + $0x8] sm:$0xf] %v1379_v44  ;;  %1614 = vmatmul.mubr.bf16.vlgmr.msra.gmra.mrb[28].mxu0 %v1379_v44  ;;  %1655 = vmatmul.mubr.bf16.vlgmr.msra.gmra.mrb[28].mxu1 %v1379_v44 }
 0x346   :  { %1919 = vmatprep.mubr.bf16.mxu0 %v4229_v30  ;;  %1960 = vmatprep.mubr.bf16.mxu1 %v4229_v30 }
 0x347   :  { %1888 = vmatpush1.bf16.msra.mxu0 %v3959_v8  ;;  %1929 = vmatpush1.bf16.msra.mxu1 %v3961_v12 }
 0x348   :  { %1889 = vmatprep.subr.bf16.mxu0 %v3967_v23  ;;  %1930 = vmatprep.subr.bf16.mxu1 %v3969_v31 }
 0x34b   :  { %1890 = vmatpush1.bf16.msra.mxu0 %v3971_v15  ;;  %1931 = vmatpush1.bf16.msra.mxu1 %v3973_v14 }
 0x34c   :  { %1891 = vmatprep.subr.bf16.mxu0 %v3979_v16  ;;  %1932 = vmatprep.subr.bf16.mxu1 %v3981_v17 }
 0x34f   :  { %1892 = vmatpush1.bf16.msra.mxu0 %v3983_v18  ;;  %1933 = vmatpush1.bf16.msra.mxu1 %v3985_v19 }
 0x350   :  { %1893 = vmatprep.subr.bf16.mxu0 %v3991_v0  ;;  %1934 = vmatprep.subr.bf16.mxu1 %v3993_v33 }
 0x353   :  { %1894 = vmatpush1.bf16.msra.mxu0 %v3995_v34  ;;  %1935 = vmatpush1.bf16.msra.mxu1 %v3997_v20 }
 0x354   :  { %1895 = vmatprep.subr.bf16.mxu0 %v4003_v24  ;;  %1936 = vmatprep.subr.bf16.mxu1 %v4005_v21 }
 0x357   :  { %1896 = vmatpush1.bf16.msra.mxu0 %v4007_v26  ;;  %1937 = vmatpush1.bf16.msra.mxu1 %v4009_v27 }
 0x358   :  { %1897 = vmatprep.subr.bf16.mxu0 %v4015_v25  ;;  %1938 = vmatprep.subr.bf16.mxu1 %v4017_v28 }
 0x35b   :  { %1898 = vmatpush1.bf16.msra.mxu0 %v4019_v7  ;;  %1939 = vmatpush1.bf16.msra.mxu1 %v4021_v29 }
 0x35c   :  { %1899 = vmatprep.subr.bf16.mxu0 %v4027_v9  ;;  %1940 = vmatprep.subr.bf16.mxu1 %v4029_v11 }
 0x35f   :  { %1900 = vmatpush1.bf16.msra.mxu0 %v4031_v35  ;;  %1941 = vmatpush1.bf16.msra.mxu1 %v4033_v22 }
 0x360   :  { %1901 = vmatprep.subr.bf16.mxu0 %v4039_v10  ;;  %1942 = vmatprep.subr.bf16.mxu1 %v4041_v13 }
 0x363   :  { %1902 = vmatpush1.bf16.msra.mxu0 %v4043_v6  ;;  %1943 = vmatpush1.bf16.msra.mxu1 %v4045_v36 }
 0x364   :  { %2193 = vmatprep.subr.bf16.mxu0 %v3955_v62  ;;  %2234 = vmatprep.subr.bf16.mxu1 %v3957_v53 }
 0x418   :  { %v1615_v37 = vpop.f32.mrb[28].mxu0  ;;  %v1656_v38 = vpop.f32.mrb[28].mxu1 }
 0x419   :  { %v1663_v40 = vadd.f32 %v1615_v37, %v4231_v39  ;;  %v1665_v42 = vadd.f32 %v1656_v38, %v4232_v41  ;;  %v1617_v43 = vpop.f32.mrb[29].mxu0  ;;  %v1658_v45 = vpop.f32.mrb[29].mxu1 }
 0x41a   :  { %v1664_v47 = vadd.f32 %v1617_v43, %v4233_v46  ;;  %v1666_v49 = vadd.f32 %v1658_v45, %v4234_v48  ;;  %v1619_v50 = vpop.f32.mrb[30].mxu0  ;;  %v1660_v51 = vpop.f32.mrb[30].mxu1  ;;  %v4235_v43 = vld [vmem:[#allocation13_spill] sm:$0xff]  ;;  %v4236_v46 = vld [vmem:[#allocation14_spill] sm:$0xff] }
 0x41b   :  { %v1667_v52 = vmul.f32 0.5, %v1663_v40  ;;  %v1620_v54 = vpop.f32.mrb[31].mxu0  ;;  %v1661_v55 = vpop.f32.mrb[31].mxu1  ;;  %v4237_v50 = vld [vmem:[#allocation15_spill] sm:$0xff] }
 0x41c   :  { %v1671_v56 = vmul.f32 0.5, %v1664_v47  ;;  %v1676_v57 = vmul.f32 0.5, %v1666_v49 }
 0x41d   :  { %3408 = vtanh.f32 %v1667_v52  ;;  %v4238_v52 = vld [vmem:[#allocation16_spill] sm:$0xff] }
 0x41e   :  { %3410 = vtanh.f32 %v1671_v56 }
 0x41f   :  { %3412 = vtanh.f32 %v1665_v42 }
 0x420   :  { %3414 = vtanh.f32 %v1676_v57 }
 0x427   :  { %v3409_v58 = vpop.eup %3408 }
 0x428   :  { %v3411_v59 = vpop.eup %3410  ;;  %v1669_v60 = vmul.f32 0.5, %v3409_v58 }
 0x429   :  { %v1673_v61 = vmul.f32 0.5, %v3411_v59  ;;  %v3413_v2 = vpop.eup %3412 }
 0x42a   :  { %v1670_v63 = vadd.f32 0.5, %v1669_v60  ;;  %v3415_v44 = vpop.eup %3414 }
 0x42b   :  { %v1674_v3 = vadd.f32 0.5, %v1673_v61  ;;  %v1678_v37 = vmul.f32 0.5, %v3415_v44 }
 0x42c   :  { %v1681_v4 = vmul.f32 %v3413_v2, %v1670_v63 }
 0x42d   :  { %v1680_v5 = vmul.f32 %v1674_v3, %v3947_v1  ;;  %v1679_v38 = vadd.f32 0.5, %v1678_v37 }
 0x42f   :  { %v4058_v32 = vadd.f32 %v1681_v4, %v1680_v5 }
 0x431   :  { %3416 = vtanh.f32 %v4058_v32 }
 0x43b   :  { %v3417_v39 = vpop.eup %3416 }
 0x43c   :  { %v1684_v40 = vmul.f32 %v3417_v39, %v1679_v38 }
 0x43e   :  { %v1685_v41 = vpack.c.bf16 %v1684_v40, %v1684_v40 }
 0x440   :  { %3092 = vst [vmem:[%s4205_s4 + $0xc] sm:$0xf] %v1685_v41  ;;  %1920 = vmatmul.mubr.bf16.vlgmr.msra.gmra.mrb[32].mxu0 %v1685_v41  ;;  %1961 = vmatmul.mubr.bf16.vlgmr.msra.gmra.mrb[32].mxu1 %v1685_v41 }
 0x441   :  { %2194 = vmatpush1.bf16.msra.mxu0 %v3959_v8  ;;  %2235 = vmatpush1.bf16.msra.mxu1 %v3961_v12 }
 0x442   :  { %2195 = vmatprep.subr.bf16.mxu0 %v3967_v23  ;;  %2236 = vmatprep.subr.bf16.mxu1 %v3969_v31 }
 0x443   :  { %2225 = vmatprep.mubr.bf16.mxu0 %v4229_v30  ;;  %2266 = vmatprep.mubr.bf16.mxu1 %v4229_v30 }
 0x445   :  { %2196 = vmatpush1.bf16.msra.mxu0 %v3971_v15  ;;  %2237 = vmatpush1.bf16.msra.mxu1 %v3973_v14 }
 0x446   :  { %2197 = vmatprep.subr.bf16.mxu0 %v3979_v16  ;;  %2238 = vmatprep.subr.bf16.mxu1 %v3981_v17 }
 0x449   :  { %2198 = vmatpush1.bf16.msra.mxu0 %v3983_v18  ;;  %2239 = vmatpush1.bf16.msra.mxu1 %v3985_v19 }
 0x44a   :  { %2199 = vmatprep.subr.bf16.mxu0 %v3991_v0  ;;  %2240 = vmatprep.subr.bf16.mxu1 %v3993_v33 }
 0x44d   :  { %2200 = vmatpush1.bf16.msra.mxu0 %v3995_v34  ;;  %2241 = vmatpush1.bf16.msra.mxu1 %v3997_v20 }
 0x44e   :  { %2201 = vmatprep.subr.bf16.mxu0 %v4003_v24  ;;  %2242 = vmatprep.subr.bf16.mxu1 %v4005_v21 }
 0x451   :  { %2202 = vmatpush1.bf16.msra.mxu0 %v4007_v26  ;;  %2243 = vmatpush1.bf16.msra.mxu1 %v4009_v27 }
 0x452   :  { %2203 = vmatprep.subr.bf16.mxu0 %v4015_v25  ;;  %2244 = vmatprep.subr.bf16.mxu1 %v4017_v28 }
 0x455   :  { %2204 = vmatpush1.bf16.msra.mxu0 %v4019_v7  ;;  %2245 = vmatpush1.bf16.msra.mxu1 %v4021_v29 }
 0x456   :  { %2205 = vmatprep.subr.bf16.mxu0 %v4027_v9  ;;  %2246 = vmatprep.subr.bf16.mxu1 %v4029_v11 }
 0x459   :  { %2206 = vmatpush1.bf16.msra.mxu0 %v4031_v35  ;;  %2247 = vmatpush1.bf16.msra.mxu1 %v4033_v22 }
 0x45a   :  { %2207 = vmatprep.subr.bf16.mxu0 %v4039_v10  ;;  %2248 = vmatprep.subr.bf16.mxu1 %v4041_v13 }
 0x45d   :  { %2208 = vmatpush1.bf16.msra.mxu0 %v4043_v6  ;;  %2249 = vmatpush1.bf16.msra.mxu1 %v4045_v36 }
 0x45e   :  { %2499 = vmatprep.subr.bf16.mxu0 %v3955_v62  ;;  %2540 = vmatprep.subr.bf16.mxu1 %v3957_v53 }
 0x513   :  { %v1921_v1 = vpop.f32.mrb[32].mxu0  ;;  %v1962_v42 = vpop.f32.mrb[32].mxu1 }
 0x514   :  { %v1969_v45 = vadd.f32 %v1921_v1, %v4235_v43  ;;  %v1971_v47 = vadd.f32 %v1962_v42, %v4236_v46  ;;  %v1923_v48 = vpop.f32.mrb[33].mxu0  ;;  %v1964_v49 = vpop.f32.mrb[33].mxu1 }
 0x515   :  { %v1970_v51 = vadd.f32 %v1923_v48, %v4237_v50  ;;  %v1972_v54 = vadd.f32 %v1964_v49, %v4238_v52  ;;  %v1925_v55 = vpop.f32.mrb[34].mxu0  ;;  %v1966_v56 = vpop.f32.mrb[34].mxu1  ;;  %v4239_v48 = vld [vmem:[#allocation17_spill] sm:$0xff]  ;;  %v4240_v50 = vld [vmem:[#allocation18_spill] sm:$0xff] }
 0x516   :  { %v1973_v57 = vmul.f32 0.5, %v1969_v45  ;;  %v1926_v58 = vpop.f32.mrb[35].mxu0  ;;  %v1967_v59 = vpop.f32.mrb[35].mxu1  ;;  %v4241_v55 = vld [vmem:[#allocation19_spill] sm:$0xff] }
 0x517   :  { %v1977_v60 = vmul.f32 0.5, %v1970_v51  ;;  %v1982_v61 = vmul.f32 0.5, %v1972_v54 }
 0x518   :  { %3418 = vtanh.f32 %v1973_v57  ;;  %v4242_v57 = vld [vmem:[#allocation20_spill] sm:$0xff] }
 0x519   :  { %3420 = vtanh.f32 %v1977_v60 }
 0x51a   :  { %3422 = vtanh.f32 %v1971_v47 }
 0x51b   :  { %3424 = vtanh.f32 %v1982_v61 }
 0x522   :  { %v3419_v63 = vpop.eup %3418 }
 0x523   :  { %v3421_v2 = vpop.eup %3420  ;;  %v1975_v3 = vmul.f32 0.5, %v3419_v63 }
 0x524   :  { %v1979_v4 = vmul.f32 0.5, %v3421_v2  ;;  %v3423_v44 = vpop.eup %3422 }
 0x525   :  { %v1976_v5 = vadd.f32 0.5, %v1975_v3  ;;  %v3425_v41 = vpop.eup %3424 }
 0x526   :  { %v1980_v37 = vadd.f32 0.5, %v1979_v4  ;;  %v1984_v1 = vmul.f32 0.5, %v3425_v41 }
 0x527   :  { %v1987_v38 = vmul.f32 %v3423_v44, %v1976_v5 }
 0x528   :  { %v1986_v39 = vmul.f32 %v1980_v37, %v4058_v32  ;;  %v1985_v42 = vadd.f32 0.5, %v1984_v1 }
 0x52a   :  { %v4103_v40 = vadd.f32 %v1987_v38, %v1986_v39 }
 0x52c   :  { %3426 = vtanh.f32 %v4103_v40 }
 0x536   :  { %v3427_v43 = vpop.eup %3426 }
 0x537   :  { %v1990_v45 = vmul.f32 %v3427_v43, %v1985_v42 }
 0x539   :  { %v1991_v46 = vpack.c.bf16 %v1990_v45, %v1990_v45 }
 0x53b   :  { %3125 = vst [vmem:[%s4205_s4 + $0x10] sm:$0xf] %v1991_v46  ;;  %2226 = vmatmul.mubr.bf16.vlgmr.msra.gmra.mrb[36].mxu0 %v1991_v46  ;;  %2267 = vmatmul.mubr.bf16.vlgmr.msra.gmra.mrb[36].mxu1 %v1991_v46 }
 0x53c   :  { %2500 = vmatpush1.bf16.msra.mxu0 %v3959_v8  ;;  %2541 = vmatpush1.bf16.msra.mxu1 %v3961_v12 }
 0x53d   :  { %2501 = vmatprep.subr.bf16.mxu0 %v3967_v23  ;;  %2542 = vmatprep.subr.bf16.mxu1 %v3969_v31 }
 0x53e   :  { %2531 = vmatprep.mubr.bf16.mxu0 %v4229_v30  ;;  %2572 = vmatprep.mubr.bf16.mxu1 %v4229_v30 }
 0x540   :  { %2502 = vmatpush1.bf16.msra.mxu0 %v3971_v15  ;;  %2543 = vmatpush1.bf16.msra.mxu1 %v3973_v14 }
 0x541   :  { %2503 = vmatprep.subr.bf16.mxu0 %v3979_v16  ;;  %2544 = vmatprep.subr.bf16.mxu1 %v3981_v17 }
 0x544   :  { %2504 = vmatpush1.bf16.msra.mxu0 %v3983_v18  ;;  %2545 = vmatpush1.bf16.msra.mxu1 %v3985_v19 }
 0x545   :  { %2505 = vmatprep.subr.bf16.mxu0 %v3991_v0  ;;  %2546 = vmatprep.subr.bf16.mxu1 %v3993_v33 }
 0x548   :  { %2506 = vmatpush1.bf16.msra.mxu0 %v3995_v34  ;;  %2547 = vmatpush1.bf16.msra.mxu1 %v3997_v20 }
 0x549   :  { %2507 = vmatprep.subr.bf16.mxu0 %v4003_v24  ;;  %2548 = vmatprep.subr.bf16.mxu1 %v4005_v21 }
 0x54c   :  { %2508 = vmatpush1.bf16.msra.mxu0 %v4007_v26  ;;  %2549 = vmatpush1.bf16.msra.mxu1 %v4009_v27 }
 0x54d   :  { %2509 = vmatprep.subr.bf16.mxu0 %v4015_v25  ;;  %2550 = vmatprep.subr.bf16.mxu1 %v4017_v28 }
 0x550   :  { %2510 = vmatpush1.bf16.msra.mxu0 %v4019_v7  ;;  %2551 = vmatpush1.bf16.msra.mxu1 %v4021_v29 }
 0x551   :  { %2511 = vmatprep.subr.bf16.mxu0 %v4027_v9  ;;  %2552 = vmatprep.subr.bf16.mxu1 %v4029_v11 }
 0x554   :  { %2512 = vmatpush1.bf16.msra.mxu0 %v4031_v35  ;;  %2553 = vmatpush1.bf16.msra.mxu1 %v4033_v22 }
 0x555   :  { %2513 = vmatprep.subr.bf16.mxu0 %v4039_v10  ;;  %2554 = vmatprep.subr.bf16.mxu1 %v4041_v13 }
 0x558   :  { %2514 = vmatpush1.bf16.msra.mxu0 %v4043_v6  ;;  %2555 = vmatpush1.bf16.msra.mxu1 %v4045_v36 }
 0x559   :  { %2805 = vmatprep.subr.bf16.mxu0 %v3955_v62  ;;  %2846 = vmatprep.subr.bf16.mxu1 %v3957_v53 }
 0x60e   :  { %v2227_v32 = vpop.f32.mrb[36].mxu0  ;;  %v2268_v47 = vpop.f32.mrb[36].mxu1 }
 0x60f   :  { %v2275_v49 = vadd.f32 %v2227_v32, %v4239_v48  ;;  %v2277_v51 = vadd.f32 %v2268_v47, %v4240_v50  ;;  %v2229_v52 = vpop.f32.mrb[37].mxu0  ;;  %v2270_v54 = vpop.f32.mrb[37].mxu1 }
 0x610   :  { %v2276_v56 = vadd.f32 %v2229_v52, %v4241_v55  ;;  %v2278_v58 = vadd.f32 %v2270_v54, %v4242_v57  ;;  %v2231_v59 = vpop.f32.mrb[38].mxu0  ;;  %v2272_v60 = vpop.f32.mrb[38].mxu1  ;;  %v4247_v55 = vld [vmem:[#allocation25_spill] sm:$0xff]  ;;  %v4248_v57 = vld [vmem:[#allocation26_spill] sm:$0xff] }
 0x611   :  { %v2279_v61 = vmul.f32 0.5, %v2275_v49  ;;  %v2232_v63 = vpop.f32.mrb[39].mxu0  ;;  %v2273_v2 = vpop.f32.mrb[39].mxu1 }
 0x612   :  { %v2283_v62 = vmul.f32 0.5, %v2276_v56  ;;  %v2288_v53 = vmul.f32 0.5, %v2278_v58  ;;  %v4250_v2 = vld [vmem:[#allocation28_spill] sm:$0xff] }
 0x613   :  { %3428 = vtanh.f32 %v2279_v61  ;;  %v4249_v61 = vld [vmem:[#allocation27_spill] sm:$0xff] }
 0x614   :  { %3430 = vtanh.f32 %v2283_v62 }
 0x615   :  { %3432 = vtanh.f32 %v2277_v51 }
 0x616   :  { %3434 = vtanh.f32 %v2288_v53 }
 0x61d   :  { %v3429_v3 = vpop.eup %3428 }
 0x61e   :  { %v3431_v4 = vpop.eup %3430  ;;  %v2281_v5 = vmul.f32 0.5, %v3429_v3 }
 0x61f   :  { %v2285_v44 = vmul.f32 0.5, %v3431_v4  ;;  %v3433_v38 = vpop.eup %3432 }
 0x620   :  { %v2282_v37 = vadd.f32 0.5, %v2281_v5  ;;  %v3435_v43 = vpop.eup %3434 }
 0x621   :  { %v2286_v39 = vadd.f32 0.5, %v2285_v44  ;;  %v2290_v45 = vmul.f32 0.5, %v3435_v43 }
 0x622   :  { %v2293_v41 = vmul.f32 %v3433_v38, %v2282_v37 }
 0x623   :  { %v2292_v1 = vmul.f32 %v2286_v39, %v4103_v40  ;;  %v2291_v46 = vadd.f32 0.5, %v2290_v45 }
 0x625   :  { %v4148_v42 = vadd.f32 %v2293_v41, %v2292_v1 }
 0x627   :  { %3436 = vtanh.f32 %v4148_v42 }
 0x631   :  { %v3437_v32 = vpop.eup %3436 }
 0x632   :  { %v2296_v47 = vmul.f32 %v3437_v32, %v2291_v46 }
 0x634   :  { %v2297_v48 = vpack.c.bf16 %v2296_v47, %v2296_v47 }
 0x636   :  { %3158 = vst [vmem:[%s4205_s4 + $0x14] sm:$0xf] %v2297_v48  ;;  %2532 = vmatmul.mubr.bf16.vlgmr.msra.gmra.mrb[40].mxu0 %v2297_v48  ;;  %2573 = vmatmul.mubr.bf16.vlgmr.msra.gmra.mrb[40].mxu1 %v2297_v48 }
 0x637   :  { %2806 = vmatpush1.bf16.msra.mxu0 %v3959_v8  ;;  %2847 = vmatpush1.bf16.msra.mxu1 %v3961_v12  ;;  %v4243_v12 = vld [vmem:[#allocation21_spill] sm:$0xff] }
 0x638   :  { %2807 = vmatprep.subr.bf16.mxu0 %v3967_v23  ;;  %2848 = vmatprep.subr.bf16.mxu1 %v3969_v31  ;;  %v4244_v31 = vld [vmem:[#allocation22_spill] sm:$0xff] }
 0x639   :  { %2837 = vmatprep.mubr.bf16.mxu0 %v4229_v30  ;;  %2878 = vmatprep.mubr.bf16.mxu1 %v4229_v30 }
 0x63b   :  { %2808 = vmatpush1.bf16.msra.mxu0 %v3971_v15  ;;  %2849 = vmatpush1.bf16.msra.mxu1 %v3973_v14 }
 0x63c   :  { %2809 = vmatprep.subr.bf16.mxu0 %v3979_v16  ;;  %2850 = vmatprep.subr.bf16.mxu1 %v3981_v17  ;;  %v4245_v17 = vld [vmem:[#allocation23_spill] sm:$0xff] }
 0x63f   :  { %2810 = vmatpush1.bf16.msra.mxu0 %v3983_v18  ;;  %2851 = vmatpush1.bf16.msra.mxu1 %v3985_v19  ;;  %v4246_v19 = vld [vmem:[#allocation24_spill] sm:$0xff] }
 0x640   :  { %2811 = vmatprep.subr.bf16.mxu0 %v3991_v0  ;;  %2852 = vmatprep.subr.bf16.mxu1 %v3993_v33 }
 0x643   :  { %2812 = vmatpush1.bf16.msra.mxu0 %v3995_v34  ;;  %2853 = vmatpush1.bf16.msra.mxu1 %v3997_v20 }
 0x644   :  { %2813 = vmatprep.subr.bf16.mxu0 %v4003_v24  ;;  %2854 = vmatprep.subr.bf16.mxu1 %v4005_v21 }
 0x647   :  { %2814 = vmatpush1.bf16.msra.mxu0 %v4007_v26  ;;  %2855 = vmatpush1.bf16.msra.mxu1 %v4009_v27 }
 0x648   :  { %2815 = vmatprep.subr.bf16.mxu0 %v4015_v25  ;;  %2856 = vmatprep.subr.bf16.mxu1 %v4017_v28 }
 0x64b   :  { %2816 = vmatpush1.bf16.msra.mxu0 %v4019_v7  ;;  %2857 = vmatpush1.bf16.msra.mxu1 %v4021_v29 }
 0x64c   :  { %2817 = vmatprep.subr.bf16.mxu0 %v4027_v9  ;;  %2858 = vmatprep.subr.bf16.mxu1 %v4029_v11 }
 0x64f   :  { %2818 = vmatpush1.bf16.msra.mxu0 %v4031_v35  ;;  %2859 = vmatpush1.bf16.msra.mxu1 %v4033_v22 }
 0x650   :  { %2819 = vmatprep.subr.bf16.mxu0 %v4039_v10  ;;  %2860 = vmatprep.subr.bf16.mxu1 %v4041_v13 }
 0x653   :  { %2820 = vmatpush1.bf16.msra.mxu0 %v4043_v6  ;;  %2861 = vmatpush1.bf16.msra.mxu1 %v4045_v36 }
 0x709   :  { %v2533_v30 = vpop.f32.mrb[40].mxu0  ;;  %v2574_v8 = vpop.f32.mrb[40].mxu1 }
 0x70a   :  { %v2581_v23 = vadd.f32 %v2533_v30, %v4243_v12  ;;  %v2583_v15 = vadd.f32 %v2574_v8, %v4244_v31  ;;  %v2535_v14 = vpop.f32.mrb[41].mxu0  ;;  %v2576_v16 = vpop.f32.mrb[41].mxu1 }
 0x70b   :  { %v2582_v18 = vadd.f32 %v2535_v14, %v4245_v17  ;;  %v2584_v0 = vadd.f32 %v2576_v16, %v4246_v19  ;;  %v2537_v33 = vpop.f32.mrb[42].mxu0  ;;  %v2578_v34 = vpop.f32.mrb[42].mxu1 }
 0x70c   :  { %v2585_v20 = vmul.f32 0.5, %v2581_v23  ;;  %v2538_v24 = vpop.f32.mrb[43].mxu0  ;;  %v2579_v21 = vpop.f32.mrb[43].mxu1 }
 0x70d   :  { %v2589_v26 = vmul.f32 0.5, %v2582_v18  ;;  %v2594_v27 = vmul.f32 0.5, %v2584_v0 }
 0x70e   :  { %3438 = vtanh.f32 %v2585_v20 }
 0x70f   :  { %3440 = vtanh.f32 %v2589_v26 }
 0x710   :  { %3442 = vtanh.f32 %v2583_v15 }
 0x711   :  { %3444 = vtanh.f32 %v2594_v27 }
 0x718   :  { %v3439_v25 = vpop.eup %3438 }
 0x719   :  { %v3441_v28 = vpop.eup %3440  ;;  %v2587_v7 = vmul.f32 0.5, %v3439_v25 }
 0x71a   :  { %v2591_v29 = vmul.f32 0.5, %v3441_v28  ;;  %v3443_v11 = vpop.eup %3442 }
 0x71b   :  { %v2588_v9 = vadd.f32 0.5, %v2587_v7  ;;  %v3445_v6 = vpop.eup %3444 }
 0x71c   :  { %v2592_v35 = vadd.f32 0.5, %v2591_v29  ;;  %v2596_v36 = vmul.f32 0.5, %v3445_v6 }
 0x71d   :  { %v2599_v22 = vmul.f32 %v3443_v11, %v2588_v9 }
 0x71e   :  { %v2598_v10 = vmul.f32 %v2592_v35, %v4148_v42  ;;  %v2597_v40 = vadd.f32 0.5, %v2596_v36 }
 0x720   :  { %v2600_v13 = vadd.f32 %v2599_v22, %v2598_v10 }
 0x722   :  { %3446 = vtanh.f32 %v2600_v13 }
 0x72c   :  { %v3447_v49 = vpop.eup %3446 }
 0x72d   :  { %v2602_v50 = vmul.f32 %v3447_v49, %v2597_v40 }
 0x72f   :  { %v2603_v51 = vpack.c.bf16 %v2602_v50, %v2602_v50 }
 0x731   :  { %3191 = vst [vmem:[%s4205_s4 + $0x18] sm:$0xf] %v2603_v51  ;;  %2838 = vmatmul.mubr.bf16.vlgmr.msra.gmra.mrb[44].mxu0 %v2603_v51  ;;  %2879 = vmatmul.mubr.bf16.vlgmr.msra.gmra.mrb[44].mxu1 %v2603_v51 }
 0x804   :  { %v2839_v52 = vpop.f32.mrb[44].mxu0  ;;  %v2880_v54 = vpop.f32.mrb[44].mxu1 }
 0x805   :  { %v2887_v56 = vadd.f32 %v2839_v52, %v4247_v55  ;;  %v2889_v58 = vadd.f32 %v2880_v54, %v4248_v57  ;;  %v2841_v59 = vpop.f32.mrb[45].mxu0  ;;  %v2882_v60 = vpop.f32.mrb[45].mxu1 }
 0x806   :  { %v2888_v63 = vadd.f32 %v2841_v59, %v4249_v61  ;;  %v2890_v62 = vadd.f32 %v2882_v60, %v4250_v2  ;;  %v2843_v53 = vpop.f32.mrb[46].mxu0  ;;  %v2884_v3 = vpop.f32.mrb[46].mxu1 }
 0x807   :  { %v2891_v4 = vmul.f32 0.5, %v2887_v56  ;;  %v2844_v5 = vpop.f32.mrb[47].mxu0  ;;  %v2885_v44 = vpop.f32.mrb[47].mxu1 }
 0x808   :  { %v2895_v37 = vmul.f32 0.5, %v2888_v63  ;;  %v2900_v38 = vmul.f32 0.5, %v2890_v62 }
 0x809   :  { %3448 = vtanh.f32 %v2891_v4 }
 0x80a   :  { %3450 = vtanh.f32 %v2895_v37 }
 0x80b   :  { %3452 = vtanh.f32 %v2889_v58 }
 0x80c   :  { %3454 = vtanh.f32 %v2900_v38 }
 0x813   :  { %v3449_v39 = vpop.eup %3448 }
 0x814   :  { %v3451_v41 = vpop.eup %3450  ;;  %v2893_v1 = vmul.f32 0.5, %v3449_v39 }
 0x815   :  { %v2897_v42 = vmul.f32 0.5, %v3451_v41  ;;  %v3453_v45 = vpop.eup %3452 }
 0x816   :  { %v2894_v43 = vadd.f32 0.5, %v2893_v1  ;;  %v3455_v30 = vpop.eup %3454 }
 0x817   :  { %v2898_v46 = vadd.f32 0.5, %v2897_v42  ;;  %v2902_v8 = vmul.f32 0.5, %v3455_v30 }
 0x818   :  { %v2905_v32 = vmul.f32 %v3453_v45, %v2894_v43 }
 0x819   :  { %v2904_v47 = vmul.f32 %v2898_v46, %v2600_v13  ;;  %v2903_v12 = vadd.f32 0.5, %v2902_v8 }
 0x81b   :  { %v2906_v48 = vadd.f32 %v2905_v32, %v2904_v47 }
 0x81d   :  { %3456 = vtanh.f32 %v2906_v48 }
 0x827   :  { %v3457_v23 = vpop.eup %3456 }
 0x828   :  { %v2908_v31 = vmul.f32 %v3457_v23, %v2903_v12 }
 0x82a   :  { %v2909_v15 = vpack.c.bf16 %v2908_v31, %v2908_v31 }
 0x82c   :  { %3224 = vst [vmem:[%s4205_s4 + $0x1c] sm:$0xf] %v2909_v15 }
 0x82d   :  { %2918 = vsyncpa [#allocation6], 1 }

</bundles_post_ra>
